<compile_context>
chip_gen: v7x
topology: tpu7x:2x2x1
jax: 0.10.0
libtpu: 0.0.40
codegen_flags: <defaults>
</compile_context>

<pallas_src>
import functools

import jax
import jax.numpy as jnp
from jax import lax
from jax.experimental import pallas as pl
from jax.experimental.pallas import tpu as pltpu

# Bone table: (a, b, c) meaning  u = P[a] - P[b],  v = P[c] - P[b]
# (a == -1 denotes the constant X axis; joint-joint differences cancel the
#  root offset, so raw joint positions are used directly).
BONES = (
    (-1, 0, 1), (0, 1, 2), (1, 2, 3), (2, 3, 4),            # thumb chain
    (-1, 0, 5), (0, 5, 6), (5, 6, 7), (6, 7, 8),            # index chain
    (0, 5, 9), (5, 9, 10), (9, 10, 11), (10, 11, 12),       # middle chain
    (5, 9, 13), (9, 13, 14), (13, 14, 15), (14, 15, 16),    # ring chain
    (9, 13, 17), (13, 17, 18), (17, 18, 19), (18, 19, 20),  # pinky chain
    (-1, 0, 17),                                            # END bone
)
NUM_JOINTS = 21
NUM_BONES = len(BONES)          # 21
LANE = 128
SUB = 8                         # sublanes per compute slab (1 f32 vreg deep)
MAX_SB = 128                    # <=16384 samples / grid step (~21 MiB dbl-buf)

IN_ROWS = NUM_JOINTS * 3        # 63
QUAT0 = 0                       # rows [0, 84)
LEN0 = 4 * NUM_BONES            # rows [84, 105)
OUT_ROWS = LEN0 + NUM_BONES     # 105

# Optional numerics-tolerant simplification (review, v7x target): since un/vn
# are already normalized, ||un||*||vn|| ~= 1, so k ~= 1.  Changes low-order
# bits only (well inside 5e-5); default off to match the reference exactly.
APPROX_UNIT_NORM_K = False


def _cdiv(a, b):
    return -(-a // b)


def _quat_kernel(x_ref, out_ref, *, nsub):
    """x_ref: (63, sb, 128) f32,  out_ref: (105, sb, 128) f32."""

    def slab(s, carry):
        off = s * SUB
        if not isinstance(off, int):
            off = pl.multiple_of(off, SUB)
        sl = pl.ds(off, SUB)

        def J(j, c):                       # (SUB, LANE) full-vreg tile
            return x_ref[3 * j + c, sl, :]

        # Cache of already-computed (normalized) edge vectors keyed by (b, c):
        # edge_cache[(b, c)] = (vnx, vny, vnz, vn_sq).  For 18/21 bones the
        # u edge (a, b) is exactly the negation of a cached edge.
        edge_cache = {}

        for i, (a, b, c) in enumerate(BONES):
            bx, by, bz = J(b, 0), J(b, 1), J(b, 2)
            cx, cy, cz = J(c, 0), J(c, 1), J(c, 2)

            vx, vy, vz = cx - bx, cy - by, cz - bz
            v_sq = vx * vx + vy * vy + vz * vz
            inv_v = lax.rsqrt(v_sq)                       # EUP
            out_ref[LEN0 + i, sl, :] = v_sq * inv_v       # ||v||
            vnx, vny, vnz = vx * inv_v, vy * inv_v, vz * inv_v
            if APPROX_UNIT_NORM_K:
                vn_sq = None
            else:
                vn_sq = vnx * vnx + vny * vny + vnz * vnz
            edge_cache[(b, c)] = (vnx, vny, vnz, vn_sq)

            if a == -1:
                # u = X_AXIS (constant); normalize(u) == (1, 0, 0) exactly.
                kcos = vnx
                if APPROX_UNIT_NORM_K:
                    k = 1.0
                else:
                    k = lax.rsqrt(lax.rsqrt(vn_sq))       # (1 * vn_sq) ** 0.25
                qw = kcos + k
                qx = jnp.zeros_like(vnx)
                qy = -vnz
                qz = vny
            else:
                # u = P[a] - P[b] == -(cached edge a->b); reuse its normalized
                # form and fold the negation into kcos / cross-product signs
                # (bit-exact vs. recomputing u, inv_u, un, un_sq).
                pnx, pny, pnz, pn_sq = edge_cache[(a, b)]
                kcos = -(pnx * vnx + pny * vny + pnz * vnz)
                if APPROX_UNIT_NORM_K:
                    k = 1.0
                else:
                    # k = sqrt(||un|| * ||vn||) == (un_sq * vn_sq) ** 0.25
                    k = lax.rsqrt(lax.rsqrt(pn_sq * vn_sq))
                qw = kcos + k
                # cross(un, vn) = cross(-pn, vn) = cross(vn, pn)
                qx = vny * pnz - vnz * pny
                qy = vnz * pnx - vnx * pnz
                qz = vnx * pny - vny * pnx

            inv_q = lax.rsqrt(qw * qw + qx * qx + qy * qy + qz * qz)
            out_ref[QUAT0 + 4 * i + 0, sl, :] = qw * inv_q
            out_ref[QUAT0 + 4 * i + 1, sl, :] = qx * inv_q
            out_ref[QUAT0 + 4 * i + 2, sl, :] = qy * inv_q
            out_ref[QUAT0 + 4 * i + 3, sl, :] = qz * inv_q
        return carry

    if nsub == 1:
        slab(0, 0)
    else:
        # Static trip count; unroll=2 gives the LLO scheduler cross-slab
        # visibility while keeping code size / vreg pressure bounded.
        lax.fori_loop(0, nsub, slab, 0, unroll=2 if nsub % 2 == 0 else 1)


@jax.jit
def quaternion_progress_pallas(data):
    """data: (B, T, 21, 3) f32 -> (root (B,T,3), quats (B,T,84),
                                   theta (B,T,21), lengths (B,T,21))."""
    B, T, J, C = data.shape
    assert J == NUM_JOINTS and C == 3
    N = B * T

    data = data.astype(jnp.float32)
    root = data[:, :, 0, :]                          # result_root_positions

    row_groups = _cdiv(N, LANE)                      # 128-sample groups needed
    sb_full = _cdiv(row_groups, SUB) * SUB
    if sb_full > MAX_SB:
        sb = MAX_SB
    elif sb_full >= 2 * SUB:
        # Prefer >=2 grid steps so the "parallel" axis keeps both v7x
        # TensorCores busy; each step still holds >= one full vreg slab.
        sb = _cdiv(sb_full, 2 * SUB) * SUB
    else:
        sb = sb_full
    rows_padded = _cdiv(row_groups, sb) * sb
    Np = rows_padded * LANE
    nsub = sb // SUB
    grid = (rows_padded // sb,)

    # Feature-major staging (one transpose).  TODO(synk): downstream consumers
    # that can take the (row, lane) layout directly would avoid this HBM pass.
    x = data.reshape(N, IN_ROWS).T                   # (63, N)
    if Np != N:
        # Edge-replicate real samples into padded lanes (no 0/0 -> NaN there).
        x = jnp.pad(x, ((0, 0), (0, Np - N)), mode="edge")
    x = x.reshape(IN_ROWS, rows_padded, LANE)

    out = pl.pallas_call(
        functools.partial(_quat_kernel, nsub=nsub),
        out_shape=jax.ShapeDtypeStruct((OUT_ROWS, rows_padded, LANE),
                                       jnp.float32),
        grid=grid,
        in_specs=[pl.BlockSpec((IN_ROWS, sb, LANE), lambda i: (0, i, 0))],
        out_specs=pl.BlockSpec((OUT_ROWS, sb, LANE), lambda i: (0, i, 0)),
        compiler_params=pltpu.CompilerParams(
            dimension_semantics=("parallel",),
            # ~21 MiB double-buffered at sb=128; exceed v5e's 16 MiB scoped
            # default but stay inside v7x's 64 MiB physical VMEM.
            vmem_limit_bytes=32 * 1024 * 1024),
    )(x)

    out = out.reshape(OUT_ROWS, Np)
    # Slice each result first so XLA can fuse slice + transpose per output.
    quat = out[QUAT0:QUAT0 + 4 * NUM_BONES, :N].T.reshape(B, T, 4 * NUM_BONES)
    lens = out[LEN0:LEN0 + NUM_BONES, :N].T.reshape(B, T, NUM_BONES)
    theta = out[QUAT0:QUAT0 + 4 * NUM_BONES:4, :N].T.reshape(B, T, NUM_BONES)
    return root, quat, theta, lens


def _reference(data):
    """Pure-JAX reference mirroring the PyTorch forward (sanity check)."""
    B, T = data.shape[:2]
    x_axis = jnp.broadcast_to(jnp.array([1.0, 0.0, 0.0], jnp.float32), (B, T, 3))
    roots = data[:, :, 0]
    quats, thetas, lens = [], [], []
    for (a, b, c) in BONES:
        u = x_axis if a == -1 else data[:, :, a] - data[:, :, b]
        v = data[:, :, c] - data[:, :, b]
        un = u / jnp.linalg.norm(u, axis=-1, keepdims=True)
        vn = v / jnp.linalg.norm(v, axis=-1, keepdims=True)
        kcos = jnp.sum(un * vn, axis=-1, keepdims=True)
        k = jnp.sqrt(jnp.linalg.norm(un, axis=-1, keepdims=True) *
                     jnp.linalg.norm(vn, axis=-1, keepdims=True))
        q = jnp.concatenate([kcos + k, jnp.cross(un, vn)], axis=-1)
        qn = q / jnp.linalg.norm(q, axis=-1, keepdims=True)
        quats.append(qn)
        thetas.append(qn[:, :, 0:1])
        lens.append(jnp.linalg.norm(v, axis=-1, keepdims=True))
    return (roots,
            jnp.concatenate(quats, axis=-1),
            jnp.concatenate(thetas, axis=-1),
            jnp.concatenate(lens, axis=-1))


if __name__ == "__main__":
    key = jax.random.PRNGKey(0)
    B, T = 2, 8
    data = jax.random.normal(key, (B, T, NUM_JOINTS, 3), dtype=jnp.float32)

    out = jax.block_until_ready(quaternion_progress_pallas(data))
    ref = _reference(data)
    for got, want in zip(out, ref):
        assert got.shape == want.shape and got.dtype == want.dtype
        # rsqrt-based normalization differs from sqrt+divide only in low bits
        assert jnp.allclose(got, want, atol=5e-5, rtol=5e-5), (
            float(jnp.max(jnp.abs(got - want))))

    print("KERNEL_OK")
</pallas_src>

<mosaic_0001>
module attributes {stable_mosaic.version = 11 : i64} {
  func.func @_quat_kernel(%arg0: i32, %arg1: memref<63x8x128xf32, #tpu.memory_space<vmem>>, %arg2: memref<105x8x128xf32, #tpu.memory_space<vmem>>) attributes {dimension_semantics = [#tpu.dimension_semantics<parallel>], iteration_bounds = array<i64: 1>, scalar_prefetch = 0 : i64, scratch_operands = 0 : i64, tpu.core_type = #tpu.core_type<tc>, window_params = [{transform_indices = @transform_0, window_bounds = array<i64: 63, 8, 128>}, {transform_indices = @transform_1, window_bounds = array<i64: 105, 8, 128>}]} {
    %c0 = arith.constant 0 : index
    %c0_0 = arith.constant 0 : index
    %c0_1 = arith.constant 0 : index
    %0 = vector.load %arg1[%c0, %c0_0, %c0_1] : memref<63x8x128xf32, #tpu.memory_space<vmem>>, vector<1x8x128xf32>
    %1 = vector.shape_cast %0 : vector<1x8x128xf32> to vector<8x128xf32>
    %c1 = arith.constant 1 : index
    %c0_2 = arith.constant 0 : index
    %c0_3 = arith.constant 0 : index
    %2 = vector.load %arg1[%c1, %c0_2, %c0_3] : memref<63x8x128xf32, #tpu.memory_space<vmem>>, vector<1x8x128xf32>
    %3 = vector.shape_cast %2 : vector<1x8x128xf32> to vector<8x128xf32>
    %c2 = arith.constant 2 : index
    %c0_4 = arith.constant 0 : index
    %c0_5 = arith.constant 0 : index
    %4 = vector.load %arg1[%c2, %c0_4, %c0_5] : memref<63x8x128xf32, #tpu.memory_space<vmem>>, vector<1x8x128xf32>
    %5 = vector.shape_cast %4 : vector<1x8x128xf32> to vector<8x128xf32>
    %c3 = arith.constant 3 : index
    %c0_6 = arith.constant 0 : index
    %c0_7 = arith.constant 0 : index
    %6 = vector.load %arg1[%c3, %c0_6, %c0_7] : memref<63x8x128xf32, #tpu.memory_space<vmem>>, vector<1x8x128xf32>
    %7 = vector.shape_cast %6 : vector<1x8x128xf32> to vector<8x128xf32>
    %c4 = arith.constant 4 : index
    %c0_8 = arith.constant 0 : index
    %c0_9 = arith.constant 0 : index
    %8 = vector.load %arg1[%c4, %c0_8, %c0_9] : memref<63x8x128xf32, #tpu.memory_space<vmem>>, vector<1x8x128xf32>
    %9 = vector.shape_cast %8 : vector<1x8x128xf32> to vector<8x128xf32>
    %c5 = arith.constant 5 : index
    %c0_10 = arith.constant 0 : index
    %c0_11 = arith.constant 0 : index
    %10 = vector.load %arg1[%c5, %c0_10, %c0_11] : memref<63x8x128xf32, #tpu.memory_space<vmem>>, vector<1x8x128xf32>
    %11 = vector.shape_cast %10 : vector<1x8x128xf32> to vector<8x128xf32>
    %12 = arith.subf %7, %1 : vector<8x128xf32>
    %13 = arith.subf %9, %3 : vector<8x128xf32>
    %14 = arith.subf %11, %5 : vector<8x128xf32>
    %15 = arith.mulf %12, %12 : vector<8x128xf32>
    %16 = arith.mulf %13, %13 : vector<8x128xf32>
    %17 = arith.addf %15, %16 : vector<8x128xf32>
    %18 = arith.mulf %14, %14 : vector<8x128xf32>
    %19 = arith.addf %17, %18 : vector<8x128xf32>
    %20 = math.rsqrt %19 : vector<8x128xf32>
    %21 = arith.mulf %19, %20 : vector<8x128xf32>
    %c84 = arith.constant 84 : index
    %c0_12 = arith.constant 0 : index
    %c0_13 = arith.constant 0 : index
    %22 = vector.load %arg2[%c84, %c0_12, %c0_13] : memref<105x8x128xf32, #tpu.memory_space<vmem>>, vector<1x8x128xf32>
    %23 = vector.shape_cast %22 : vector<1x8x128xf32> to vector<8x128xf32>
    %24 = vector.shape_cast %21 : vector<8x128xf32> to vector<1x8x128xf32>
    tpu.vector_store %arg2[%c84, %c0_12, %c0_13], %24 {strides = array<i32>} : memref<105x8x128xf32, #tpu.memory_space<vmem>>, vector<1x8x128xf32>,
    %25 = arith.mulf %12, %20 : vector<8x128xf32>
    %26 = arith.mulf %13, %20 : vector<8x128xf32>
    %27 = arith.mulf %14, %20 : vector<8x128xf32>
    %28 = arith.mulf %25, %25 : vector<8x128xf32>
    %29 = arith.mulf %26, %26 : vector<8x128xf32>
    %30 = arith.addf %28, %29 : vector<8x128xf32>
    %31 = arith.mulf %27, %27 : vector<8x128xf32>
    %32 = arith.addf %30, %31 : vector<8x128xf32>
    %33 = math.rsqrt %32 : vector<8x128xf32>
    %34 = math.rsqrt %33 : vector<8x128xf32>
    %35 = arith.addf %25, %34 : vector<8x128xf32>
    %cst = arith.constant 0.000000e+00 : f32
    %36 = vector.broadcast %cst : f32 to vector<8x128xf32>
    %cst_14 = arith.constant 0.000000e+00 : f32
    %37 = vector.broadcast %cst_14 : f32 to vector<8x128xf32>
    %38 = arith.subf %37, %27 : vector<8x128xf32>
    %39 = arith.mulf %35, %35 : vector<8x128xf32>
    %40 = arith.mulf %36, %36 : vector<8x128xf32>
    %41 = arith.addf %39, %40 : vector<8x128xf32>
    %42 = arith.mulf %38, %38 : vector<8x128xf32>
    %43 = arith.addf %41, %42 : vector<8x128xf32>
    %44 = arith.mulf %26, %26 : vector<8x128xf32>
    %45 = arith.addf %43, %44 : vector<8x128xf32>
    %46 = math.rsqrt %45 : vector<8x128xf32>
    %47 = arith.mulf %35, %46 : vector<8x128xf32>
    %c0_15 = arith.constant 0 : index
    %c0_16 = arith.constant 0 : index
    %c0_17 = arith.constant 0 : index
    %48 = vector.load %arg2[%c0_15, %c0_16, %c0_17] : memref<105x8x128xf32, #tpu.memory_space<vmem>>, vector<1x8x128xf32>
    %49 = vector.shape_cast %48 : vector<1x8x128xf32> to vector<8x128xf32>
    %50 = vector.shape_cast %47 : vector<8x128xf32> to vector<1x8x128xf32>
    tpu.vector_store %arg2[%c0_15, %c0_16, %c0_17], %50 {strides = array<i32>} : memref<105x8x128xf32, #tpu.memory_space<vmem>>, vector<1x8x128xf32>,
    %51 = arith.mulf %36, %46 : vector<8x128xf32>
    %c1_18 = arith.constant 1 : index
    %c0_19 = arith.constant 0 : index
    %c0_20 = arith.constant 0 : index
    %52 = vector.load %arg2[%c1_18, %c0_19, %c0_20] : memref<105x8x128xf32, #tpu.memory_space<vmem>>, vector<1x8x128xf32>
    %53 = vector.shape_cast %52 : vector<1x8x128xf32> to vector<8x128xf32>
    %54 = vector.shape_cast %51 : vector<8x128xf32> to vector<1x8x128xf32>
    tpu.vector_store %arg2[%c1_18, %c0_19, %c0_20], %54 {strides = array<i32>} : memref<105x8x128xf32, #tpu.memory_space<vmem>>, vector<1x8x128xf32>,
    %55 = arith.mulf %38, %46 : vector<8x128xf32>
    %c2_21 = arith.constant 2 : index
    %c0_22 = arith.constant 0 : index
    %c0_23 = arith.constant 0 : index
    %56 = vector.load %arg2[%c2_21, %c0_22, %c0_23] : memref<105x8x128xf32, #tpu.memory_space<vmem>>, vector<1x8x128xf32>
    %57 = vector.shape_cast %56 : vector<1x8x128xf32> to vector<8x128xf32>
    %58 = vector.shape_cast %55 : vector<8x128xf32> to vector<1x8x128xf32>
    tpu.vector_store %arg2[%c2_21, %c0_22, %c0_23], %58 {strides = array<i32>} : memref<105x8x128xf32, #tpu.memory_space<vmem>>, vector<1x8x128xf32>,
    %59 = arith.mulf %26, %46 : vector<8x128xf32>
    %c3_24 = arith.constant 3 : index
    %c0_25 = arith.constant 0 : index
    %c0_26 = arith.constant 0 : index
    %60 = vector.load %arg2[%c3_24, %c0_25, %c0_26] : memref<105x8x128xf32, #tpu.memory_space<vmem>>, vector<1x8x128xf32>
    %61 = vector.shape_cast %60 : vector<1x8x128xf32> to vector<8x128xf32>
    %62 = vector.shape_cast %59 : vector<8x128xf32> to vector<1x8x128xf32>
    tpu.vector_store %arg2[%c3_24, %c0_25, %c0_26], %62 {strides = array<i32>} : memref<105x8x128xf32, #tpu.memory_space<vmem>>, vector<1x8x128xf32>,
    %c3_27 = arith.constant 3 : index
    %c0_28 = arith.constant 0 : index
    %c0_29 = arith.constant 0 : index
    %63 = vector.load %arg1[%c3_27, %c0_28, %c0_29] : memref<63x8x128xf32, #tpu.memory_space<vmem>>, vector<1x8x128xf32>
    %64 = vector.shape_cast %63 : vector<1x8x128xf32> to vector<8x128xf32>
    %c4_30 = arith.constant 4 : index
    %c0_31 = arith.constant 0 : index
    %c0_32 = arith.constant 0 : index
    %65 = vector.load %arg1[%c4_30, %c0_31, %c0_32] : memref<63x8x128xf32, #tpu.memory_space<vmem>>, vector<1x8x128xf32>
    %66 = vector.shape_cast %65 : vector<1x8x128xf32> to vector<8x128xf32>
    %c5_33 = arith.constant 5 : index
    %c0_34 = arith.constant 0 : index
    %c0_35 = arith.constant 0 : index
    %67 = vector.load %arg1[%c5_33, %c0_34, %c0_35] : memref<63x8x128xf32, #tpu.memory_space<vmem>>, vector<1x8x128xf32>
    %68 = vector.shape_cast %67 : vector<1x8x128xf32> to vector<8x128xf32>
    %c6 = arith.constant 6 : index
    %c0_36 = arith.constant 0 : index
    %c0_37 = arith.constant 0 : index
    %69 = vector.load %arg1[%c6, %c0_36, %c0_37] : memref<63x8x128xf32, #tpu.memory_space<vmem>>, vector<1x8x128xf32>
    %70 = vector.shape_cast %69 : vector<1x8x128xf32> to vector<8x128xf32>
    %c7 = arith.constant 7 : index
    %c0_38 = arith.constant 0 : index
    %c0_39 = arith.constant 0 : index
    %71 = vector.load %arg1[%c7, %c0_38, %c0_39] : memref<63x8x128xf32, #tpu.memory_space<vmem>>, vector<1x8x128xf32>
    %72 = vector.shape_cast %71 : vector<1x8x128xf32> to vector<8x128xf32>
    %c8 = arith.constant 8 : index
    %c0_40 = arith.constant 0 : index
    %c0_41 = arith.constant 0 : index
    %73 = vector.load %arg1[%c8, %c0_40, %c0_41] : memref<63x8x128xf32, #tpu.memory_space<vmem>>, vector<1x8x128xf32>
    %74 = vector.shape_cast %73 : vector<1x8x128xf32> to vector<8x128xf32>
    %75 = arith.subf %70, %64 : vector<8x128xf32>
    %76 = arith.subf %72, %66 : vector<8x128xf32>
    %77 = arith.subf %74, %68 : vector<8x128xf32>
    %78 = arith.mulf %75, %75 : vector<8x128xf32>
    %79 = arith.mulf %76, %76 : vector<8x128xf32>
    %80 = arith.addf %78, %79 : vector<8x128xf32>
    %81 = arith.mulf %77, %77 : vector<8x128xf32>
    %82 = arith.addf %80, %81 : vector<8x128xf32>
    %83 = math.rsqrt %82 : vector<8x128xf32>
    %84 = arith.mulf %82, %83 : vector<8x128xf32>
    %c85 = arith.constant 85 : index
    %c0_42 = arith.constant 0 : index
    %c0_43 = arith.constant 0 : index
    %85 = vector.load %arg2[%c85, %c0_42, %c0_43] : memref<105x8x128xf32, #tpu.memory_space<vmem>>, vector<1x8x128xf32>
    %86 = vector.shape_cast %85 : vector<1x8x128xf32> to vector<8x128xf32>
    %87 = vector.shape_cast %84 : vector<8x128xf32> to vector<1x8x128xf32>
    tpu.vector_store %arg2[%c85, %c0_42, %c0_43], %87 {strides = array<i32>} : memref<105x8x128xf32, #tpu.memory_space<vmem>>, vector<1x8x128xf32>,
    %88 = arith.mulf %75, %83 : vector<8x128xf32>
    %89 = arith.mulf %76, %83 : vector<8x128xf32>
    %90 = arith.mulf %77, %83 : vector<8x128xf32>
    %91 = arith.mulf %88, %88 : vector<8x128xf32>
    %92 = arith.mulf %89, %89 : vector<8x128xf32>
    %93 = arith.addf %91, %92 : vector<8x128xf32>
    %94 = arith.mulf %90, %90 : vector<8x128xf32>
    %95 = arith.addf %93, %94 : vector<8x128xf32>
    %96 = arith.mulf %25, %88 : vector<8x128xf32>
    %97 = arith.mulf %26, %89 : vector<8x128xf32>
    %98 = arith.addf %96, %97 : vector<8x128xf32>
    %99 = arith.mulf %27, %90 : vector<8x128xf32>
    %100 = arith.addf %98, %99 : vector<8x128xf32>
    %cst_44 = arith.constant 0.000000e+00 : f32
    %101 = vector.broadcast %cst_44 : f32 to vector<8x128xf32>
    %102 = arith.subf %101, %100 : vector<8x128xf32>
    %103 = arith.mulf %32, %95 : vector<8x128xf32>
    %104 = math.rsqrt %103 : vector<8x128xf32>
    %105 = math.rsqrt %104 : vector<8x128xf32>
    %106 = arith.addf %102, %105 : vector<8x128xf32>
    %107 = arith.mulf %89, %27 : vector<8x128xf32>
    %108 = arith.mulf %90, %26 : vector<8x128xf32>
    %109 = arith.subf %107, %108 : vector<8x128xf32>
    %110 = arith.mulf %90, %25 : vector<8x128xf32>
    %111 = arith.mulf %88, %27 : vector<8x128xf32>
    %112 = arith.subf %110, %111 : vector<8x128xf32>
    %113 = arith.mulf %88, %26 : vector<8x128xf32>
    %114 = arith.mulf %89, %25 : vector<8x128xf32>
    %115 = arith.subf %113, %114 : vector<8x128xf32>
    %116 = arith.mulf %106, %106 : vector<8x128xf32>
    %117 = arith.mulf %109, %109 : vector<8x128xf32>
    %118 = arith.addf %116, %117 : vector<8x128xf32>
    %119 = arith.mulf %112, %112 : vector<8x128xf32>
    %120 = arith.addf %118, %119 : vector<8x128xf32>
    %121 = arith.mulf %115, %115 : vector<8x128xf32>
    %122 = arith.addf %120, %121 : vector<8x128xf32>
    %123 = math.rsqrt %122 : vector<8x128xf32>
    %124 = arith.mulf %106, %123 : vector<8x128xf32>
    %c4_45 = arith.constant 4 : index
    %c0_46 = arith.constant 0 : index
    %c0_47 = arith.constant 0 : index
    %125 = vector.load %arg2[%c4_45, %c0_46, %c0_47] : memref<105x8x128xf32, #tpu.memory_space<vmem>>, vector<1x8x128xf32>
    %126 = vector.shape_cast %125 : vector<1x8x128xf32> to vector<8x128xf32>
    %127 = vector.shape_cast %124 : vector<8x128xf32> to vector<1x8x128xf32>
    tpu.vector_store %arg2[%c4_45, %c0_46, %c0_47], %127 {strides = array<i32>} : memref<105x8x128xf32, #tpu.memory_space<vmem>>, vector<1x8x128xf32>,
    %128 = arith.mulf %109, %123 : vector<8x128xf32>
    %c5_48 = arith.constant 5 : index
    %c0_49 = arith.constant 0 : index
    %c0_50 = arith.constant 0 : index
    %129 = vector.load %arg2[%c5_48, %c0_49, %c0_50] : memref<105x8x128xf32, #tpu.memory_space<vmem>>, vector<1x8x128xf32>
    %130 = vector.shape_cast %129 : vector<1x8x128xf32> to vector<8x128xf32>
    %131 = vector.shape_cast %128 : vector<8x128xf32> to vector<1x8x128xf32>
    tpu.vector_store %arg2[%c5_48, %c0_49, %c0_50], %131 {strides = array<i32>} : memref<105x8x128xf32, #tpu.memory_space<vmem>>, vector<1x8x128xf32>,
    %132 = arith.mulf %112, %123 : vector<8x128xf32>
    %c6_51 = arith.constant 6 : index
    %c0_52 = arith.constant 0 : index
    %c0_53 = arith.constant 0 : index
    %133 = vector.load %arg2[%c6_51, %c0_52, %c0_53] : memref<105x8x128xf32, #tpu.memory_space<vmem>>, vector<1x8x128xf32>
    %134 = vector.shape_cast %133 : vector<1x8x128xf32> to vector<8x128xf32>
    %135 = vector.shape_cast %132 : vector<8x128xf32> to vector<1x8x128xf32>
    tpu.vector_store %arg2[%c6_51, %c0_52, %c0_53], %135 {strides = array<i32>} : memref<105x8x128xf32, #tpu.memory_space<vmem>>, vector<1x8x128xf32>,
    %136 = arith.mulf %115, %123 : vector<8x128xf32>
    %c7_54 = arith.constant 7 : index
    %c0_55 = arith.constant 0 : index
    %c0_56 = arith.constant 0 : index
    %137 = vector.load %arg2[%c7_54, %c0_55, %c0_56] : memref<105x8x128xf32, #tpu.memory_space<vmem>>, vector<1x8x128xf32>
    %138 = vector.shape_cast %137 : vector<1x8x128xf32> to vector<8x128xf32>
    %139 = vector.shape_cast %136 : vector<8x128xf32> to vector<1x8x128xf32>
    tpu.vector_store %arg2[%c7_54, %c0_55, %c0_56], %139 {strides = array<i32>} : memref<105x8x128xf32, #tpu.memory_space<vmem>>, vector<1x8x128xf32>,
    %c6_57 = arith.constant 6 : index
    %c0_58 = arith.constant 0 : index
    %c0_59 = arith.constant 0 : index
    %140 = vector.load %arg1[%c6_57, %c0_58, %c0_59] : memref<63x8x128xf32, #tpu.memory_space<vmem>>, vector<1x8x128xf32>
    %141 = vector.shape_cast %140 : vector<1x8x128xf32> to vector<8x128xf32>
    %c7_60 = arith.constant 7 : index
    %c0_61 = arith.constant 0 : index
    %c0_62 = arith.constant 0 : index
    %142 = vector.load %arg1[%c7_60, %c0_61, %c0_62] : memref<63x8x128xf32, #tpu.memory_space<vmem>>, vector<1x8x128xf32>
    %143 = vector.shape_cast %142 : vector<1x8x128xf32> to vector<8x128xf32>
    %c8_63 = arith.constant 8 : index
    %c0_64 = arith.constant 0 : index
    %c0_65 = arith.constant 0 : index
    %144 = vector.load %arg1[%c8_63, %c0_64, %c0_65] : memref<63x8x128xf32, #tpu.memory_space<vmem>>, vector<1x8x128xf32>
    %145 = vector.shape_cast %144 : vector<1x8x128xf32> to vector<8x128xf32>
    %c9 = arith.constant 9 : index
    %c0_66 = arith.constant 0 : index
    %c0_67 = arith.constant 0 : index
    %146 = vector.load %arg1[%c9, %c0_66, %c0_67] : memref<63x8x128xf32, #tpu.memory_space<vmem>>, vector<1x8x128xf32>
    %147 = vector.shape_cast %146 : vector<1x8x128xf32> to vector<8x128xf32>
    %c10 = arith.constant 10 : index
    %c0_68 = arith.constant 0 : index
    %c0_69 = arith.constant 0 : index
    %148 = vector.load %arg1[%c10, %c0_68, %c0_69] : memref<63x8x128xf32, #tpu.memory_space<vmem>>, vector<1x8x128xf32>
    %149 = vector.shape_cast %148 : vector<1x8x128xf32> to vector<8x128xf32>
    %c11 = arith.constant 11 : index
    %c0_70 = arith.constant 0 : index
    %c0_71 = arith.constant 0 : index
    %150 = vector.load %arg1[%c11, %c0_70, %c0_71] : memref<63x8x128xf32, #tpu.memory_space<vmem>>, vector<1x8x128xf32>
    %151 = vector.shape_cast %150 : vector<1x8x128xf32> to vector<8x128xf32>
    %152 = arith.subf %147, %141 : vector<8x128xf32>
    %153 = arith.subf %149, %143 : vector<8x128xf32>
    %154 = arith.subf %151, %145 : vector<8x128xf32>
    %155 = arith.mulf %152, %152 : vector<8x128xf32>
    %156 = arith.mulf %153, %153 : vector<8x128xf32>
    %157 = arith.addf %155, %156 : vector<8x128xf32>
    %158 = arith.mulf %154, %154 : vector<8x128xf32>
    %159 = arith.addf %157, %158 : vector<8x128xf32>
    %160 = math.rsqrt %159 : vector<8x128xf32>
    %161 = arith.mulf %159, %160 : vector<8x128xf32>
    %c86 = arith.constant 86 : index
    %c0_72 = arith.constant 0 : index
    %c0_73 = arith.constant 0 : index
    %162 = vector.load %arg2[%c86, %c0_72, %c0_73] : memref<105x8x128xf32, #tpu.memory_space<vmem>>, vector<1x8x128xf32>
    %163 = vector.shape_cast %162 : vector<1x8x128xf32> to vector<8x128xf32>
    %164 = vector.shape_cast %161 : vector<8x128xf32> to vector<1x8x128xf32>
    tpu.vector_store %arg2[%c86, %c0_72, %c0_73], %164 {strides = array<i32>} : memref<105x8x128xf32, #tpu.memory_space<vmem>>, vector<1x8x128xf32>,
    %165 = arith.mulf %152, %160 : vector<8x128xf32>
    %166 = arith.mulf %153, %160 : vector<8x128xf32>
    %167 = arith.mulf %154, %160 : vector<8x128xf32>
    %168 = arith.mulf %165, %165 : vector<8x128xf32>
    %169 = arith.mulf %166, %166 : vector<8x128xf32>
    %170 = arith.addf %168, %169 : vector<8x128xf32>
    %171 = arith.mulf %167, %167 : vector<8x128xf32>
    %172 = arith.addf %170, %171 : vector<8x128xf32>
    %173 = arith.mulf %88, %165 : vector<8x128xf32>
    %174 = arith.mulf %89, %166 : vector<8x128xf32>
    %175 = arith.addf %173, %174 : vector<8x128xf32>
    %176 = arith.mulf %90, %167 : vector<8x128xf32>
    %177 = arith.addf %175, %176 : vector<8x128xf32>
    %cst_74 = arith.constant 0.000000e+00 : f32
    %178 = vector.broadcast %cst_74 : f32 to vector<8x128xf32>
    %179 = arith.subf %178, %177 : vector<8x128xf32>
    %180 = arith.mulf %95, %172 : vector<8x128xf32>
    %181 = math.rsqrt %180 : vector<8x128xf32>
    %182 = math.rsqrt %181 : vector<8x128xf32>
    %183 = arith.addf %179, %182 : vector<8x128xf32>
    %184 = arith.mulf %166, %90 : vector<8x128xf32>
    %185 = arith.mulf %167, %89 : vector<8x128xf32>
    %186 = arith.subf %184, %185 : vector<8x128xf32>
    %187 = arith.mulf %167, %88 : vector<8x128xf32>
    %188 = arith.mulf %165, %90 : vector<8x128xf32>
    %189 = arith.subf %187, %188 : vector<8x128xf32>
    %190 = arith.mulf %165, %89 : vector<8x128xf32>
    %191 = arith.mulf %166, %88 : vector<8x128xf32>
    %192 = arith.subf %190, %191 : vector<8x128xf32>
    %193 = arith.mulf %183, %183 : vector<8x128xf32>
    %194 = arith.mulf %186, %186 : vector<8x128xf32>
    %195 = arith.addf %193, %194 : vector<8x128xf32>
    %196 = arith.mulf %189, %189 : vector<8x128xf32>
    %197 = arith.addf %195, %196 : vector<8x128xf32>
    %198 = arith.mulf %192, %192 : vector<8x128xf32>
    %199 = arith.addf %197, %198 : vector<8x128xf32>
    %200 = math.rsqrt %199 : vector<8x128xf32>
    %201 = arith.mulf %183, %200 : vector<8x128xf32>
    %c8_75 = arith.constant 8 : index
    %c0_76 = arith.constant 0 : index
    %c0_77 = arith.constant 0 : index
    %202 = vector.load %arg2[%c8_75, %c0_76, %c0_77] : memref<105x8x128xf32, #tpu.memory_space<vmem>>, vector<1x8x128xf32>
    %203 = vector.shape_cast %202 : vector<1x8x128xf32> to vector<8x128xf32>
    %204 = vector.shape_cast %201 : vector<8x128xf32> to vector<1x8x128xf32>
    tpu.vector_store %arg2[%c8_75, %c0_76, %c0_77], %204 {strides = array<i32>} : memref<105x8x128xf32, #tpu.memory_space<vmem>>, vector<1x8x128xf32>,
    %205 = arith.mulf %186, %200 : vector<8x128xf32>
    %c9_78 = arith.constant 9 : index
    %c0_79 = arith.constant 0 : index
    %c0_80 = arith.constant 0 : index
    %206 = vector.load %arg2[%c9_78, %c0_79, %c0_80] : memref<105x8x128xf32, #tpu.memory_space<vmem>>, vector<1x8x128xf32>
    %207 = vector.shape_cast %206 : vector<1x8x128xf32> to vector<8x128xf32>
    %208 = vector.shape_cast %205 : vector<8x128xf32> to vector<1x8x128xf32>
    tpu.vector_store %arg2[%c9_78, %c0_79, %c0_80], %208 {strides = array<i32>} : memref<105x8x128xf32, #tpu.memory_space<vmem>>, vector<1x8x128xf32>,
    %209 = arith.mulf %189, %200 : vector<8x128xf32>
    %c10_81 = arith.constant 10 : index
    %c0_82 = arith.constant 0 : index
    %c0_83 = arith.constant 0 : index
    %210 = vector.load %arg2[%c10_81, %c0_82, %c0_83] : memref<105x8x128xf32, #tpu.memory_space<vmem>>, vector<1x8x128xf32>
    %211 = vector.shape_cast %210 : vector<1x8x128xf32> to vector<8x128xf32>
    %212 = vector.shape_cast %209 : vector<8x128xf32> to vector<1x8x128xf32>
    tpu.vector_store %arg2[%c10_81, %c0_82, %c0_83], %212 {strides = array<i32>} : memref<105x8x128xf32, #tpu.memory_space<vmem>>, vector<1x8x128xf32>,
    %213 = arith.mulf %192, %200 : vector<8x128xf32>
    %c11_84 = arith.constant 11 : index
    %c0_85 = arith.constant 0 : index
    %c0_86 = arith.constant 0 : index
    %214 = vector.load %arg2[%c11_84, %c0_85, %c0_86] : memref<105x8x128xf32, #tpu.memory_space<vmem>>, vector<1x8x128xf32>
    %215 = vector.shape_cast %214 : vector<1x8x128xf32> to vector<8x128xf32>
    %216 = vector.shape_cast %213 : vector<8x128xf32> to vector<1x8x128xf32>
    tpu.vector_store %arg2[%c11_84, %c0_85, %c0_86], %216 {strides = array<i32>} : memref<105x8x128xf32, #tpu.memory_space<vmem>>, vector<1x8x128xf32>,
    %c9_87 = arith.constant 9 : index
    %c0_88 = arith.constant 0 : index
    %c0_89 = arith.constant 0 : index
    %217 = vector.load %arg1[%c9_87, %c0_88, %c0_89] : memref<63x8x128xf32, #tpu.memory_space<vmem>>, vector<1x8x128xf32>
    %218 = vector.shape_cast %217 : vector<1x8x128xf32> to vector<8x128xf32>
    %c10_90 = arith.constant 10 : index
    %c0_91 = arith.constant 0 : index
    %c0_92 = arith.constant 0 : index
    %219 = vector.load %arg1[%c10_90, %c0_91, %c0_92] : memref<63x8x128xf32, #tpu.memory_space<vmem>>, vector<1x8x128xf32>
    %220 = vector.shape_cast %219 : vector<1x8x128xf32> to vector<8x128xf32>
    %c11_93 = arith.constant 11 : index
    %c0_94 = arith.constant 0 : index
    %c0_95 = arith.constant 0 : index
    %221 = vector.load %arg1[%c11_93, %c0_94, %c0_95] : memref<63x8x128xf32, #tpu.memory_space<vmem>>, vector<1x8x128xf32>
    %222 = vector.shape_cast %221 : vector<1x8x128xf32> to vector<8x128xf32>
    %c12 = arith.constant 12 : index
    %c0_96 = arith.constant 0 : index
    %c0_97 = arith.constant 0 : index
    %223 = vector.load %arg1[%c12, %c0_96, %c0_97] : memref<63x8x128xf32, #tpu.memory_space<vmem>>, vector<1x8x128xf32>
    %224 = vector.shape_cast %223 : vector<1x8x128xf32> to vector<8x128xf32>
    %c13 = arith.constant 13 : index
    %c0_98 = arith.constant 0 : index
    %c0_99 = arith.constant 0 : index
    %225 = vector.load %arg1[%c13, %c0_98, %c0_99] : memref<63x8x128xf32, #tpu.memory_space<vmem>>, vector<1x8x128xf32>
    %226 = vector.shape_cast %225 : vector<1x8x128xf32> to vector<8x128xf32>
    %c14 = arith.constant 14 : index
    %c0_100 = arith.constant 0 : index
    %c0_101 = arith.constant 0 : index
    %227 = vector.load %arg1[%c14, %c0_100, %c0_101] : memref<63x8x128xf32, #tpu.memory_space<vmem>>, vector<1x8x128xf32>
    %228 = vector.shape_cast %227 : vector<1x8x128xf32> to vector<8x128xf32>
    %229 = arith.subf %224, %218 : vector<8x128xf32>
    %230 = arith.subf %226, %220 : vector<8x128xf32>
    %231 = arith.subf %228, %222 : vector<8x128xf32>
    %232 = arith.mulf %229, %229 : vector<8x128xf32>
    %233 = arith.mulf %230, %230 : vector<8x128xf32>
    %234 = arith.addf %232, %233 : vector<8x128xf32>
    %235 = arith.mulf %231, %231 : vector<8x128xf32>
    %236 = arith.addf %234, %235 : vector<8x128xf32>
    %237 = math.rsqrt %236 : vector<8x128xf32>
    %238 = arith.mulf %236, %237 : vector<8x128xf32>
    %c87 = arith.constant 87 : index
    %c0_102 = arith.constant 0 : index
    %c0_103 = arith.constant 0 : index
    %239 = vector.load %arg2[%c87, %c0_102, %c0_103] : memref<105x8x128xf32, #tpu.memory_space<vmem>>, vector<1x8x128xf32>
    %240 = vector.shape_cast %239 : vector<1x8x128xf32> to vector<8x128xf32>
    %241 = vector.shape_cast %238 : vector<8x128xf32> to vector<1x8x128xf32>
    tpu.vector_store %arg2[%c87, %c0_102, %c0_103], %241 {strides = array<i32>} : memref<105x8x128xf32, #tpu.memory_space<vmem>>, vector<1x8x128xf32>,
    %242 = arith.mulf %229, %237 : vector<8x128xf32>
    %243 = arith.mulf %230, %237 : vector<8x128xf32>
    %244 = arith.mulf %231, %237 : vector<8x128xf32>
    %245 = arith.mulf %242, %242 : vector<8x128xf32>
    %246 = arith.mulf %243, %243 : vector<8x128xf32>
    %247 = arith.addf %245, %246 : vector<8x128xf32>
    %248 = arith.mulf %244, %244 : vector<8x128xf32>
    %249 = arith.addf %247, %248 : vector<8x128xf32>
    %250 = arith.mulf %165, %242 : vector<8x128xf32>
    %251 = arith.mulf %166, %243 : vector<8x128xf32>
    %252 = arith.addf %250, %251 : vector<8x128xf32>
    %253 = arith.mulf %167, %244 : vector<8x128xf32>
    %254 = arith.addf %252, %253 : vector<8x128xf32>
    %cst_104 = arith.constant 0.000000e+00 : f32
    %255 = vector.broadcast %cst_104 : f32 to vector<8x128xf32>
    %256 = arith.subf %255, %254 : vector<8x128xf32>
    %257 = arith.mulf %172, %249 : vector<8x128xf32>
    %258 = math.rsqrt %257 : vector<8x128xf32>
    %259 = math.rsqrt %258 : vector<8x128xf32>
    %260 = arith.addf %256, %259 : vector<8x128xf32>
    %261 = arith.mulf %243, %167 : vector<8x128xf32>
    %262 = arith.mulf %244, %166 : vector<8x128xf32>
    %263 = arith.subf %261, %262 : vector<8x128xf32>
    %264 = arith.mulf %244, %165 : vector<8x128xf32>
    %265 = arith.mulf %242, %167 : vector<8x128xf32>
    %266 = arith.subf %264, %265 : vector<8x128xf32>
    %267 = arith.mulf %242, %166 : vector<8x128xf32>
    %268 = arith.mulf %243, %165 : vector<8x128xf32>
    %269 = arith.subf %267, %268 : vector<8x128xf32>
    %270 = arith.mulf %260, %260 : vector<8x128xf32>
    %271 = arith.mulf %263, %263 : vector<8x128xf32>
    %272 = arith.addf %270, %271 : vector<8x128xf32>
    %273 = arith.mulf %266, %266 : vector<8x128xf32>
    %274 = arith.addf %272, %273 : vector<8x128xf32>
    %275 = arith.mulf %269, %269 : vector<8x128xf32>
    %276 = arith.addf %274, %275 : vector<8x128xf32>
    %277 = math.rsqrt %276 : vector<8x128xf32>
    %278 = arith.mulf %260, %277 : vector<8x128xf32>
    %c12_105 = arith.constant 12 : index
    %c0_106 = arith.constant 0 : index
    %c0_107 = arith.constant 0 : index
    %279 = vector.load %arg2[%c12_105, %c0_106, %c0_107] : memref<105x8x128xf32, #tpu.memory_space<vmem>>, vector<1x8x128xf32>
    %280 = vector.shape_cast %279 : vector<1x8x128xf32> to vector<8x128xf32>
    %281 = vector.shape_cast %278 : vector<8x128xf32> to vector<1x8x128xf32>
    tpu.vector_store %arg2[%c12_105, %c0_106, %c0_107], %281 {strides = array<i32>} : memref<105x8x128xf32, #tpu.memory_space<vmem>>, vector<1x8x128xf32>,
    %282 = arith.mulf %263, %277 : vector<8x128xf32>
    %c13_108 = arith.constant 13 : index
    %c0_109 = arith.constant 0 : index
    %c0_110 = arith.constant 0 : index
    %283 = vector.load %arg2[%c13_108, %c0_109, %c0_110] : memref<105x8x128xf32, #tpu.memory_space<vmem>>, vector<1x8x128xf32>
    %284 = vector.shape_cast %283 : vector<1x8x128xf32> to vector<8x128xf32>
    %285 = vector.shape_cast %282 : vector<8x128xf32> to vector<1x8x128xf32>
    tpu.vector_store %arg2[%c13_108, %c0_109, %c0_110], %285 {strides = array<i32>} : memref<105x8x128xf32, #tpu.memory_space<vmem>>, vector<1x8x128xf32>,
    %286 = arith.mulf %266, %277 : vector<8x128xf32>
    %c14_111 = arith.constant 14 : index
    %c0_112 = arith.constant 0 : index
    %c0_113 = arith.constant 0 : index
    %287 = vector.load %arg2[%c14_111, %c0_112, %c0_113] : memref<105x8x128xf32, #tpu.memory_space<vmem>>, vector<1x8x128xf32>
    %288 = vector.shape_cast %287 : vector<1x8x128xf32> to vector<8x128xf32>
    %289 = vector.shape_cast %286 : vector<8x128xf32> to vector<1x8x128xf32>
    tpu.vector_store %arg2[%c14_111, %c0_112, %c0_113], %289 {strides = array<i32>} : memref<105x8x128xf32, #tpu.memory_space<vmem>>, vector<1x8x128xf32>,
    %290 = arith.mulf %269, %277 : vector<8x128xf32>
    %c15 = arith.constant 15 : index
    %c0_114 = arith.constant 0 : index
    %c0_115 = arith.constant 0 : index
    %291 = vector.load %arg2[%c15, %c0_114, %c0_115] : memref<105x8x128xf32, #tpu.memory_space<vmem>>, vector<1x8x128xf32>
    %292 = vector.shape_cast %291 : vector<1x8x128xf32> to vector<8x128xf32>
    %293 = vector.shape_cast %290 : vector<8x128xf32> to vector<1x8x128xf32>
    tpu.vector_store %arg2[%c15, %c0_114, %c0_115], %293 {strides = array<i32>} : memref<105x8x128xf32, #tpu.memory_space<vmem>>, vector<1x8x128xf32>,
    %c0_116 = arith.constant 0 : index
    %c0_117 = arith.constant 0 : index
    %c0_118 = arith.constant 0 : index
    %294 = vector.load %arg1[%c0_116, %c0_117, %c0_118] : memref<63x8x128xf32, #tpu.memory_space<vmem>>, vector<1x8x128xf32>
    %295 = vector.shape_cast %294 : vector<1x8x128xf32> to vector<8x128xf32>
    %c1_119 = arith.constant 1 : index
    %c0_120 = arith.constant 0 : index
    %c0_121 = arith.constant 0 : index
    %296 = vector.load %arg1[%c1_119, %c0_120, %c0_121] : memref<63x8x128xf32, #tpu.memory_space<vmem>>, vector<1x8x128xf32>
    %297 = vector.shape_cast %296 : vector<1x8x128xf32> to vector<8x128xf32>
    %c2_122 = arith.constant 2 : index
    %c0_123 = arith.constant 0 : index
    %c0_124 = arith.constant 0 : index
    %298 = vector.load %arg1[%c2_122, %c0_123, %c0_124] : memref<63x8x128xf32, #tpu.memory_space<vmem>>, vector<1x8x128xf32>
    %299 = vector.shape_cast %298 : vector<1x8x128xf32> to vector<8x128xf32>
    %c15_125 = arith.constant 15 : index
    %c0_126 = arith.constant 0 : index
    %c0_127 = arith.constant 0 : index
    %300 = vector.load %arg1[%c15_125, %c0_126, %c0_127] : memref<63x8x128xf32, #tpu.memory_space<vmem>>, vector<1x8x128xf32>
    %301 = vector.shape_cast %300 : vector<1x8x128xf32> to vector<8x128xf32>
    %c16 = arith.constant 16 : index
    %c0_128 = arith.constant 0 : index
    %c0_129 = arith.constant 0 : index
    %302 = vector.load %arg1[%c16, %c0_128, %c0_129] : memref<63x8x128xf32, #tpu.memory_space<vmem>>, vector<1x8x128xf32>
    %303 = vector.shape_cast %302 : vector<1x8x128xf32> to vector<8x128xf32>
    %c17 = arith.constant 17 : index
    %c0_130 = arith.constant 0 : index
    %c0_131 = arith.constant 0 : index
    %304 = vector.load %arg1[%c17, %c0_130, %c0_131] : memref<63x8x128xf32, #tpu.memory_space<vmem>>, vector<1x8x128xf32>
    %305 = vector.shape_cast %304 : vector<1x8x128xf32> to vector<8x128xf32>
    %306 = arith.subf %301, %295 : vector<8x128xf32>
    %307 = arith.subf %303, %297 : vector<8x128xf32>
    %308 = arith.subf %305, %299 : vector<8x128xf32>
    %309 = arith.mulf %306, %306 : vector<8x128xf32>
    %310 = arith.mulf %307, %307 : vector<8x128xf32>
    %311 = arith.addf %309, %310 : vector<8x128xf32>
    %312 = arith.mulf %308, %308 : vector<8x128xf32>
    %313 = arith.addf %311, %312 : vector<8x128xf32>
    %314 = math.rsqrt %313 : vector<8x128xf32>
    %315 = arith.mulf %313, %314 : vector<8x128xf32>
    %c88 = arith.constant 88 : index
    %c0_132 = arith.constant 0 : index
    %c0_133 = arith.constant 0 : index
    %316 = vector.load %arg2[%c88, %c0_132, %c0_133] : memref<105x8x128xf32, #tpu.memory_space<vmem>>, vector<1x8x128xf32>
    %317 = vector.shape_cast %316 : vector<1x8x128xf32> to vector<8x128xf32>
    %318 = vector.shape_cast %315 : vector<8x128xf32> to vector<1x8x128xf32>
    tpu.vector_store %arg2[%c88, %c0_132, %c0_133], %318 {strides = array<i32>} : memref<105x8x128xf32, #tpu.memory_space<vmem>>, vector<1x8x128xf32>,
    %319 = arith.mulf %306, %314 : vector<8x128xf32>
    %320 = arith.mulf %307, %314 : vector<8x128xf32>
    %321 = arith.mulf %308, %314 : vector<8x128xf32>
    %322 = arith.mulf %319, %319 : vector<8x128xf32>
    %323 = arith.mulf %320, %320 : vector<8x128xf32>
    %324 = arith.addf %322, %323 : vector<8x128xf32>
    %325 = arith.mulf %321, %321 : vector<8x128xf32>
    %326 = arith.addf %324, %325 : vector<8x128xf32>
    %327 = math.rsqrt %326 : vector<8x128xf32>
    %328 = math.rsqrt %327 : vector<8x128xf32>
    %329 = arith.addf %319, %328 : vector<8x128xf32>
    %cst_134 = arith.constant 0.000000e+00 : f32
    %330 = vector.broadcast %cst_134 : f32 to vector<8x128xf32>
    %cst_135 = arith.constant 0.000000e+00 : f32
    %331 = vector.broadcast %cst_135 : f32 to vector<8x128xf32>
    %332 = arith.subf %331, %321 : vector<8x128xf32>
    %333 = arith.mulf %329, %329 : vector<8x128xf32>
    %334 = arith.mulf %330, %330 : vector<8x128xf32>
    %335 = arith.addf %333, %334 : vector<8x128xf32>
    %336 = arith.mulf %332, %332 : vector<8x128xf32>
    %337 = arith.addf %335, %336 : vector<8x128xf32>
    %338 = arith.mulf %320, %320 : vector<8x128xf32>
    %339 = arith.addf %337, %338 : vector<8x128xf32>
    %340 = math.rsqrt %339 : vector<8x128xf32>
    %341 = arith.mulf %329, %340 : vector<8x128xf32>
    %c16_136 = arith.constant 16 : index
    %c0_137 = arith.constant 0 : index
    %c0_138 = arith.constant 0 : index
    %342 = vector.load %arg2[%c16_136, %c0_137, %c0_138] : memref<105x8x128xf32, #tpu.memory_space<vmem>>, vector<1x8x128xf32>
    %343 = vector.shape_cast %342 : vector<1x8x128xf32> to vector<8x128xf32>
    %344 = vector.shape_cast %341 : vector<8x128xf32> to vector<1x8x128xf32>
    tpu.vector_store %arg2[%c16_136, %c0_137, %c0_138], %344 {strides = array<i32>} : memref<105x8x128xf32, #tpu.memory_space<vmem>>, vector<1x8x128xf32>,
    %345 = arith.mulf %330, %340 : vector<8x128xf32>
    %c17_139 = arith.constant 17 : index
    %c0_140 = arith.constant 0 : index
    %c0_141 = arith.constant 0 : index
    %346 = vector.load %arg2[%c17_139, %c0_140, %c0_141] : memref<105x8x128xf32, #tpu.memory_space<vmem>>, vector<1x8x128xf32>
    %347 = vector.shape_cast %346 : vector<1x8x128xf32> to vector<8x128xf32>
    %348 = vector.shape_cast %345 : vector<8x128xf32> to vector<1x8x128xf32>
    tpu.vector_store %arg2[%c17_139, %c0_140, %c0_141], %348 {strides = array<i32>} : memref<105x8x128xf32, #tpu.memory_space<vmem>>, vector<1x8x128xf32>,
    %349 = arith.mulf %332, %340 : vector<8x128xf32>
    %c18 = arith.constant 18 : index
    %c0_142 = arith.constant 0 : index
    %c0_143 = arith.constant 0 : index
    %350 = vector.load %arg2[%c18, %c0_142, %c0_143] : memref<105x8x128xf32, #tpu.memory_space<vmem>>, vector<1x8x128xf32>
    %351 = vector.shape_cast %350 : vector<1x8x128xf32> to vector<8x128xf32>
    %352 = vector.shape_cast %349 : vector<8x128xf32> to vector<1x8x128xf32>
    tpu.vector_store %arg2[%c18, %c0_142, %c0_143], %352 {strides = array<i32>} : memref<105x8x128xf32, #tpu.memory_space<vmem>>, vector<1x8x128xf32>,
    %353 = arith.mulf %320, %340 : vector<8x128xf32>
    %c19 = arith.constant 19 : index
    %c0_144 = arith.constant 0 : index
    %c0_145 = arith.constant 0 : index
    %354 = vector.load %arg2[%c19, %c0_144, %c0_145] : memref<105x8x128xf32, #tpu.memory_space<vmem>>, vector<1x8x128xf32>
    %355 = vector.shape_cast %354 : vector<1x8x128xf32> to vector<8x128xf32>
    %356 = vector.shape_cast %353 : vector<8x128xf32> to vector<1x8x128xf32>
    tpu.vector_store %arg2[%c19, %c0_144, %c0_145], %356 {strides = array<i32>} : memref<105x8x128xf32, #tpu.memory_space<vmem>>, vector<1x8x128xf32>,
    %c15_146 = arith.constant 15 : index
    %c0_147 = arith.constant 0 : index
    %c0_148 = arith.constant 0 : index
    %357 = vector.load %arg1[%c15_146, %c0_147, %c0_148] : memref<63x8x128xf32, #tpu.memory_space<vmem>>, vector<1x8x128xf32>
    %358 = vector.shape_cast %357 : vector<1x8x128xf32> to vector<8x128xf32>
    %c16_149 = arith.constant 16 : index
    %c0_150 = arith.constant 0 : index
    %c0_151 = arith.constant 0 : index
    %359 = vector.load %arg1[%c16_149, %c0_150, %c0_151] : memref<63x8x128xf32, #tpu.memory_space<vmem>>, vector<1x8x128xf32>
    %360 = vector.shape_cast %359 : vector<1x8x128xf32> to vector<8x128xf32>
    %c17_152 = arith.constant 17 : index
    %c0_153 = arith.constant 0 : index
    %c0_154 = arith.constant 0 : index
    %361 = vector.load %arg1[%c17_152, %c0_153, %c0_154] : memref<63x8x128xf32, #tpu.memory_space<vmem>>, vector<1x8x128xf32>
    %362 = vector.shape_cast %361 : vector<1x8x128xf32> to vector<8x128xf32>
    %c18_155 = arith.constant 18 : index
    %c0_156 = arith.constant 0 : index
    %c0_157 = arith.constant 0 : index
    %363 = vector.load %arg1[%c18_155, %c0_156, %c0_157] : memref<63x8x128xf32, #tpu.memory_space<vmem>>, vector<1x8x128xf32>
    %364 = vector.shape_cast %363 : vector<1x8x128xf32> to vector<8x128xf32>
    %c19_158 = arith.constant 19 : index
    %c0_159 = arith.constant 0 : index
    %c0_160 = arith.constant 0 : index
    %365 = vector.load %arg1[%c19_158, %c0_159, %c0_160] : memref<63x8x128xf32, #tpu.memory_space<vmem>>, vector<1x8x128xf32>
    %366 = vector.shape_cast %365 : vector<1x8x128xf32> to vector<8x128xf32>
    %c20 = arith.constant 20 : index
    %c0_161 = arith.constant 0 : index
    %c0_162 = arith.constant 0 : index
    %367 = vector.load %arg1[%c20, %c0_161, %c0_162] : memref<63x8x128xf32, #tpu.memory_space<vmem>>, vector<1x8x128xf32>
    %368 = vector.shape_cast %367 : vector<1x8x128xf32> to vector<8x128xf32>
    %369 = arith.subf %364, %358 : vector<8x128xf32>
    %370 = arith.subf %366, %360 : vector<8x128xf32>
    %371 = arith.subf %368, %362 : vector<8x128xf32>
    %372 = arith.mulf %369, %369 : vector<8x128xf32>
    %373 = arith.mulf %370, %370 : vector<8x128xf32>
    %374 = arith.addf %372, %373 : vector<8x128xf32>
    %375 = arith.mulf %371, %371 : vector<8x128xf32>
    %376 = arith.addf %374, %375 : vector<8x128xf32>
    %377 = math.rsqrt %376 : vector<8x128xf32>
    %378 = arith.mulf %376, %377 : vector<8x128xf32>
    %c89 = arith.constant 89 : index
    %c0_163 = arith.constant 0 : index
    %c0_164 = arith.constant 0 : index
    %379 = vector.load %arg2[%c89, %c0_163, %c0_164] : memref<105x8x128xf32, #tpu.memory_space<vmem>>, vector<1x8x128xf32>
    %380 = vector.shape_cast %379 : vector<1x8x128xf32> to vector<8x128xf32>
    %381 = vector.shape_cast %378 : vector<8x128xf32> to vector<1x8x128xf32>
    tpu.vector_store %arg2[%c89, %c0_163, %c0_164], %381 {strides = array<i32>} : memref<105x8x128xf32, #tpu.memory_space<vmem>>, vector<1x8x128xf32>,
    %382 = arith.mulf %369, %377 : vector<8x128xf32>
    %383 = arith.mulf %370, %377 : vector<8x128xf32>
    %384 = arith.mulf %371, %377 : vector<8x128xf32>
    %385 = arith.mulf %382, %382 : vector<8x128xf32>
    %386 = arith.mulf %383, %383 : vector<8x128xf32>
    %387 = arith.addf %385, %386 : vector<8x128xf32>
    %388 = arith.mulf %384, %384 : vector<8x128xf32>
    %389 = arith.addf %387, %388 : vector<8x128xf32>
    %390 = arith.mulf %319, %382 : vector<8x128xf32>
    %391 = arith.mulf %320, %383 : vector<8x128xf32>
    %392 = arith.addf %390, %391 : vector<8x128xf32>
    %393 = arith.mulf %321, %384 : vector<8x128xf32>
    %394 = arith.addf %392, %393 : vector<8x128xf32>
    %cst_165 = arith.constant 0.000000e+00 : f32
    %395 = vector.broadcast %cst_165 : f32 to vector<8x128xf32>
    %396 = arith.subf %395, %394 : vector<8x128xf32>
    %397 = arith.mulf %326, %389 : vector<8x128xf32>
    %398 = math.rsqrt %397 : vector<8x128xf32>
    %399 = math.rsqrt %398 : vector<8x128xf32>
    %400 = arith.addf %396, %399 : vector<8x128xf32>
    %401 = arith.mulf %383, %321 : vector<8x128xf32>
    %402 = arith.mulf %384, %320 : vector<8x128xf32>
    %403 = arith.subf %401, %402 : vector<8x128xf32>
    %404 = arith.mulf %384, %319 : vector<8x128xf32>
    %405 = arith.mulf %382, %321 : vector<8x128xf32>
    %406 = arith.subf %404, %405 : vector<8x128xf32>
    %407 = arith.mulf %382, %320 : vector<8x128xf32>
    %408 = arith.mulf %383, %319 : vector<8x128xf32>
    %409 = arith.subf %407, %408 : vector<8x128xf32>
    %410 = arith.mulf %400, %400 : vector<8x128xf32>
    %411 = arith.mulf %403, %403 : vector<8x128xf32>
    %412 = arith.addf %410, %411 : vector<8x128xf32>
    %413 = arith.mulf %406, %406 : vector<8x128xf32>
    %414 = arith.addf %412, %413 : vector<8x128xf32>
    %415 = arith.mulf %409, %409 : vector<8x128xf32>
    %416 = arith.addf %414, %415 : vector<8x128xf32>
    %417 = math.rsqrt %416 : vector<8x128xf32>
    %418 = arith.mulf %400, %417 : vector<8x128xf32>
    %c20_166 = arith.constant 20 : index
    %c0_167 = arith.constant 0 : index
    %c0_168 = arith.constant 0 : index
    %419 = vector.load %arg2[%c20_166, %c0_167, %c0_168] : memref<105x8x128xf32, #tpu.memory_space<vmem>>, vector<1x8x128xf32>
    %420 = vector.shape_cast %419 : vector<1x8x128xf32> to vector<8x128xf32>
    %421 = vector.shape_cast %418 : vector<8x128xf32> to vector<1x8x128xf32>
    tpu.vector_store %arg2[%c20_166, %c0_167, %c0_168], %421 {strides = array<i32>} : memref<105x8x128xf32, #tpu.memory_space<vmem>>, vector<1x8x128xf32>,
    %422 = arith.mulf %403, %417 : vector<8x128xf32>
    %c21 = arith.constant 21 : index
    %c0_169 = arith.constant 0 : index
    %c0_170 = arith.constant 0 : index
    %423 = vector.load %arg2[%c21, %c0_169, %c0_170] : memref<105x8x128xf32, #tpu.memory_space<vmem>>, vector<1x8x128xf32>
    %424 = vector.shape_cast %423 : vector<1x8x128xf32> to vector<8x128xf32>
    %425 = vector.shape_cast %422 : vector<8x128xf32> to vector<1x8x128xf32>
    tpu.vector_store %arg2[%c21, %c0_169, %c0_170], %425 {strides = array<i32>} : memref<105x8x128xf32, #tpu.memory_space<vmem>>, vector<1x8x128xf32>,
    %426 = arith.mulf %406, %417 : vector<8x128xf32>
    %c22 = arith.constant 22 : index
    %c0_171 = arith.constant 0 : index
    %c0_172 = arith.constant 0 : index
    %427 = vector.load %arg2[%c22, %c0_171, %c0_172] : memref<105x8x128xf32, #tpu.memory_space<vmem>>, vector<1x8x128xf32>
    %428 = vector.shape_cast %427 : vector<1x8x128xf32> to vector<8x128xf32>
    %429 = vector.shape_cast %426 : vector<8x128xf32> to vector<1x8x128xf32>
    tpu.vector_store %arg2[%c22, %c0_171, %c0_172], %429 {strides = array<i32>} : memref<105x8x128xf32, #tpu.memory_space<vmem>>, vector<1x8x128xf32>,
    %430 = arith.mulf %409, %417 : vector<8x128xf32>
    %c23 = arith.constant 23 : index
    %c0_173 = arith.constant 0 : index
    %c0_174 = arith.constant 0 : index
    %431 = vector.load %arg2[%c23, %c0_173, %c0_174] : memref<105x8x128xf32, #tpu.memory_space<vmem>>, vector<1x8x128xf32>
    %432 = vector.shape_cast %431 : vector<1x8x128xf32> to vector<8x128xf32>
    %433 = vector.shape_cast %430 : vector<8x128xf32> to vector<1x8x128xf32>
    tpu.vector_store %arg2[%c23, %c0_173, %c0_174], %433 {strides = array<i32>} : memref<105x8x128xf32, #tpu.memory_space<vmem>>, vector<1x8x128xf32>,
    %c18_175 = arith.constant 18 : index
    %c0_176 = arith.constant 0 : index
    %c0_177 = arith.constant 0 : index
    %434 = vector.load %arg1[%c18_175, %c0_176, %c0_177] : memref<63x8x128xf32, #tpu.memory_space<vmem>>, vector<1x8x128xf32>
    %435 = vector.shape_cast %434 : vector<1x8x128xf32> to vector<8x128xf32>
    %c19_178 = arith.constant 19 : index
    %c0_179 = arith.constant 0 : index
    %c0_180 = arith.constant 0 : index
    %436 = vector.load %arg1[%c19_178, %c0_179, %c0_180] : memref<63x8x128xf32, #tpu.memory_space<vmem>>, vector<1x8x128xf32>
    %437 = vector.shape_cast %436 : vector<1x8x128xf32> to vector<8x128xf32>
    %c20_181 = arith.constant 20 : index
    %c0_182 = arith.constant 0 : index
    %c0_183 = arith.constant 0 : index
    %438 = vector.load %arg1[%c20_181, %c0_182, %c0_183] : memref<63x8x128xf32, #tpu.memory_space<vmem>>, vector<1x8x128xf32>
    %439 = vector.shape_cast %438 : vector<1x8x128xf32> to vector<8x128xf32>
    %c21_184 = arith.constant 21 : index
    %c0_185 = arith.constant 0 : index
    %c0_186 = arith.constant 0 : index
    %440 = vector.load %arg1[%c21_184, %c0_185, %c0_186] : memref<63x8x128xf32, #tpu.memory_space<vmem>>, vector<1x8x128xf32>
    %441 = vector.shape_cast %440 : vector<1x8x128xf32> to vector<8x128xf32>
    %c22_187 = arith.constant 22 : index
    %c0_188 = arith.constant 0 : index
    %c0_189 = arith.constant 0 : index
    %442 = vector.load %arg1[%c22_187, %c0_188, %c0_189] : memref<63x8x128xf32, #tpu.memory_space<vmem>>, vector<1x8x128xf32>
    %443 = vector.shape_cast %442 : vector<1x8x128xf32> to vector<8x128xf32>
    %c23_190 = arith.constant 23 : index
    %c0_191 = arith.constant 0 : index
    %c0_192 = arith.constant 0 : index
    %444 = vector.load %arg1[%c23_190, %c0_191, %c0_192] : memref<63x8x128xf32, #tpu.memory_space<vmem>>, vector<1x8x128xf32>
    %445 = vector.shape_cast %444 : vector<1x8x128xf32> to vector<8x128xf32>
    %446 = arith.subf %441, %435 : vector<8x128xf32>
    %447 = arith.subf %443, %437 : vector<8x128xf32>
    %448 = arith.subf %445, %439 : vector<8x128xf32>
    %449 = arith.mulf %446, %446 : vector<8x128xf32>
    %450 = arith.mulf %447, %447 : vector<8x128xf32>
    %451 = arith.addf %449, %450 : vector<8x128xf32>
    %452 = arith.mulf %448, %448 : vector<8x128xf32>
    %453 = arith.addf %451, %452 : vector<8x128xf32>
    %454 = math.rsqrt %453 : vector<8x128xf32>
    %455 = arith.mulf %453, %454 : vector<8x128xf32>
    %c90 = arith.constant 90 : index
    %c0_193 = arith.constant 0 : index
    %c0_194 = arith.constant 0 : index
    %456 = vector.load %arg2[%c90, %c0_193, %c0_194] : memref<105x8x128xf32, #tpu.memory_space<vmem>>, vector<1x8x128xf32>
    %457 = vector.shape_cast %456 : vector<1x8x128xf32> to vector<8x128xf32>
    %458 = vector.shape_cast %455 : vector<8x128xf32> to vector<1x8x128xf32>
    tpu.vector_store %arg2[%c90, %c0_193, %c0_194], %458 {strides = array<i32>} : memref<105x8x128xf32, #tpu.memory_space<vmem>>, vector<1x8x128xf32>,
    %459 = arith.mulf %446, %454 : vector<8x128xf32>
    %460 = arith.mulf %447, %454 : vector<8x128xf32>
    %461 = arith.mulf %448, %454 : vector<8x128xf32>
    %462 = arith.mulf %459, %459 : vector<8x128xf32>
    %463 = arith.mulf %460, %460 : vector<8x128xf32>
    %464 = arith.addf %462, %463 : vector<8x128xf32>
    %465 = arith.mulf %461, %461 : vector<8x128xf32>
    %466 = arith.addf %464, %465 : vector<8x128xf32>
    %467 = arith.mulf %382, %459 : vector<8x128xf32>
    %468 = arith.mulf %383, %460 : vector<8x128xf32>
    %469 = arith.addf %467, %468 : vector<8x128xf32>
    %470 = arith.mulf %384, %461 : vector<8x128xf32>
    %471 = arith.addf %469, %470 : vector<8x128xf32>
    %cst_195 = arith.constant 0.000000e+00 : f32
    %472 = vector.broadcast %cst_195 : f32 to vector<8x128xf32>
    %473 = arith.subf %472, %471 : vector<8x128xf32>
    %474 = arith.mulf %389, %466 : vector<8x128xf32>
    %475 = math.rsqrt %474 : vector<8x128xf32>
    %476 = math.rsqrt %475 : vector<8x128xf32>
    %477 = arith.addf %473, %476 : vector<8x128xf32>
    %478 = arith.mulf %460, %384 : vector<8x128xf32>
    %479 = arith.mulf %461, %383 : vector<8x128xf32>
    %480 = arith.subf %478, %479 : vector<8x128xf32>
    %481 = arith.mulf %461, %382 : vector<8x128xf32>
    %482 = arith.mulf %459, %384 : vector<8x128xf32>
    %483 = arith.subf %481, %482 : vector<8x128xf32>
    %484 = arith.mulf %459, %383 : vector<8x128xf32>
    %485 = arith.mulf %460, %382 : vector<8x128xf32>
    %486 = arith.subf %484, %485 : vector<8x128xf32>
    %487 = arith.mulf %477, %477 : vector<8x128xf32>
    %488 = arith.mulf %480, %480 : vector<8x128xf32>
    %489 = arith.addf %487, %488 : vector<8x128xf32>
    %490 = arith.mulf %483, %483 : vector<8x128xf32>
    %491 = arith.addf %489, %490 : vector<8x128xf32>
    %492 = arith.mulf %486, %486 : vector<8x128xf32>
    %493 = arith.addf %491, %492 : vector<8x128xf32>
    %494 = math.rsqrt %493 : vector<8x128xf32>
    %495 = arith.mulf %477, %494 : vector<8x128xf32>
    %c24 = arith.constant 24 : index
    %c0_196 = arith.constant 0 : index
    %c0_197 = arith.constant 0 : index
    %496 = vector.load %arg2[%c24, %c0_196, %c0_197] : memref<105x8x128xf32, #tpu.memory_space<vmem>>, vector<1x8x128xf32>
    %497 = vector.shape_cast %496 : vector<1x8x128xf32> to vector<8x128xf32>
    %498 = vector.shape_cast %495 : vector<8x128xf32> to vector<1x8x128xf32>
    tpu.vector_store %arg2[%c24, %c0_196, %c0_197], %498 {strides = array<i32>} : memref<105x8x128xf32, #tpu.memory_space<vmem>>, vector<1x8x128xf32>,
    %499 = arith.mulf %480, %494 : vector<8x128xf32>
    %c25 = arith.constant 25 : index
    %c0_198 = arith.constant 0 : index
    %c0_199 = arith.constant 0 : index
    %500 = vector.load %arg2[%c25, %c0_198, %c0_199] : memref<105x8x128xf32, #tpu.memory_space<vmem>>, vector<1x8x128xf32>
    %501 = vector.shape_cast %500 : vector<1x8x128xf32> to vector<8x128xf32>
    %502 = vector.shape_cast %499 : vector<8x128xf32> to vector<1x8x128xf32>
    tpu.vector_store %arg2[%c25, %c0_198, %c0_199], %502 {strides = array<i32>} : memref<105x8x128xf32, #tpu.memory_space<vmem>>, vector<1x8x128xf32>,
    %503 = arith.mulf %483, %494 : vector<8x128xf32>
    %c26 = arith.constant 26 : index
    %c0_200 = arith.constant 0 : index
    %c0_201 = arith.constant 0 : index
    %504 = vector.load %arg2[%c26, %c0_200, %c0_201] : memref<105x8x128xf32, #tpu.memory_space<vmem>>, vector<1x8x128xf32>
    %505 = vector.shape_cast %504 : vector<1x8x128xf32> to vector<8x128xf32>
    %506 = vector.shape_cast %503 : vector<8x128xf32> to vector<1x8x128xf32>
    tpu.vector_store %arg2[%c26, %c0_200, %c0_201], %506 {strides = array<i32>} : memref<105x8x128xf32, #tpu.memory_space<vmem>>, vector<1x8x128xf32>,
    %507 = arith.mulf %486, %494 : vector<8x128xf32>
    %c27 = arith.constant 27 : index
    %c0_202 = arith.constant 0 : index
    %c0_203 = arith.constant 0 : index
    %508 = vector.load %arg2[%c27, %c0_202, %c0_203] : memref<105x8x128xf32, #tpu.memory_space<vmem>>, vector<1x8x128xf32>
    %509 = vector.shape_cast %508 : vector<1x8x128xf32> to vector<8x128xf32>
    %510 = vector.shape_cast %507 : vector<8x128xf32> to vector<1x8x128xf32>
    tpu.vector_store %arg2[%c27, %c0_202, %c0_203], %510 {strides = array<i32>} : memref<105x8x128xf32, #tpu.memory_space<vmem>>, vector<1x8x128xf32>,
    %c21_204 = arith.constant 21 : index
    %c0_205 = arith.constant 0 : index
    %c0_206 = arith.constant 0 : index
    %511 = vector.load %arg1[%c21_204, %c0_205, %c0_206] : memref<63x8x128xf32, #tpu.memory_space<vmem>>, vector<1x8x128xf32>
    %512 = vector.shape_cast %511 : vector<1x8x128xf32> to vector<8x128xf32>
    %c22_207 = arith.constant 22 : index
    %c0_208 = arith.constant 0 : index
    %c0_209 = arith.constant 0 : index
    %513 = vector.load %arg1[%c22_207, %c0_208, %c0_209] : memref<63x8x128xf32, #tpu.memory_space<vmem>>, vector<1x8x128xf32>
    %514 = vector.shape_cast %513 : vector<1x8x128xf32> to vector<8x128xf32>
    %c23_210 = arith.constant 23 : index
    %c0_211 = arith.constant 0 : index
    %c0_212 = arith.constant 0 : index
    %515 = vector.load %arg1[%c23_210, %c0_211, %c0_212] : memref<63x8x128xf32, #tpu.memory_space<vmem>>, vector<1x8x128xf32>
    %516 = vector.shape_cast %515 : vector<1x8x128xf32> to vector<8x128xf32>
    %c24_213 = arith.constant 24 : index
    %c0_214 = arith.constant 0 : index
    %c0_215 = arith.constant 0 : index
    %517 = vector.load %arg1[%c24_213, %c0_214, %c0_215] : memref<63x8x128xf32, #tpu.memory_space<vmem>>, vector<1x8x128xf32>
    %518 = vector.shape_cast %517 : vector<1x8x128xf32> to vector<8x128xf32>
    %c25_216 = arith.constant 25 : index
    %c0_217 = arith.constant 0 : index
    %c0_218 = arith.constant 0 : index
    %519 = vector.load %arg1[%c25_216, %c0_217, %c0_218] : memref<63x8x128xf32, #tpu.memory_space<vmem>>, vector<1x8x128xf32>
    %520 = vector.shape_cast %519 : vector<1x8x128xf32> to vector<8x128xf32>
    %c26_219 = arith.constant 26 : index
    %c0_220 = arith.constant 0 : index
    %c0_221 = arith.constant 0 : index
    %521 = vector.load %arg1[%c26_219, %c0_220, %c0_221] : memref<63x8x128xf32, #tpu.memory_space<vmem>>, vector<1x8x128xf32>
    %522 = vector.shape_cast %521 : vector<1x8x128xf32> to vector<8x128xf32>
    %523 = arith.subf %518, %512 : vector<8x128xf32>
    %524 = arith.subf %520, %514 : vector<8x128xf32>
    %525 = arith.subf %522, %516 : vector<8x128xf32>
    %526 = arith.mulf %523, %523 : vector<8x128xf32>
    %527 = arith.mulf %524, %524 : vector<8x128xf32>
    %528 = arith.addf %526, %527 : vector<8x128xf32>
    %529 = arith.mulf %525, %525 : vector<8x128xf32>
    %530 = arith.addf %528, %529 : vector<8x128xf32>
    %531 = math.rsqrt %530 : vector<8x128xf32>
    %532 = arith.mulf %530, %531 : vector<8x128xf32>
    %c91 = arith.constant 91 : index
    %c0_222 = arith.constant 0 : index
    %c0_223 = arith.constant 0 : index
    %533 = vector.load %arg2[%c91, %c0_222, %c0_223] : memref<105x8x128xf32, #tpu.memory_space<vmem>>, vector<1x8x128xf32>
    %534 = vector.shape_cast %533 : vector<1x8x128xf32> to vector<8x128xf32>
    %535 = vector.shape_cast %532 : vector<8x128xf32> to vector<1x8x128xf32>
    tpu.vector_store %arg2[%c91, %c0_222, %c0_223], %535 {strides = array<i32>} : memref<105x8x128xf32, #tpu.memory_space<vmem>>, vector<1x8x128xf32>,
    %536 = arith.mulf %523, %531 : vector<8x128xf32>
    %537 = arith.mulf %524, %531 : vector<8x128xf32>
    %538 = arith.mulf %525, %531 : vector<8x128xf32>
    %539 = arith.mulf %536, %536 : vector<8x128xf32>
    %540 = arith.mulf %537, %537 : vector<8x128xf32>
    %541 = arith.addf %539, %540 : vector<8x128xf32>
    %542 = arith.mulf %538, %538 : vector<8x128xf32>
    %543 = arith.addf %541, %542 : vector<8x128xf32>
    %544 = arith.mulf %459, %536 : vector<8x128xf32>
    %545 = arith.mulf %460, %537 : vector<8x128xf32>
    %546 = arith.addf %544, %545 : vector<8x128xf32>
    %547 = arith.mulf %461, %538 : vector<8x128xf32>
    %548 = arith.addf %546, %547 : vector<8x128xf32>
    %cst_224 = arith.constant 0.000000e+00 : f32
    %549 = vector.broadcast %cst_224 : f32 to vector<8x128xf32>
    %550 = arith.subf %549, %548 : vector<8x128xf32>
    %551 = arith.mulf %466, %543 : vector<8x128xf32>
    %552 = math.rsqrt %551 : vector<8x128xf32>
    %553 = math.rsqrt %552 : vector<8x128xf32>
    %554 = arith.addf %550, %553 : vector<8x128xf32>
    %555 = arith.mulf %537, %461 : vector<8x128xf32>
    %556 = arith.mulf %538, %460 : vector<8x128xf32>
    %557 = arith.subf %555, %556 : vector<8x128xf32>
    %558 = arith.mulf %538, %459 : vector<8x128xf32>
    %559 = arith.mulf %536, %461 : vector<8x128xf32>
    %560 = arith.subf %558, %559 : vector<8x128xf32>
    %561 = arith.mulf %536, %460 : vector<8x128xf32>
    %562 = arith.mulf %537, %459 : vector<8x128xf32>
    %563 = arith.subf %561, %562 : vector<8x128xf32>
    %564 = arith.mulf %554, %554 : vector<8x128xf32>
    %565 = arith.mulf %557, %557 : vector<8x128xf32>
    %566 = arith.addf %564, %565 : vector<8x128xf32>
    %567 = arith.mulf %560, %560 : vector<8x128xf32>
    %568 = arith.addf %566, %567 : vector<8x128xf32>
    %569 = arith.mulf %563, %563 : vector<8x128xf32>
    %570 = arith.addf %568, %569 : vector<8x128xf32>
    %571 = math.rsqrt %570 : vector<8x128xf32>
    %572 = arith.mulf %554, %571 : vector<8x128xf32>
    %c28 = arith.constant 28 : index
    %c0_225 = arith.constant 0 : index
    %c0_226 = arith.constant 0 : index
    %573 = vector.load %arg2[%c28, %c0_225, %c0_226] : memref<105x8x128xf32, #tpu.memory_space<vmem>>, vector<1x8x128xf32>
    %574 = vector.shape_cast %573 : vector<1x8x128xf32> to vector<8x128xf32>
    %575 = vector.shape_cast %572 : vector<8x128xf32> to vector<1x8x128xf32>
    tpu.vector_store %arg2[%c28, %c0_225, %c0_226], %575 {strides = array<i32>} : memref<105x8x128xf32, #tpu.memory_space<vmem>>, vector<1x8x128xf32>,
    %576 = arith.mulf %557, %571 : vector<8x128xf32>
    %c29 = arith.constant 29 : index
    %c0_227 = arith.constant 0 : index
    %c0_228 = arith.constant 0 : index
    %577 = vector.load %arg2[%c29, %c0_227, %c0_228] : memref<105x8x128xf32, #tpu.memory_space<vmem>>, vector<1x8x128xf32>
    %578 = vector.shape_cast %577 : vector<1x8x128xf32> to vector<8x128xf32>
    %579 = vector.shape_cast %576 : vector<8x128xf32> to vector<1x8x128xf32>
    tpu.vector_store %arg2[%c29, %c0_227, %c0_228], %579 {strides = array<i32>} : memref<105x8x128xf32, #tpu.memory_space<vmem>>, vector<1x8x128xf32>,
    %580 = arith.mulf %560, %571 : vector<8x128xf32>
    %c30 = arith.constant 30 : index
    %c0_229 = arith.constant 0 : index
    %c0_230 = arith.constant 0 : index
    %581 = vector.load %arg2[%c30, %c0_229, %c0_230] : memref<105x8x128xf32, #tpu.memory_space<vmem>>, vector<1x8x128xf32>
    %582 = vector.shape_cast %581 : vector<1x8x128xf32> to vector<8x128xf32>
    %583 = vector.shape_cast %580 : vector<8x128xf32> to vector<1x8x128xf32>
    tpu.vector_store %arg2[%c30, %c0_229, %c0_230], %583 {strides = array<i32>} : memref<105x8x128xf32, #tpu.memory_space<vmem>>, vector<1x8x128xf32>,
    %584 = arith.mulf %563, %571 : vector<8x128xf32>
    %c31 = arith.constant 31 : index
    %c0_231 = arith.constant 0 : index
    %c0_232 = arith.constant 0 : index
    %585 = vector.load %arg2[%c31, %c0_231, %c0_232] : memref<105x8x128xf32, #tpu.memory_space<vmem>>, vector<1x8x128xf32>
    %586 = vector.shape_cast %585 : vector<1x8x128xf32> to vector<8x128xf32>
    %587 = vector.shape_cast %584 : vector<8x128xf32> to vector<1x8x128xf32>
    tpu.vector_store %arg2[%c31, %c0_231, %c0_232], %587 {strides = array<i32>} : memref<105x8x128xf32, #tpu.memory_space<vmem>>, vector<1x8x128xf32>,
    %c15_233 = arith.constant 15 : index
    %c0_234 = arith.constant 0 : index
    %c0_235 = arith.constant 0 : index
    %588 = vector.load %arg1[%c15_233, %c0_234, %c0_235] : memref<63x8x128xf32, #tpu.memory_space<vmem>>, vector<1x8x128xf32>
    %589 = vector.shape_cast %588 : vector<1x8x128xf32> to vector<8x128xf32>
    %c16_236 = arith.constant 16 : index
    %c0_237 = arith.constant 0 : index
    %c0_238 = arith.constant 0 : index
    %590 = vector.load %arg1[%c16_236, %c0_237, %c0_238] : memref<63x8x128xf32, #tpu.memory_space<vmem>>, vector<1x8x128xf32>
    %591 = vector.shape_cast %590 : vector<1x8x128xf32> to vector<8x128xf32>
    %c17_239 = arith.constant 17 : index
    %c0_240 = arith.constant 0 : index
    %c0_241 = arith.constant 0 : index
    %592 = vector.load %arg1[%c17_239, %c0_240, %c0_241] : memref<63x8x128xf32, #tpu.memory_space<vmem>>, vector<1x8x128xf32>
    %593 = vector.shape_cast %592 : vector<1x8x128xf32> to vector<8x128xf32>
    %c27_242 = arith.constant 27 : index
    %c0_243 = arith.constant 0 : index
    %c0_244 = arith.constant 0 : index
    %594 = vector.load %arg1[%c27_242, %c0_243, %c0_244] : memref<63x8x128xf32, #tpu.memory_space<vmem>>, vector<1x8x128xf32>
    %595 = vector.shape_cast %594 : vector<1x8x128xf32> to vector<8x128xf32>
    %c28_245 = arith.constant 28 : index
    %c0_246 = arith.constant 0 : index
    %c0_247 = arith.constant 0 : index
    %596 = vector.load %arg1[%c28_245, %c0_246, %c0_247] : memref<63x8x128xf32, #tpu.memory_space<vmem>>, vector<1x8x128xf32>
    %597 = vector.shape_cast %596 : vector<1x8x128xf32> to vector<8x128xf32>
    %c29_248 = arith.constant 29 : index
    %c0_249 = arith.constant 0 : index
    %c0_250 = arith.constant 0 : index
    %598 = vector.load %arg1[%c29_248, %c0_249, %c0_250] : memref<63x8x128xf32, #tpu.memory_space<vmem>>, vector<1x8x128xf32>
    %599 = vector.shape_cast %598 : vector<1x8x128xf32> to vector<8x128xf32>
    %600 = arith.subf %595, %589 : vector<8x128xf32>
    %601 = arith.subf %597, %591 : vector<8x128xf32>
    %602 = arith.subf %599, %593 : vector<8x128xf32>
    %603 = arith.mulf %600, %600 : vector<8x128xf32>
    %604 = arith.mulf %601, %601 : vector<8x128xf32>
    %605 = arith.addf %603, %604 : vector<8x128xf32>
    %606 = arith.mulf %602, %602 : vector<8x128xf32>
    %607 = arith.addf %605, %606 : vector<8x128xf32>
    %608 = math.rsqrt %607 : vector<8x128xf32>
    %609 = arith.mulf %607, %608 : vector<8x128xf32>
    %c92 = arith.constant 92 : index
    %c0_251 = arith.constant 0 : index
    %c0_252 = arith.constant 0 : index
    %610 = vector.load %arg2[%c92, %c0_251, %c0_252] : memref<105x8x128xf32, #tpu.memory_space<vmem>>, vector<1x8x128xf32>
    %611 = vector.shape_cast %610 : vector<1x8x128xf32> to vector<8x128xf32>
    %612 = vector.shape_cast %609 : vector<8x128xf32> to vector<1x8x128xf32>
    tpu.vector_store %arg2[%c92, %c0_251, %c0_252], %612 {strides = array<i32>} : memref<105x8x128xf32, #tpu.memory_space<vmem>>, vector<1x8x128xf32>,
    %613 = arith.mulf %600, %608 : vector<8x128xf32>
    %614 = arith.mulf %601, %608 : vector<8x128xf32>
    %615 = arith.mulf %602, %608 : vector<8x128xf32>
    %616 = arith.mulf %613, %613 : vector<8x128xf32>
    %617 = arith.mulf %614, %614 : vector<8x128xf32>
    %618 = arith.addf %616, %617 : vector<8x128xf32>
    %619 = arith.mulf %615, %615 : vector<8x128xf32>
    %620 = arith.addf %618, %619 : vector<8x128xf32>
    %621 = arith.mulf %319, %613 : vector<8x128xf32>
    %622 = arith.mulf %320, %614 : vector<8x128xf32>
    %623 = arith.addf %621, %622 : vector<8x128xf32>
    %624 = arith.mulf %321, %615 : vector<8x128xf32>
    %625 = arith.addf %623, %624 : vector<8x128xf32>
    %cst_253 = arith.constant 0.000000e+00 : f32
    %626 = vector.broadcast %cst_253 : f32 to vector<8x128xf32>
    %627 = arith.subf %626, %625 : vector<8x128xf32>
    %628 = arith.mulf %326, %620 : vector<8x128xf32>
    %629 = math.rsqrt %628 : vector<8x128xf32>
    %630 = math.rsqrt %629 : vector<8x128xf32>
    %631 = arith.addf %627, %630 : vector<8x128xf32>
    %632 = arith.mulf %614, %321 : vector<8x128xf32>
    %633 = arith.mulf %615, %320 : vector<8x128xf32>
    %634 = arith.subf %632, %633 : vector<8x128xf32>
    %635 = arith.mulf %615, %319 : vector<8x128xf32>
    %636 = arith.mulf %613, %321 : vector<8x128xf32>
    %637 = arith.subf %635, %636 : vector<8x128xf32>
    %638 = arith.mulf %613, %320 : vector<8x128xf32>
    %639 = arith.mulf %614, %319 : vector<8x128xf32>
    %640 = arith.subf %638, %639 : vector<8x128xf32>
    %641 = arith.mulf %631, %631 : vector<8x128xf32>
    %642 = arith.mulf %634, %634 : vector<8x128xf32>
    %643 = arith.addf %641, %642 : vector<8x128xf32>
    %644 = arith.mulf %637, %637 : vector<8x128xf32>
    %645 = arith.addf %643, %644 : vector<8x128xf32>
    %646 = arith.mulf %640, %640 : vector<8x128xf32>
    %647 = arith.addf %645, %646 : vector<8x128xf32>
    %648 = math.rsqrt %647 : vector<8x128xf32>
    %649 = arith.mulf %631, %648 : vector<8x128xf32>
    %c32 = arith.constant 32 : index
    %c0_254 = arith.constant 0 : index
    %c0_255 = arith.constant 0 : index
    %650 = vector.load %arg2[%c32, %c0_254, %c0_255] : memref<105x8x128xf32, #tpu.memory_space<vmem>>, vector<1x8x128xf32>
    %651 = vector.shape_cast %650 : vector<1x8x128xf32> to vector<8x128xf32>
    %652 = vector.shape_cast %649 : vector<8x128xf32> to vector<1x8x128xf32>
    tpu.vector_store %arg2[%c32, %c0_254, %c0_255], %652 {strides = array<i32>} : memref<105x8x128xf32, #tpu.memory_space<vmem>>, vector<1x8x128xf32>,
    %653 = arith.mulf %634, %648 : vector<8x128xf32>
    %c33 = arith.constant 33 : index
    %c0_256 = arith.constant 0 : index
    %c0_257 = arith.constant 0 : index
    %654 = vector.load %arg2[%c33, %c0_256, %c0_257] : memref<105x8x128xf32, #tpu.memory_space<vmem>>, vector<1x8x128xf32>
    %655 = vector.shape_cast %654 : vector<1x8x128xf32> to vector<8x128xf32>
    %656 = vector.shape_cast %653 : vector<8x128xf32> to vector<1x8x128xf32>
    tpu.vector_store %arg2[%c33, %c0_256, %c0_257], %656 {strides = array<i32>} : memref<105x8x128xf32, #tpu.memory_space<vmem>>, vector<1x8x128xf32>,
    %657 = arith.mulf %637, %648 : vector<8x128xf32>
    %c34 = arith.constant 34 : index
    %c0_258 = arith.constant 0 : index
    %c0_259 = arith.constant 0 : index
    %658 = vector.load %arg2[%c34, %c0_258, %c0_259] : memref<105x8x128xf32, #tpu.memory_space<vmem>>, vector<1x8x128xf32>
    %659 = vector.shape_cast %658 : vector<1x8x128xf32> to vector<8x128xf32>
    %660 = vector.shape_cast %657 : vector<8x128xf32> to vector<1x8x128xf32>
    tpu.vector_store %arg2[%c34, %c0_258, %c0_259], %660 {strides = array<i32>} : memref<105x8x128xf32, #tpu.memory_space<vmem>>, vector<1x8x128xf32>,
    %661 = arith.mulf %640, %648 : vector<8x128xf32>
    %c35 = arith.constant 35 : index
    %c0_260 = arith.constant 0 : index
    %c0_261 = arith.constant 0 : index
    %662 = vector.load %arg2[%c35, %c0_260, %c0_261] : memref<105x8x128xf32, #tpu.memory_space<vmem>>, vector<1x8x128xf32>
    %663 = vector.shape_cast %662 : vector<1x8x128xf32> to vector<8x128xf32>
    %664 = vector.shape_cast %661 : vector<8x128xf32> to vector<1x8x128xf32>
    tpu.vector_store %arg2[%c35, %c0_260, %c0_261], %664 {strides = array<i32>} : memref<105x8x128xf32, #tpu.memory_space<vmem>>, vector<1x8x128xf32>,
    %c27_262 = arith.constant 27 : index
    %c0_263 = arith.constant 0 : index
    %c0_264 = arith.constant 0 : index
    %665 = vector.load %arg1[%c27_262, %c0_263, %c0_264] : memref<63x8x128xf32, #tpu.memory_space<vmem>>, vector<1x8x128xf32>
    %666 = vector.shape_cast %665 : vector<1x8x128xf32> to vector<8x128xf32>
    %c28_265 = arith.constant 28 : index
    %c0_266 = arith.constant 0 : index
    %c0_267 = arith.constant 0 : index
    %667 = vector.load %arg1[%c28_265, %c0_266, %c0_267] : memref<63x8x128xf32, #tpu.memory_space<vmem>>, vector<1x8x128xf32>
    %668 = vector.shape_cast %667 : vector<1x8x128xf32> to vector<8x128xf32>
    %c29_268 = arith.constant 29 : index
    %c0_269 = arith.constant 0 : index
    %c0_270 = arith.constant 0 : index
    %669 = vector.load %arg1[%c29_268, %c0_269, %c0_270] : memref<63x8x128xf32, #tpu.memory_space<vmem>>, vector<1x8x128xf32>
    %670 = vector.shape_cast %669 : vector<1x8x128xf32> to vector<8x128xf32>
    %c30_271 = arith.constant 30 : index
    %c0_272 = arith.constant 0 : index
    %c0_273 = arith.constant 0 : index
    %671 = vector.load %arg1[%c30_271, %c0_272, %c0_273] : memref<63x8x128xf32, #tpu.memory_space<vmem>>, vector<1x8x128xf32>
    %672 = vector.shape_cast %671 : vector<1x8x128xf32> to vector<8x128xf32>
    %c31_274 = arith.constant 31 : index
    %c0_275 = arith.constant 0 : index
    %c0_276 = arith.constant 0 : index
    %673 = vector.load %arg1[%c31_274, %c0_275, %c0_276] : memref<63x8x128xf32, #tpu.memory_space<vmem>>, vector<1x8x128xf32>
    %674 = vector.shape_cast %673 : vector<1x8x128xf32> to vector<8x128xf32>
    %c32_277 = arith.constant 32 : index
    %c0_278 = arith.constant 0 : index
    %c0_279 = arith.constant 0 : index
    %675 = vector.load %arg1[%c32_277, %c0_278, %c0_279] : memref<63x8x128xf32, #tpu.memory_space<vmem>>, vector<1x8x128xf32>
    %676 = vector.shape_cast %675 : vector<1x8x128xf32> to vector<8x128xf32>
    %677 = arith.subf %672, %666 : vector<8x128xf32>
    %678 = arith.subf %674, %668 : vector<8x128xf32>
    %679 = arith.subf %676, %670 : vector<8x128xf32>
    %680 = arith.mulf %677, %677 : vector<8x128xf32>
    %681 = arith.mulf %678, %678 : vector<8x128xf32>
    %682 = arith.addf %680, %681 : vector<8x128xf32>
    %683 = arith.mulf %679, %679 : vector<8x128xf32>
    %684 = arith.addf %682, %683 : vector<8x128xf32>
    %685 = math.rsqrt %684 : vector<8x128xf32>
    %686 = arith.mulf %684, %685 : vector<8x128xf32>
    %c93 = arith.constant 93 : index
    %c0_280 = arith.constant 0 : index
    %c0_281 = arith.constant 0 : index
    %687 = vector.load %arg2[%c93, %c0_280, %c0_281] : memref<105x8x128xf32, #tpu.memory_space<vmem>>, vector<1x8x128xf32>
    %688 = vector.shape_cast %687 : vector<1x8x128xf32> to vector<8x128xf32>
    %689 = vector.shape_cast %686 : vector<8x128xf32> to vector<1x8x128xf32>
    tpu.vector_store %arg2[%c93, %c0_280, %c0_281], %689 {strides = array<i32>} : memref<105x8x128xf32, #tpu.memory_space<vmem>>, vector<1x8x128xf32>,
    %690 = arith.mulf %677, %685 : vector<8x128xf32>
    %691 = arith.mulf %678, %685 : vector<8x128xf32>
    %692 = arith.mulf %679, %685 : vector<8x128xf32>
    %693 = arith.mulf %690, %690 : vector<8x128xf32>
    %694 = arith.mulf %691, %691 : vector<8x128xf32>
    %695 = arith.addf %693, %694 : vector<8x128xf32>
    %696 = arith.mulf %692, %692 : vector<8x128xf32>
    %697 = arith.addf %695, %696 : vector<8x128xf32>
    %698 = arith.mulf %613, %690 : vector<8x128xf32>
    %699 = arith.mulf %614, %691 : vector<8x128xf32>
    %700 = arith.addf %698, %699 : vector<8x128xf32>
    %701 = arith.mulf %615, %692 : vector<8x128xf32>
    %702 = arith.addf %700, %701 : vector<8x128xf32>
    %cst_282 = arith.constant 0.000000e+00 : f32
    %703 = vector.broadcast %cst_282 : f32 to vector<8x128xf32>
    %704 = arith.subf %703, %702 : vector<8x128xf32>
    %705 = arith.mulf %620, %697 : vector<8x128xf32>
    %706 = math.rsqrt %705 : vector<8x128xf32>
    %707 = math.rsqrt %706 : vector<8x128xf32>
    %708 = arith.addf %704, %707 : vector<8x128xf32>
    %709 = arith.mulf %691, %615 : vector<8x128xf32>
    %710 = arith.mulf %692, %614 : vector<8x128xf32>
    %711 = arith.subf %709, %710 : vector<8x128xf32>
    %712 = arith.mulf %692, %613 : vector<8x128xf32>
    %713 = arith.mulf %690, %615 : vector<8x128xf32>
    %714 = arith.subf %712, %713 : vector<8x128xf32>
    %715 = arith.mulf %690, %614 : vector<8x128xf32>
    %716 = arith.mulf %691, %613 : vector<8x128xf32>
    %717 = arith.subf %715, %716 : vector<8x128xf32>
    %718 = arith.mulf %708, %708 : vector<8x128xf32>
    %719 = arith.mulf %711, %711 : vector<8x128xf32>
    %720 = arith.addf %718, %719 : vector<8x128xf32>
    %721 = arith.mulf %714, %714 : vector<8x128xf32>
    %722 = arith.addf %720, %721 : vector<8x128xf32>
    %723 = arith.mulf %717, %717 : vector<8x128xf32>
    %724 = arith.addf %722, %723 : vector<8x128xf32>
    %725 = math.rsqrt %724 : vector<8x128xf32>
    %726 = arith.mulf %708, %725 : vector<8x128xf32>
    %c36 = arith.constant 36 : index
    %c0_283 = arith.constant 0 : index
    %c0_284 = arith.constant 0 : index
    %727 = vector.load %arg2[%c36, %c0_283, %c0_284] : memref<105x8x128xf32, #tpu.memory_space<vmem>>, vector<1x8x128xf32>
    %728 = vector.shape_cast %727 : vector<1x8x128xf32> to vector<8x128xf32>
    %729 = vector.shape_cast %726 : vector<8x128xf32> to vector<1x8x128xf32>
    tpu.vector_store %arg2[%c36, %c0_283, %c0_284], %729 {strides = array<i32>} : memref<105x8x128xf32, #tpu.memory_space<vmem>>, vector<1x8x128xf32>,
    %730 = arith.mulf %711, %725 : vector<8x128xf32>
    %c37 = arith.constant 37 : index
    %c0_285 = arith.constant 0 : index
    %c0_286 = arith.constant 0 : index
    %731 = vector.load %arg2[%c37, %c0_285, %c0_286] : memref<105x8x128xf32, #tpu.memory_space<vmem>>, vector<1x8x128xf32>
    %732 = vector.shape_cast %731 : vector<1x8x128xf32> to vector<8x128xf32>
    %733 = vector.shape_cast %730 : vector<8x128xf32> to vector<1x8x128xf32>
    tpu.vector_store %arg2[%c37, %c0_285, %c0_286], %733 {strides = array<i32>} : memref<105x8x128xf32, #tpu.memory_space<vmem>>, vector<1x8x128xf32>,
    %734 = arith.mulf %714, %725 : vector<8x128xf32>
    %c38 = arith.constant 38 : index
    %c0_287 = arith.constant 0 : index
    %c0_288 = arith.constant 0 : index
    %735 = vector.load %arg2[%c38, %c0_287, %c0_288] : memref<105x8x128xf32, #tpu.memory_space<vmem>>, vector<1x8x128xf32>
    %736 = vector.shape_cast %735 : vector<1x8x128xf32> to vector<8x128xf32>
    %737 = vector.shape_cast %734 : vector<8x128xf32> to vector<1x8x128xf32>
    tpu.vector_store %arg2[%c38, %c0_287, %c0_288], %737 {strides = array<i32>} : memref<105x8x128xf32, #tpu.memory_space<vmem>>, vector<1x8x128xf32>,
    %738 = arith.mulf %717, %725 : vector<8x128xf32>
    %c39 = arith.constant 39 : index
    %c0_289 = arith.constant 0 : index
    %c0_290 = arith.constant 0 : index
    %739 = vector.load %arg2[%c39, %c0_289, %c0_290] : memref<105x8x128xf32, #tpu.memory_space<vmem>>, vector<1x8x128xf32>
    %740 = vector.shape_cast %739 : vector<1x8x128xf32> to vector<8x128xf32>
    %741 = vector.shape_cast %738 : vector<8x128xf32> to vector<1x8x128xf32>
    tpu.vector_store %arg2[%c39, %c0_289, %c0_290], %741 {strides = array<i32>} : memref<105x8x128xf32, #tpu.memory_space<vmem>>, vector<1x8x128xf32>,
    %c30_291 = arith.constant 30 : index
    %c0_292 = arith.constant 0 : index
    %c0_293 = arith.constant 0 : index
    %742 = vector.load %arg1[%c30_291, %c0_292, %c0_293] : memref<63x8x128xf32, #tpu.memory_space<vmem>>, vector<1x8x128xf32>
    %743 = vector.shape_cast %742 : vector<1x8x128xf32> to vector<8x128xf32>
    %c31_294 = arith.constant 31 : index
    %c0_295 = arith.constant 0 : index
    %c0_296 = arith.constant 0 : index
    %744 = vector.load %arg1[%c31_294, %c0_295, %c0_296] : memref<63x8x128xf32, #tpu.memory_space<vmem>>, vector<1x8x128xf32>
    %745 = vector.shape_cast %744 : vector<1x8x128xf32> to vector<8x128xf32>
    %c32_297 = arith.constant 32 : index
    %c0_298 = arith.constant 0 : index
    %c0_299 = arith.constant 0 : index
    %746 = vector.load %arg1[%c32_297, %c0_298, %c0_299] : memref<63x8x128xf32, #tpu.memory_space<vmem>>, vector<1x8x128xf32>
    %747 = vector.shape_cast %746 : vector<1x8x128xf32> to vector<8x128xf32>
    %c33_300 = arith.constant 33 : index
    %c0_301 = arith.constant 0 : index
    %c0_302 = arith.constant 0 : index
    %748 = vector.load %arg1[%c33_300, %c0_301, %c0_302] : memref<63x8x128xf32, #tpu.memory_space<vmem>>, vector<1x8x128xf32>
    %749 = vector.shape_cast %748 : vector<1x8x128xf32> to vector<8x128xf32>
    %c34_303 = arith.constant 34 : index
    %c0_304 = arith.constant 0 : index
    %c0_305 = arith.constant 0 : index
    %750 = vector.load %arg1[%c34_303, %c0_304, %c0_305] : memref<63x8x128xf32, #tpu.memory_space<vmem>>, vector<1x8x128xf32>
    %751 = vector.shape_cast %750 : vector<1x8x128xf32> to vector<8x128xf32>
    %c35_306 = arith.constant 35 : index
    %c0_307 = arith.constant 0 : index
    %c0_308 = arith.constant 0 : index
    %752 = vector.load %arg1[%c35_306, %c0_307, %c0_308] : memref<63x8x128xf32, #tpu.memory_space<vmem>>, vector<1x8x128xf32>
    %753 = vector.shape_cast %752 : vector<1x8x128xf32> to vector<8x128xf32>
    %754 = arith.subf %749, %743 : vector<8x128xf32>
    %755 = arith.subf %751, %745 : vector<8x128xf32>
    %756 = arith.subf %753, %747 : vector<8x128xf32>
    %757 = arith.mulf %754, %754 : vector<8x128xf32>
    %758 = arith.mulf %755, %755 : vector<8x128xf32>
    %759 = arith.addf %757, %758 : vector<8x128xf32>
    %760 = arith.mulf %756, %756 : vector<8x128xf32>
    %761 = arith.addf %759, %760 : vector<8x128xf32>
    %762 = math.rsqrt %761 : vector<8x128xf32>
    %763 = arith.mulf %761, %762 : vector<8x128xf32>
    %c94 = arith.constant 94 : index
    %c0_309 = arith.constant 0 : index
    %c0_310 = arith.constant 0 : index
    %764 = vector.load %arg2[%c94, %c0_309, %c0_310] : memref<105x8x128xf32, #tpu.memory_space<vmem>>, vector<1x8x128xf32>
    %765 = vector.shape_cast %764 : vector<1x8x128xf32> to vector<8x128xf32>
    %766 = vector.shape_cast %763 : vector<8x128xf32> to vector<1x8x128xf32>
    tpu.vector_store %arg2[%c94, %c0_309, %c0_310], %766 {strides = array<i32>} : memref<105x8x128xf32, #tpu.memory_space<vmem>>, vector<1x8x128xf32>,
    %767 = arith.mulf %754, %762 : vector<8x128xf32>
    %768 = arith.mulf %755, %762 : vector<8x128xf32>
    %769 = arith.mulf %756, %762 : vector<8x128xf32>
    %770 = arith.mulf %767, %767 : vector<8x128xf32>
    %771 = arith.mulf %768, %768 : vector<8x128xf32>
    %772 = arith.addf %770, %771 : vector<8x128xf32>
    %773 = arith.mulf %769, %769 : vector<8x128xf32>
    %774 = arith.addf %772, %773 : vector<8x128xf32>
    %775 = arith.mulf %690, %767 : vector<8x128xf32>
    %776 = arith.mulf %691, %768 : vector<8x128xf32>
    %777 = arith.addf %775, %776 : vector<8x128xf32>
    %778 = arith.mulf %692, %769 : vector<8x128xf32>
    %779 = arith.addf %777, %778 : vector<8x128xf32>
    %cst_311 = arith.constant 0.000000e+00 : f32
    %780 = vector.broadcast %cst_311 : f32 to vector<8x128xf32>
    %781 = arith.subf %780, %779 : vector<8x128xf32>
    %782 = arith.mulf %697, %774 : vector<8x128xf32>
    %783 = math.rsqrt %782 : vector<8x128xf32>
    %784 = math.rsqrt %783 : vector<8x128xf32>
    %785 = arith.addf %781, %784 : vector<8x128xf32>
    %786 = arith.mulf %768, %692 : vector<8x128xf32>
    %787 = arith.mulf %769, %691 : vector<8x128xf32>
    %788 = arith.subf %786, %787 : vector<8x128xf32>
    %789 = arith.mulf %769, %690 : vector<8x128xf32>
    %790 = arith.mulf %767, %692 : vector<8x128xf32>
    %791 = arith.subf %789, %790 : vector<8x128xf32>
    %792 = arith.mulf %767, %691 : vector<8x128xf32>
    %793 = arith.mulf %768, %690 : vector<8x128xf32>
    %794 = arith.subf %792, %793 : vector<8x128xf32>
    %795 = arith.mulf %785, %785 : vector<8x128xf32>
    %796 = arith.mulf %788, %788 : vector<8x128xf32>
    %797 = arith.addf %795, %796 : vector<8x128xf32>
    %798 = arith.mulf %791, %791 : vector<8x128xf32>
    %799 = arith.addf %797, %798 : vector<8x128xf32>
    %800 = arith.mulf %794, %794 : vector<8x128xf32>
    %801 = arith.addf %799, %800 : vector<8x128xf32>
    %802 = math.rsqrt %801 : vector<8x128xf32>
    %803 = arith.mulf %785, %802 : vector<8x128xf32>
    %c40 = arith.constant 40 : index
    %c0_312 = arith.constant 0 : index
    %c0_313 = arith.constant 0 : index
    %804 = vector.load %arg2[%c40, %c0_312, %c0_313] : memref<105x8x128xf32, #tpu.memory_space<vmem>>, vector<1x8x128xf32>
    %805 = vector.shape_cast %804 : vector<1x8x128xf32> to vector<8x128xf32>
    %806 = vector.shape_cast %803 : vector<8x128xf32> to vector<1x8x128xf32>
    tpu.vector_store %arg2[%c40, %c0_312, %c0_313], %806 {strides = array<i32>} : memref<105x8x128xf32, #tpu.memory_space<vmem>>, vector<1x8x128xf32>,
    %807 = arith.mulf %788, %802 : vector<8x128xf32>
    %c41 = arith.constant 41 : index
    %c0_314 = arith.constant 0 : index
    %c0_315 = arith.constant 0 : index
    %808 = vector.load %arg2[%c41, %c0_314, %c0_315] : memref<105x8x128xf32, #tpu.memory_space<vmem>>, vector<1x8x128xf32>
    %809 = vector.shape_cast %808 : vector<1x8x128xf32> to vector<8x128xf32>
    %810 = vector.shape_cast %807 : vector<8x128xf32> to vector<1x8x128xf32>
    tpu.vector_store %arg2[%c41, %c0_314, %c0_315], %810 {strides = array<i32>} : memref<105x8x128xf32, #tpu.memory_space<vmem>>, vector<1x8x128xf32>,
    %811 = arith.mulf %791, %802 : vector<8x128xf32>
    %c42 = arith.constant 42 : index
    %c0_316 = arith.constant 0 : index
    %c0_317 = arith.constant 0 : index
    %812 = vector.load %arg2[%c42, %c0_316, %c0_317] : memref<105x8x128xf32, #tpu.memory_space<vmem>>, vector<1x8x128xf32>
    %813 = vector.shape_cast %812 : vector<1x8x128xf32> to vector<8x128xf32>
    %814 = vector.shape_cast %811 : vector<8x128xf32> to vector<1x8x128xf32>
    tpu.vector_store %arg2[%c42, %c0_316, %c0_317], %814 {strides = array<i32>} : memref<105x8x128xf32, #tpu.memory_space<vmem>>, vector<1x8x128xf32>,
    %815 = arith.mulf %794, %802 : vector<8x128xf32>
    %c43 = arith.constant 43 : index
    %c0_318 = arith.constant 0 : index
    %c0_319 = arith.constant 0 : index
    %816 = vector.load %arg2[%c43, %c0_318, %c0_319] : memref<105x8x128xf32, #tpu.memory_space<vmem>>, vector<1x8x128xf32>
    %817 = vector.shape_cast %816 : vector<1x8x128xf32> to vector<8x128xf32>
    %818 = vector.shape_cast %815 : vector<8x128xf32> to vector<1x8x128xf32>
    tpu.vector_store %arg2[%c43, %c0_318, %c0_319], %818 {strides = array<i32>} : memref<105x8x128xf32, #tpu.memory_space<vmem>>, vector<1x8x128xf32>,
    %c33_320 = arith.constant 33 : index
    %c0_321 = arith.constant 0 : index
    %c0_322 = arith.constant 0 : index
    %819 = vector.load %arg1[%c33_320, %c0_321, %c0_322] : memref<63x8x128xf32, #tpu.memory_space<vmem>>, vector<1x8x128xf32>
    %820 = vector.shape_cast %819 : vector<1x8x128xf32> to vector<8x128xf32>
    %c34_323 = arith.constant 34 : index
    %c0_324 = arith.constant 0 : index
    %c0_325 = arith.constant 0 : index
    %821 = vector.load %arg1[%c34_323, %c0_324, %c0_325] : memref<63x8x128xf32, #tpu.memory_space<vmem>>, vector<1x8x128xf32>
    %822 = vector.shape_cast %821 : vector<1x8x128xf32> to vector<8x128xf32>
    %c35_326 = arith.constant 35 : index
    %c0_327 = arith.constant 0 : index
    %c0_328 = arith.constant 0 : index
    %823 = vector.load %arg1[%c35_326, %c0_327, %c0_328] : memref<63x8x128xf32, #tpu.memory_space<vmem>>, vector<1x8x128xf32>
    %824 = vector.shape_cast %823 : vector<1x8x128xf32> to vector<8x128xf32>
    %c36_329 = arith.constant 36 : index
    %c0_330 = arith.constant 0 : index
    %c0_331 = arith.constant 0 : index
    %825 = vector.load %arg1[%c36_329, %c0_330, %c0_331] : memref<63x8x128xf32, #tpu.memory_space<vmem>>, vector<1x8x128xf32>
    %826 = vector.shape_cast %825 : vector<1x8x128xf32> to vector<8x128xf32>
    %c37_332 = arith.constant 37 : index
    %c0_333 = arith.constant 0 : index
    %c0_334 = arith.constant 0 : index
    %827 = vector.load %arg1[%c37_332, %c0_333, %c0_334] : memref<63x8x128xf32, #tpu.memory_space<vmem>>, vector<1x8x128xf32>
    %828 = vector.shape_cast %827 : vector<1x8x128xf32> to vector<8x128xf32>
    %c38_335 = arith.constant 38 : index
    %c0_336 = arith.constant 0 : index
    %c0_337 = arith.constant 0 : index
    %829 = vector.load %arg1[%c38_335, %c0_336, %c0_337] : memref<63x8x128xf32, #tpu.memory_space<vmem>>, vector<1x8x128xf32>
    %830 = vector.shape_cast %829 : vector<1x8x128xf32> to vector<8x128xf32>
    %831 = arith.subf %826, %820 : vector<8x128xf32>
    %832 = arith.subf %828, %822 : vector<8x128xf32>
    %833 = arith.subf %830, %824 : vector<8x128xf32>
    %834 = arith.mulf %831, %831 : vector<8x128xf32>
    %835 = arith.mulf %832, %832 : vector<8x128xf32>
    %836 = arith.addf %834, %835 : vector<8x128xf32>
    %837 = arith.mulf %833, %833 : vector<8x128xf32>
    %838 = arith.addf %836, %837 : vector<8x128xf32>
    %839 = math.rsqrt %838 : vector<8x128xf32>
    %840 = arith.mulf %838, %839 : vector<8x128xf32>
    %c95 = arith.constant 95 : index
    %c0_338 = arith.constant 0 : index
    %c0_339 = arith.constant 0 : index
    %841 = vector.load %arg2[%c95, %c0_338, %c0_339] : memref<105x8x128xf32, #tpu.memory_space<vmem>>, vector<1x8x128xf32>
    %842 = vector.shape_cast %841 : vector<1x8x128xf32> to vector<8x128xf32>
    %843 = vector.shape_cast %840 : vector<8x128xf32> to vector<1x8x128xf32>
    tpu.vector_store %arg2[%c95, %c0_338, %c0_339], %843 {strides = array<i32>} : memref<105x8x128xf32, #tpu.memory_space<vmem>>, vector<1x8x128xf32>,
    %844 = arith.mulf %831, %839 : vector<8x128xf32>
    %845 = arith.mulf %832, %839 : vector<8x128xf32>
    %846 = arith.mulf %833, %839 : vector<8x128xf32>
    %847 = arith.mulf %844, %844 : vector<8x128xf32>
    %848 = arith.mulf %845, %845 : vector<8x128xf32>
    %849 = arith.addf %847, %848 : vector<8x128xf32>
    %850 = arith.mulf %846, %846 : vector<8x128xf32>
    %851 = arith.addf %849, %850 : vector<8x128xf32>
    %852 = arith.mulf %767, %844 : vector<8x128xf32>
    %853 = arith.mulf %768, %845 : vector<8x128xf32>
    %854 = arith.addf %852, %853 : vector<8x128xf32>
    %855 = arith.mulf %769, %846 : vector<8x128xf32>
    %856 = arith.addf %854, %855 : vector<8x128xf32>
    %cst_340 = arith.constant 0.000000e+00 : f32
    %857 = vector.broadcast %cst_340 : f32 to vector<8x128xf32>
    %858 = arith.subf %857, %856 : vector<8x128xf32>
    %859 = arith.mulf %774, %851 : vector<8x128xf32>
    %860 = math.rsqrt %859 : vector<8x128xf32>
    %861 = math.rsqrt %860 : vector<8x128xf32>
    %862 = arith.addf %858, %861 : vector<8x128xf32>
    %863 = arith.mulf %845, %769 : vector<8x128xf32>
    %864 = arith.mulf %846, %768 : vector<8x128xf32>
    %865 = arith.subf %863, %864 : vector<8x128xf32>
    %866 = arith.mulf %846, %767 : vector<8x128xf32>
    %867 = arith.mulf %844, %769 : vector<8x128xf32>
    %868 = arith.subf %866, %867 : vector<8x128xf32>
    %869 = arith.mulf %844, %768 : vector<8x128xf32>
    %870 = arith.mulf %845, %767 : vector<8x128xf32>
    %871 = arith.subf %869, %870 : vector<8x128xf32>
    %872 = arith.mulf %862, %862 : vector<8x128xf32>
    %873 = arith.mulf %865, %865 : vector<8x128xf32>
    %874 = arith.addf %872, %873 : vector<8x128xf32>
    %875 = arith.mulf %868, %868 : vector<8x128xf32>
    %876 = arith.addf %874, %875 : vector<8x128xf32>
    %877 = arith.mulf %871, %871 : vector<8x128xf32>
    %878 = arith.addf %876, %877 : vector<8x128xf32>
    %879 = math.rsqrt %878 : vector<8x128xf32>
    %880 = arith.mulf %862, %879 : vector<8x128xf32>
    %c44 = arith.constant 44 : index
    %c0_341 = arith.constant 0 : index
    %c0_342 = arith.constant 0 : index
    %881 = vector.load %arg2[%c44, %c0_341, %c0_342] : memref<105x8x128xf32, #tpu.memory_space<vmem>>, vector<1x8x128xf32>
    %882 = vector.shape_cast %881 : vector<1x8x128xf32> to vector<8x128xf32>
    %883 = vector.shape_cast %880 : vector<8x128xf32> to vector<1x8x128xf32>
    tpu.vector_store %arg2[%c44, %c0_341, %c0_342], %883 {strides = array<i32>} : memref<105x8x128xf32, #tpu.memory_space<vmem>>, vector<1x8x128xf32>,
    %884 = arith.mulf %865, %879 : vector<8x128xf32>
    %c45 = arith.constant 45 : index
    %c0_343 = arith.constant 0 : index
    %c0_344 = arith.constant 0 : index
    %885 = vector.load %arg2[%c45, %c0_343, %c0_344] : memref<105x8x128xf32, #tpu.memory_space<vmem>>, vector<1x8x128xf32>
    %886 = vector.shape_cast %885 : vector<1x8x128xf32> to vector<8x128xf32>
    %887 = vector.shape_cast %884 : vector<8x128xf32> to vector<1x8x128xf32>
    tpu.vector_store %arg2[%c45, %c0_343, %c0_344], %887 {strides = array<i32>} : memref<105x8x128xf32, #tpu.memory_space<vmem>>, vector<1x8x128xf32>,
    %888 = arith.mulf %868, %879 : vector<8x128xf32>
    %c46 = arith.constant 46 : index
    %c0_345 = arith.constant 0 : index
    %c0_346 = arith.constant 0 : index
    %889 = vector.load %arg2[%c46, %c0_345, %c0_346] : memref<105x8x128xf32, #tpu.memory_space<vmem>>, vector<1x8x128xf32>
    %890 = vector.shape_cast %889 : vector<1x8x128xf32> to vector<8x128xf32>
    %891 = vector.shape_cast %888 : vector<8x128xf32> to vector<1x8x128xf32>
    tpu.vector_store %arg2[%c46, %c0_345, %c0_346], %891 {strides = array<i32>} : memref<105x8x128xf32, #tpu.memory_space<vmem>>, vector<1x8x128xf32>,
    %892 = arith.mulf %871, %879 : vector<8x128xf32>
    %c47 = arith.constant 47 : index
    %c0_347 = arith.constant 0 : index
    %c0_348 = arith.constant 0 : index
    %893 = vector.load %arg2[%c47, %c0_347, %c0_348] : memref<105x8x128xf32, #tpu.memory_space<vmem>>, vector<1x8x128xf32>
    %894 = vector.shape_cast %893 : vector<1x8x128xf32> to vector<8x128xf32>
    %895 = vector.shape_cast %892 : vector<8x128xf32> to vector<1x8x128xf32>
    tpu.vector_store %arg2[%c47, %c0_347, %c0_348], %895 {strides = array<i32>} : memref<105x8x128xf32, #tpu.memory_space<vmem>>, vector<1x8x128xf32>,
    %c27_349 = arith.constant 27 : index
    %c0_350 = arith.constant 0 : index
    %c0_351 = arith.constant 0 : index
    %896 = vector.load %arg1[%c27_349, %c0_350, %c0_351] : memref<63x8x128xf32, #tpu.memory_space<vmem>>, vector<1x8x128xf32>
    %897 = vector.shape_cast %896 : vector<1x8x128xf32> to vector<8x128xf32>
    %c28_352 = arith.constant 28 : index
    %c0_353 = arith.constant 0 : index
    %c0_354 = arith.constant 0 : index
    %898 = vector.load %arg1[%c28_352, %c0_353, %c0_354] : memref<63x8x128xf32, #tpu.memory_space<vmem>>, vector<1x8x128xf32>
    %899 = vector.shape_cast %898 : vector<1x8x128xf32> to vector<8x128xf32>
    %c29_355 = arith.constant 29 : index
    %c0_356 = arith.constant 0 : index
    %c0_357 = arith.constant 0 : index
    %900 = vector.load %arg1[%c29_355, %c0_356, %c0_357] : memref<63x8x128xf32, #tpu.memory_space<vmem>>, vector<1x8x128xf32>
    %901 = vector.shape_cast %900 : vector<1x8x128xf32> to vector<8x128xf32>
    %c39_358 = arith.constant 39 : index
    %c0_359 = arith.constant 0 : index
    %c0_360 = arith.constant 0 : index
    %902 = vector.load %arg1[%c39_358, %c0_359, %c0_360] : memref<63x8x128xf32, #tpu.memory_space<vmem>>, vector<1x8x128xf32>
    %903 = vector.shape_cast %902 : vector<1x8x128xf32> to vector<8x128xf32>
    %c40_361 = arith.constant 40 : index
    %c0_362 = arith.constant 0 : index
    %c0_363 = arith.constant 0 : index
    %904 = vector.load %arg1[%c40_361, %c0_362, %c0_363] : memref<63x8x128xf32, #tpu.memory_space<vmem>>, vector<1x8x128xf32>
    %905 = vector.shape_cast %904 : vector<1x8x128xf32> to vector<8x128xf32>
    %c41_364 = arith.constant 41 : index
    %c0_365 = arith.constant 0 : index
    %c0_366 = arith.constant 0 : index
    %906 = vector.load %arg1[%c41_364, %c0_365, %c0_366] : memref<63x8x128xf32, #tpu.memory_space<vmem>>, vector<1x8x128xf32>
    %907 = vector.shape_cast %906 : vector<1x8x128xf32> to vector<8x128xf32>
    %908 = arith.subf %903, %897 : vector<8x128xf32>
    %909 = arith.subf %905, %899 : vector<8x128xf32>
    %910 = arith.subf %907, %901 : vector<8x128xf32>
    %911 = arith.mulf %908, %908 : vector<8x128xf32>
    %912 = arith.mulf %909, %909 : vector<8x128xf32>
    %913 = arith.addf %911, %912 : vector<8x128xf32>
    %914 = arith.mulf %910, %910 : vector<8x128xf32>
    %915 = arith.addf %913, %914 : vector<8x128xf32>
    %916 = math.rsqrt %915 : vector<8x128xf32>
    %917 = arith.mulf %915, %916 : vector<8x128xf32>
    %c96 = arith.constant 96 : index
    %c0_367 = arith.constant 0 : index
    %c0_368 = arith.constant 0 : index
    %918 = vector.load %arg2[%c96, %c0_367, %c0_368] : memref<105x8x128xf32, #tpu.memory_space<vmem>>, vector<1x8x128xf32>
    %919 = vector.shape_cast %918 : vector<1x8x128xf32> to vector<8x128xf32>
    %920 = vector.shape_cast %917 : vector<8x128xf32> to vector<1x8x128xf32>
    tpu.vector_store %arg2[%c96, %c0_367, %c0_368], %920 {strides = array<i32>} : memref<105x8x128xf32, #tpu.memory_space<vmem>>, vector<1x8x128xf32>,
    %921 = arith.mulf %908, %916 : vector<8x128xf32>
    %922 = arith.mulf %909, %916 : vector<8x128xf32>
    %923 = arith.mulf %910, %916 : vector<8x128xf32>
    %924 = arith.mulf %921, %921 : vector<8x128xf32>
    %925 = arith.mulf %922, %922 : vector<8x128xf32>
    %926 = arith.addf %924, %925 : vector<8x128xf32>
    %927 = arith.mulf %923, %923 : vector<8x128xf32>
    %928 = arith.addf %926, %927 : vector<8x128xf32>
    %929 = arith.mulf %613, %921 : vector<8x128xf32>
    %930 = arith.mulf %614, %922 : vector<8x128xf32>
    %931 = arith.addf %929, %930 : vector<8x128xf32>
    %932 = arith.mulf %615, %923 : vector<8x128xf32>
    %933 = arith.addf %931, %932 : vector<8x128xf32>
    %cst_369 = arith.constant 0.000000e+00 : f32
    %934 = vector.broadcast %cst_369 : f32 to vector<8x128xf32>
    %935 = arith.subf %934, %933 : vector<8x128xf32>
    %936 = arith.mulf %620, %928 : vector<8x128xf32>
    %937 = math.rsqrt %936 : vector<8x128xf32>
    %938 = math.rsqrt %937 : vector<8x128xf32>
    %939 = arith.addf %935, %938 : vector<8x128xf32>
    %940 = arith.mulf %922, %615 : vector<8x128xf32>
    %941 = arith.mulf %923, %614 : vector<8x128xf32>
    %942 = arith.subf %940, %941 : vector<8x128xf32>
    %943 = arith.mulf %923, %613 : vector<8x128xf32>
    %944 = arith.mulf %921, %615 : vector<8x128xf32>
    %945 = arith.subf %943, %944 : vector<8x128xf32>
    %946 = arith.mulf %921, %614 : vector<8x128xf32>
    %947 = arith.mulf %922, %613 : vector<8x128xf32>
    %948 = arith.subf %946, %947 : vector<8x128xf32>
    %949 = arith.mulf %939, %939 : vector<8x128xf32>
    %950 = arith.mulf %942, %942 : vector<8x128xf32>
    %951 = arith.addf %949, %950 : vector<8x128xf32>
    %952 = arith.mulf %945, %945 : vector<8x128xf32>
    %953 = arith.addf %951, %952 : vector<8x128xf32>
    %954 = arith.mulf %948, %948 : vector<8x128xf32>
    %955 = arith.addf %953, %954 : vector<8x128xf32>
    %956 = math.rsqrt %955 : vector<8x128xf32>
    %957 = arith.mulf %939, %956 : vector<8x128xf32>
    %c48 = arith.constant 48 : index
    %c0_370 = arith.constant 0 : index
    %c0_371 = arith.constant 0 : index
    %958 = vector.load %arg2[%c48, %c0_370, %c0_371] : memref<105x8x128xf32, #tpu.memory_space<vmem>>, vector<1x8x128xf32>
    %959 = vector.shape_cast %958 : vector<1x8x128xf32> to vector<8x128xf32>
    %960 = vector.shape_cast %957 : vector<8x128xf32> to vector<1x8x128xf32>
    tpu.vector_store %arg2[%c48, %c0_370, %c0_371], %960 {strides = array<i32>} : memref<105x8x128xf32, #tpu.memory_space<vmem>>, vector<1x8x128xf32>,
    %961 = arith.mulf %942, %956 : vector<8x128xf32>
    %c49 = arith.constant 49 : index
    %c0_372 = arith.constant 0 : index
    %c0_373 = arith.constant 0 : index
    %962 = vector.load %arg2[%c49, %c0_372, %c0_373] : memref<105x8x128xf32, #tpu.memory_space<vmem>>, vector<1x8x128xf32>
    %963 = vector.shape_cast %962 : vector<1x8x128xf32> to vector<8x128xf32>
    %964 = vector.shape_cast %961 : vector<8x128xf32> to vector<1x8x128xf32>
    tpu.vector_store %arg2[%c49, %c0_372, %c0_373], %964 {strides = array<i32>} : memref<105x8x128xf32, #tpu.memory_space<vmem>>, vector<1x8x128xf32>,
    %965 = arith.mulf %945, %956 : vector<8x128xf32>
    %c50 = arith.constant 50 : index
    %c0_374 = arith.constant 0 : index
    %c0_375 = arith.constant 0 : index
    %966 = vector.load %arg2[%c50, %c0_374, %c0_375] : memref<105x8x128xf32, #tpu.memory_space<vmem>>, vector<1x8x128xf32>
    %967 = vector.shape_cast %966 : vector<1x8x128xf32> to vector<8x128xf32>
    %968 = vector.shape_cast %965 : vector<8x128xf32> to vector<1x8x128xf32>
    tpu.vector_store %arg2[%c50, %c0_374, %c0_375], %968 {strides = array<i32>} : memref<105x8x128xf32, #tpu.memory_space<vmem>>, vector<1x8x128xf32>,
    %969 = arith.mulf %948, %956 : vector<8x128xf32>
    %c51 = arith.constant 51 : index
    %c0_376 = arith.constant 0 : index
    %c0_377 = arith.constant 0 : index
    %970 = vector.load %arg2[%c51, %c0_376, %c0_377] : memref<105x8x128xf32, #tpu.memory_space<vmem>>, vector<1x8x128xf32>
    %971 = vector.shape_cast %970 : vector<1x8x128xf32> to vector<8x128xf32>
    %972 = vector.shape_cast %969 : vector<8x128xf32> to vector<1x8x128xf32>
    tpu.vector_store %arg2[%c51, %c0_376, %c0_377], %972 {strides = array<i32>} : memref<105x8x128xf32, #tpu.memory_space<vmem>>, vector<1x8x128xf32>,
    %c39_378 = arith.constant 39 : index
    %c0_379 = arith.constant 0 : index
    %c0_380 = arith.constant 0 : index
    %973 = vector.load %arg1[%c39_378, %c0_379, %c0_380] : memref<63x8x128xf32, #tpu.memory_space<vmem>>, vector<1x8x128xf32>
    %974 = vector.shape_cast %973 : vector<1x8x128xf32> to vector<8x128xf32>
    %c40_381 = arith.constant 40 : index
    %c0_382 = arith.constant 0 : index
    %c0_383 = arith.constant 0 : index
    %975 = vector.load %arg1[%c40_381, %c0_382, %c0_383] : memref<63x8x128xf32, #tpu.memory_space<vmem>>, vector<1x8x128xf32>
    %976 = vector.shape_cast %975 : vector<1x8x128xf32> to vector<8x128xf32>
    %c41_384 = arith.constant 41 : index
    %c0_385 = arith.constant 0 : index
    %c0_386 = arith.constant 0 : index
    %977 = vector.load %arg1[%c41_384, %c0_385, %c0_386] : memref<63x8x128xf32, #tpu.memory_space<vmem>>, vector<1x8x128xf32>
    %978 = vector.shape_cast %977 : vector<1x8x128xf32> to vector<8x128xf32>
    %c42_387 = arith.constant 42 : index
    %c0_388 = arith.constant 0 : index
    %c0_389 = arith.constant 0 : index
    %979 = vector.load %arg1[%c42_387, %c0_388, %c0_389] : memref<63x8x128xf32, #tpu.memory_space<vmem>>, vector<1x8x128xf32>
    %980 = vector.shape_cast %979 : vector<1x8x128xf32> to vector<8x128xf32>
    %c43_390 = arith.constant 43 : index
    %c0_391 = arith.constant 0 : index
    %c0_392 = arith.constant 0 : index
    %981 = vector.load %arg1[%c43_390, %c0_391, %c0_392] : memref<63x8x128xf32, #tpu.memory_space<vmem>>, vector<1x8x128xf32>
    %982 = vector.shape_cast %981 : vector<1x8x128xf32> to vector<8x128xf32>
    %c44_393 = arith.constant 44 : index
    %c0_394 = arith.constant 0 : index
    %c0_395 = arith.constant 0 : index
    %983 = vector.load %arg1[%c44_393, %c0_394, %c0_395] : memref<63x8x128xf32, #tpu.memory_space<vmem>>, vector<1x8x128xf32>
    %984 = vector.shape_cast %983 : vector<1x8x128xf32> to vector<8x128xf32>
    %985 = arith.subf %980, %974 : vector<8x128xf32>
    %986 = arith.subf %982, %976 : vector<8x128xf32>
    %987 = arith.subf %984, %978 : vector<8x128xf32>
    %988 = arith.mulf %985, %985 : vector<8x128xf32>
    %989 = arith.mulf %986, %986 : vector<8x128xf32>
    %990 = arith.addf %988, %989 : vector<8x128xf32>
    %991 = arith.mulf %987, %987 : vector<8x128xf32>
    %992 = arith.addf %990, %991 : vector<8x128xf32>
    %993 = math.rsqrt %992 : vector<8x128xf32>
    %994 = arith.mulf %992, %993 : vector<8x128xf32>
    %c97 = arith.constant 97 : index
    %c0_396 = arith.constant 0 : index
    %c0_397 = arith.constant 0 : index
    %995 = vector.load %arg2[%c97, %c0_396, %c0_397] : memref<105x8x128xf32, #tpu.memory_space<vmem>>, vector<1x8x128xf32>
    %996 = vector.shape_cast %995 : vector<1x8x128xf32> to vector<8x128xf32>
    %997 = vector.shape_cast %994 : vector<8x128xf32> to vector<1x8x128xf32>
    tpu.vector_store %arg2[%c97, %c0_396, %c0_397], %997 {strides = array<i32>} : memref<105x8x128xf32, #tpu.memory_space<vmem>>, vector<1x8x128xf32>,
    %998 = arith.mulf %985, %993 : vector<8x128xf32>
    %999 = arith.mulf %986, %993 : vector<8x128xf32>
    %1000 = arith.mulf %987, %993 : vector<8x128xf32>
    %1001 = arith.mulf %998, %998 : vector<8x128xf32>
    %1002 = arith.mulf %999, %999 : vector<8x128xf32>
    %1003 = arith.addf %1001, %1002 : vector<8x128xf32>
    %1004 = arith.mulf %1000, %1000 : vector<8x128xf32>
    %1005 = arith.addf %1003, %1004 : vector<8x128xf32>
    %1006 = arith.mulf %921, %998 : vector<8x128xf32>
    %1007 = arith.mulf %922, %999 : vector<8x128xf32>
    %1008 = arith.addf %1006, %1007 : vector<8x128xf32>
    %1009 = arith.mulf %923, %1000 : vector<8x128xf32>
    %1010 = arith.addf %1008, %1009 : vector<8x128xf32>
    %cst_398 = arith.constant 0.000000e+00 : f32
    %1011 = vector.broadcast %cst_398 : f32 to vector<8x128xf32>
    %1012 = arith.subf %1011, %1010 : vector<8x128xf32>
    %1013 = arith.mulf %928, %1005 : vector<8x128xf32>
    %1014 = math.rsqrt %1013 : vector<8x128xf32>
    %1015 = math.rsqrt %1014 : vector<8x128xf32>
    %1016 = arith.addf %1012, %1015 : vector<8x128xf32>
    %1017 = arith.mulf %999, %923 : vector<8x128xf32>
    %1018 = arith.mulf %1000, %922 : vector<8x128xf32>
    %1019 = arith.subf %1017, %1018 : vector<8x128xf32>
    %1020 = arith.mulf %1000, %921 : vector<8x128xf32>
    %1021 = arith.mulf %998, %923 : vector<8x128xf32>
    %1022 = arith.subf %1020, %1021 : vector<8x128xf32>
    %1023 = arith.mulf %998, %922 : vector<8x128xf32>
    %1024 = arith.mulf %999, %921 : vector<8x128xf32>
    %1025 = arith.subf %1023, %1024 : vector<8x128xf32>
    %1026 = arith.mulf %1016, %1016 : vector<8x128xf32>
    %1027 = arith.mulf %1019, %1019 : vector<8x128xf32>
    %1028 = arith.addf %1026, %1027 : vector<8x128xf32>
    %1029 = arith.mulf %1022, %1022 : vector<8x128xf32>
    %1030 = arith.addf %1028, %1029 : vector<8x128xf32>
    %1031 = arith.mulf %1025, %1025 : vector<8x128xf32>
    %1032 = arith.addf %1030, %1031 : vector<8x128xf32>
    %1033 = math.rsqrt %1032 : vector<8x128xf32>
    %1034 = arith.mulf %1016, %1033 : vector<8x128xf32>
    %c52 = arith.constant 52 : index
    %c0_399 = arith.constant 0 : index
    %c0_400 = arith.constant 0 : index
    %1035 = vector.load %arg2[%c52, %c0_399, %c0_400] : memref<105x8x128xf32, #tpu.memory_space<vmem>>, vector<1x8x128xf32>
    %1036 = vector.shape_cast %1035 : vector<1x8x128xf32> to vector<8x128xf32>
    %1037 = vector.shape_cast %1034 : vector<8x128xf32> to vector<1x8x128xf32>
    tpu.vector_store %arg2[%c52, %c0_399, %c0_400], %1037 {strides = array<i32>} : memref<105x8x128xf32, #tpu.memory_space<vmem>>, vector<1x8x128xf32>,
    %1038 = arith.mulf %1019, %1033 : vector<8x128xf32>
    %c53 = arith.constant 53 : index
    %c0_401 = arith.constant 0 : index
    %c0_402 = arith.constant 0 : index
    %1039 = vector.load %arg2[%c53, %c0_401, %c0_402] : memref<105x8x128xf32, #tpu.memory_space<vmem>>, vector<1x8x128xf32>
    %1040 = vector.shape_cast %1039 : vector<1x8x128xf32> to vector<8x128xf32>
    %1041 = vector.shape_cast %1038 : vector<8x128xf32> to vector<1x8x128xf32>
    tpu.vector_store %arg2[%c53, %c0_401, %c0_402], %1041 {strides = array<i32>} : memref<105x8x128xf32, #tpu.memory_space<vmem>>, vector<1x8x128xf32>,
    %1042 = arith.mulf %1022, %1033 : vector<8x128xf32>
    %c54 = arith.constant 54 : index
    %c0_403 = arith.constant 0 : index
    %c0_404 = arith.constant 0 : index
    %1043 = vector.load %arg2[%c54, %c0_403, %c0_404] : memref<105x8x128xf32, #tpu.memory_space<vmem>>, vector<1x8x128xf32>
    %1044 = vector.shape_cast %1043 : vector<1x8x128xf32> to vector<8x128xf32>
    %1045 = vector.shape_cast %1042 : vector<8x128xf32> to vector<1x8x128xf32>
    tpu.vector_store %arg2[%c54, %c0_403, %c0_404], %1045 {strides = array<i32>} : memref<105x8x128xf32, #tpu.memory_space<vmem>>, vector<1x8x128xf32>,
    %1046 = arith.mulf %1025, %1033 : vector<8x128xf32>
    %c55 = arith.constant 55 : index
    %c0_405 = arith.constant 0 : index
    %c0_406 = arith.constant 0 : index
    %1047 = vector.load %arg2[%c55, %c0_405, %c0_406] : memref<105x8x128xf32, #tpu.memory_space<vmem>>, vector<1x8x128xf32>
    %1048 = vector.shape_cast %1047 : vector<1x8x128xf32> to vector<8x128xf32>
    %1049 = vector.shape_cast %1046 : vector<8x128xf32> to vector<1x8x128xf32>
    tpu.vector_store %arg2[%c55, %c0_405, %c0_406], %1049 {strides = array<i32>} : memref<105x8x128xf32, #tpu.memory_space<vmem>>, vector<1x8x128xf32>,
    %c42_407 = arith.constant 42 : index
    %c0_408 = arith.constant 0 : index
    %c0_409 = arith.constant 0 : index
    %1050 = vector.load %arg1[%c42_407, %c0_408, %c0_409] : memref<63x8x128xf32, #tpu.memory_space<vmem>>, vector<1x8x128xf32>
    %1051 = vector.shape_cast %1050 : vector<1x8x128xf32> to vector<8x128xf32>
    %c43_410 = arith.constant 43 : index
    %c0_411 = arith.constant 0 : index
    %c0_412 = arith.constant 0 : index
    %1052 = vector.load %arg1[%c43_410, %c0_411, %c0_412] : memref<63x8x128xf32, #tpu.memory_space<vmem>>, vector<1x8x128xf32>
    %1053 = vector.shape_cast %1052 : vector<1x8x128xf32> to vector<8x128xf32>
    %c44_413 = arith.constant 44 : index
    %c0_414 = arith.constant 0 : index
    %c0_415 = arith.constant 0 : index
    %1054 = vector.load %arg1[%c44_413, %c0_414, %c0_415] : memref<63x8x128xf32, #tpu.memory_space<vmem>>, vector<1x8x128xf32>
    %1055 = vector.shape_cast %1054 : vector<1x8x128xf32> to vector<8x128xf32>
    %c45_416 = arith.constant 45 : index
    %c0_417 = arith.constant 0 : index
    %c0_418 = arith.constant 0 : index
    %1056 = vector.load %arg1[%c45_416, %c0_417, %c0_418] : memref<63x8x128xf32, #tpu.memory_space<vmem>>, vector<1x8x128xf32>
    %1057 = vector.shape_cast %1056 : vector<1x8x128xf32> to vector<8x128xf32>
    %c46_419 = arith.constant 46 : index
    %c0_420 = arith.constant 0 : index
    %c0_421 = arith.constant 0 : index
    %1058 = vector.load %arg1[%c46_419, %c0_420, %c0_421] : memref<63x8x128xf32, #tpu.memory_space<vmem>>, vector<1x8x128xf32>
    %1059 = vector.shape_cast %1058 : vector<1x8x128xf32> to vector<8x128xf32>
    %c47_422 = arith.constant 47 : index
    %c0_423 = arith.constant 0 : index
    %c0_424 = arith.constant 0 : index
    %1060 = vector.load %arg1[%c47_422, %c0_423, %c0_424] : memref<63x8x128xf32, #tpu.memory_space<vmem>>, vector<1x8x128xf32>
    %1061 = vector.shape_cast %1060 : vector<1x8x128xf32> to vector<8x128xf32>
    %1062 = arith.subf %1057, %1051 : vector<8x128xf32>
    %1063 = arith.subf %1059, %1053 : vector<8x128xf32>
    %1064 = arith.subf %1061, %1055 : vector<8x128xf32>
    %1065 = arith.mulf %1062, %1062 : vector<8x128xf32>
    %1066 = arith.mulf %1063, %1063 : vector<8x128xf32>
    %1067 = arith.addf %1065, %1066 : vector<8x128xf32>
    %1068 = arith.mulf %1064, %1064 : vector<8x128xf32>
    %1069 = arith.addf %1067, %1068 : vector<8x128xf32>
    %1070 = math.rsqrt %1069 : vector<8x128xf32>
    %1071 = arith.mulf %1069, %1070 : vector<8x128xf32>
    %c98 = arith.constant 98 : index
    %c0_425 = arith.constant 0 : index
    %c0_426 = arith.constant 0 : index
    %1072 = vector.load %arg2[%c98, %c0_425, %c0_426] : memref<105x8x128xf32, #tpu.memory_space<vmem>>, vector<1x8x128xf32>
    %1073 = vector.shape_cast %1072 : vector<1x8x128xf32> to vector<8x128xf32>
    %1074 = vector.shape_cast %1071 : vector<8x128xf32> to vector<1x8x128xf32>
    tpu.vector_store %arg2[%c98, %c0_425, %c0_426], %1074 {strides = array<i32>} : memref<105x8x128xf32, #tpu.memory_space<vmem>>, vector<1x8x128xf32>,
    %1075 = arith.mulf %1062, %1070 : vector<8x128xf32>
    %1076 = arith.mulf %1063, %1070 : vector<8x128xf32>
    %1077 = arith.mulf %1064, %1070 : vector<8x128xf32>
    %1078 = arith.mulf %1075, %1075 : vector<8x128xf32>
    %1079 = arith.mulf %1076, %1076 : vector<8x128xf32>
    %1080 = arith.addf %1078, %1079 : vector<8x128xf32>
    %1081 = arith.mulf %1077, %1077 : vector<8x128xf32>
    %1082 = arith.addf %1080, %1081 : vector<8x128xf32>
    %1083 = arith.mulf %998, %1075 : vector<8x128xf32>
    %1084 = arith.mulf %999, %1076 : vector<8x128xf32>
    %1085 = arith.addf %1083, %1084 : vector<8x128xf32>
    %1086 = arith.mulf %1000, %1077 : vector<8x128xf32>
    %1087 = arith.addf %1085, %1086 : vector<8x128xf32>
    %cst_427 = arith.constant 0.000000e+00 : f32
    %1088 = vector.broadcast %cst_427 : f32 to vector<8x128xf32>
    %1089 = arith.subf %1088, %1087 : vector<8x128xf32>
    %1090 = arith.mulf %1005, %1082 : vector<8x128xf32>
    %1091 = math.rsqrt %1090 : vector<8x128xf32>
    %1092 = math.rsqrt %1091 : vector<8x128xf32>
    %1093 = arith.addf %1089, %1092 : vector<8x128xf32>
    %1094 = arith.mulf %1076, %1000 : vector<8x128xf32>
    %1095 = arith.mulf %1077, %999 : vector<8x128xf32>
    %1096 = arith.subf %1094, %1095 : vector<8x128xf32>
    %1097 = arith.mulf %1077, %998 : vector<8x128xf32>
    %1098 = arith.mulf %1075, %1000 : vector<8x128xf32>
    %1099 = arith.subf %1097, %1098 : vector<8x128xf32>
    %1100 = arith.mulf %1075, %999 : vector<8x128xf32>
    %1101 = arith.mulf %1076, %998 : vector<8x128xf32>
    %1102 = arith.subf %1100, %1101 : vector<8x128xf32>
    %1103 = arith.mulf %1093, %1093 : vector<8x128xf32>
    %1104 = arith.mulf %1096, %1096 : vector<8x128xf32>
    %1105 = arith.addf %1103, %1104 : vector<8x128xf32>
    %1106 = arith.mulf %1099, %1099 : vector<8x128xf32>
    %1107 = arith.addf %1105, %1106 : vector<8x128xf32>
    %1108 = arith.mulf %1102, %1102 : vector<8x128xf32>
    %1109 = arith.addf %1107, %1108 : vector<8x128xf32>
    %1110 = math.rsqrt %1109 : vector<8x128xf32>
    %1111 = arith.mulf %1093, %1110 : vector<8x128xf32>
    %c56 = arith.constant 56 : index
    %c0_428 = arith.constant 0 : index
    %c0_429 = arith.constant 0 : index
    %1112 = vector.load %arg2[%c56, %c0_428, %c0_429] : memref<105x8x128xf32, #tpu.memory_space<vmem>>, vector<1x8x128xf32>
    %1113 = vector.shape_cast %1112 : vector<1x8x128xf32> to vector<8x128xf32>
    %1114 = vector.shape_cast %1111 : vector<8x128xf32> to vector<1x8x128xf32>
    tpu.vector_store %arg2[%c56, %c0_428, %c0_429], %1114 {strides = array<i32>} : memref<105x8x128xf32, #tpu.memory_space<vmem>>, vector<1x8x128xf32>,
    %1115 = arith.mulf %1096, %1110 : vector<8x128xf32>
    %c57 = arith.constant 57 : index
    %c0_430 = arith.constant 0 : index
    %c0_431 = arith.constant 0 : index
    %1116 = vector.load %arg2[%c57, %c0_430, %c0_431] : memref<105x8x128xf32, #tpu.memory_space<vmem>>, vector<1x8x128xf32>
    %1117 = vector.shape_cast %1116 : vector<1x8x128xf32> to vector<8x128xf32>
    %1118 = vector.shape_cast %1115 : vector<8x128xf32> to vector<1x8x128xf32>
    tpu.vector_store %arg2[%c57, %c0_430, %c0_431], %1118 {strides = array<i32>} : memref<105x8x128xf32, #tpu.memory_space<vmem>>, vector<1x8x128xf32>,
    %1119 = arith.mulf %1099, %1110 : vector<8x128xf32>
    %c58 = arith.constant 58 : index
    %c0_432 = arith.constant 0 : index
    %c0_433 = arith.constant 0 : index
    %1120 = vector.load %arg2[%c58, %c0_432, %c0_433] : memref<105x8x128xf32, #tpu.memory_space<vmem>>, vector<1x8x128xf32>
    %1121 = vector.shape_cast %1120 : vector<1x8x128xf32> to vector<8x128xf32>
    %1122 = vector.shape_cast %1119 : vector<8x128xf32> to vector<1x8x128xf32>
    tpu.vector_store %arg2[%c58, %c0_432, %c0_433], %1122 {strides = array<i32>} : memref<105x8x128xf32, #tpu.memory_space<vmem>>, vector<1x8x128xf32>,
    %1123 = arith.mulf %1102, %1110 : vector<8x128xf32>
    %c59 = arith.constant 59 : index
    %c0_434 = arith.constant 0 : index
    %c0_435 = arith.constant 0 : index
    %1124 = vector.load %arg2[%c59, %c0_434, %c0_435] : memref<105x8x128xf32, #tpu.memory_space<vmem>>, vector<1x8x128xf32>
    %1125 = vector.shape_cast %1124 : vector<1x8x128xf32> to vector<8x128xf32>
    %1126 = vector.shape_cast %1123 : vector<8x128xf32> to vector<1x8x128xf32>
    tpu.vector_store %arg2[%c59, %c0_434, %c0_435], %1126 {strides = array<i32>} : memref<105x8x128xf32, #tpu.memory_space<vmem>>, vector<1x8x128xf32>,
    %c45_436 = arith.constant 45 : index
    %c0_437 = arith.constant 0 : index
    %c0_438 = arith.constant 0 : index
    %1127 = vector.load %arg1[%c45_436, %c0_437, %c0_438] : memref<63x8x128xf32, #tpu.memory_space<vmem>>, vector<1x8x128xf32>
    %1128 = vector.shape_cast %1127 : vector<1x8x128xf32> to vector<8x128xf32>
    %c46_439 = arith.constant 46 : index
    %c0_440 = arith.constant 0 : index
    %c0_441 = arith.constant 0 : index
    %1129 = vector.load %arg1[%c46_439, %c0_440, %c0_441] : memref<63x8x128xf32, #tpu.memory_space<vmem>>, vector<1x8x128xf32>
    %1130 = vector.shape_cast %1129 : vector<1x8x128xf32> to vector<8x128xf32>
    %c47_442 = arith.constant 47 : index
    %c0_443 = arith.constant 0 : index
    %c0_444 = arith.constant 0 : index
    %1131 = vector.load %arg1[%c47_442, %c0_443, %c0_444] : memref<63x8x128xf32, #tpu.memory_space<vmem>>, vector<1x8x128xf32>
    %1132 = vector.shape_cast %1131 : vector<1x8x128xf32> to vector<8x128xf32>
    %c48_445 = arith.constant 48 : index
    %c0_446 = arith.constant 0 : index
    %c0_447 = arith.constant 0 : index
    %1133 = vector.load %arg1[%c48_445, %c0_446, %c0_447] : memref<63x8x128xf32, #tpu.memory_space<vmem>>, vector<1x8x128xf32>
    %1134 = vector.shape_cast %1133 : vector<1x8x128xf32> to vector<8x128xf32>
    %c49_448 = arith.constant 49 : index
    %c0_449 = arith.constant 0 : index
    %c0_450 = arith.constant 0 : index
    %1135 = vector.load %arg1[%c49_448, %c0_449, %c0_450] : memref<63x8x128xf32, #tpu.memory_space<vmem>>, vector<1x8x128xf32>
    %1136 = vector.shape_cast %1135 : vector<1x8x128xf32> to vector<8x128xf32>
    %c50_451 = arith.constant 50 : index
    %c0_452 = arith.constant 0 : index
    %c0_453 = arith.constant 0 : index
    %1137 = vector.load %arg1[%c50_451, %c0_452, %c0_453] : memref<63x8x128xf32, #tpu.memory_space<vmem>>, vector<1x8x128xf32>
    %1138 = vector.shape_cast %1137 : vector<1x8x128xf32> to vector<8x128xf32>
    %1139 = arith.subf %1134, %1128 : vector<8x128xf32>
    %1140 = arith.subf %1136, %1130 : vector<8x128xf32>
    %1141 = arith.subf %1138, %1132 : vector<8x128xf32>
    %1142 = arith.mulf %1139, %1139 : vector<8x128xf32>
    %1143 = arith.mulf %1140, %1140 : vector<8x128xf32>
    %1144 = arith.addf %1142, %1143 : vector<8x128xf32>
    %1145 = arith.mulf %1141, %1141 : vector<8x128xf32>
    %1146 = arith.addf %1144, %1145 : vector<8x128xf32>
    %1147 = math.rsqrt %1146 : vector<8x128xf32>
    %1148 = arith.mulf %1146, %1147 : vector<8x128xf32>
    %c99 = arith.constant 99 : index
    %c0_454 = arith.constant 0 : index
    %c0_455 = arith.constant 0 : index
    %1149 = vector.load %arg2[%c99, %c0_454, %c0_455] : memref<105x8x128xf32, #tpu.memory_space<vmem>>, vector<1x8x128xf32>
    %1150 = vector.shape_cast %1149 : vector<1x8x128xf32> to vector<8x128xf32>
    %1151 = vector.shape_cast %1148 : vector<8x128xf32> to vector<1x8x128xf32>
    tpu.vector_store %arg2[%c99, %c0_454, %c0_455], %1151 {strides = array<i32>} : memref<105x8x128xf32, #tpu.memory_space<vmem>>, vector<1x8x128xf32>,
    %1152 = arith.mulf %1139, %1147 : vector<8x128xf32>
    %1153 = arith.mulf %1140, %1147 : vector<8x128xf32>
    %1154 = arith.mulf %1141, %1147 : vector<8x128xf32>
    %1155 = arith.mulf %1152, %1152 : vector<8x128xf32>
    %1156 = arith.mulf %1153, %1153 : vector<8x128xf32>
    %1157 = arith.addf %1155, %1156 : vector<8x128xf32>
    %1158 = arith.mulf %1154, %1154 : vector<8x128xf32>
    %1159 = arith.addf %1157, %1158 : vector<8x128xf32>
    %1160 = arith.mulf %1075, %1152 : vector<8x128xf32>
    %1161 = arith.mulf %1076, %1153 : vector<8x128xf32>
    %1162 = arith.addf %1160, %1161 : vector<8x128xf32>
    %1163 = arith.mulf %1077, %1154 : vector<8x128xf32>
    %1164 = arith.addf %1162, %1163 : vector<8x128xf32>
    %cst_456 = arith.constant 0.000000e+00 : f32
    %1165 = vector.broadcast %cst_456 : f32 to vector<8x128xf32>
    %1166 = arith.subf %1165, %1164 : vector<8x128xf32>
    %1167 = arith.mulf %1082, %1159 : vector<8x128xf32>
    %1168 = math.rsqrt %1167 : vector<8x128xf32>
    %1169 = math.rsqrt %1168 : vector<8x128xf32>
    %1170 = arith.addf %1166, %1169 : vector<8x128xf32>
    %1171 = arith.mulf %1153, %1077 : vector<8x128xf32>
    %1172 = arith.mulf %1154, %1076 : vector<8x128xf32>
    %1173 = arith.subf %1171, %1172 : vector<8x128xf32>
    %1174 = arith.mulf %1154, %1075 : vector<8x128xf32>
    %1175 = arith.mulf %1152, %1077 : vector<8x128xf32>
    %1176 = arith.subf %1174, %1175 : vector<8x128xf32>
    %1177 = arith.mulf %1152, %1076 : vector<8x128xf32>
    %1178 = arith.mulf %1153, %1075 : vector<8x128xf32>
    %1179 = arith.subf %1177, %1178 : vector<8x128xf32>
    %1180 = arith.mulf %1170, %1170 : vector<8x128xf32>
    %1181 = arith.mulf %1173, %1173 : vector<8x128xf32>
    %1182 = arith.addf %1180, %1181 : vector<8x128xf32>
    %1183 = arith.mulf %1176, %1176 : vector<8x128xf32>
    %1184 = arith.addf %1182, %1183 : vector<8x128xf32>
    %1185 = arith.mulf %1179, %1179 : vector<8x128xf32>
    %1186 = arith.addf %1184, %1185 : vector<8x128xf32>
    %1187 = math.rsqrt %1186 : vector<8x128xf32>
    %1188 = arith.mulf %1170, %1187 : vector<8x128xf32>
    %c60 = arith.constant 60 : index
    %c0_457 = arith.constant 0 : index
    %c0_458 = arith.constant 0 : index
    %1189 = vector.load %arg2[%c60, %c0_457, %c0_458] : memref<105x8x128xf32, #tpu.memory_space<vmem>>, vector<1x8x128xf32>
    %1190 = vector.shape_cast %1189 : vector<1x8x128xf32> to vector<8x128xf32>
    %1191 = vector.shape_cast %1188 : vector<8x128xf32> to vector<1x8x128xf32>
    tpu.vector_store %arg2[%c60, %c0_457, %c0_458], %1191 {strides = array<i32>} : memref<105x8x128xf32, #tpu.memory_space<vmem>>, vector<1x8x128xf32>,
    %1192 = arith.mulf %1173, %1187 : vector<8x128xf32>
    %c61 = arith.constant 61 : index
    %c0_459 = arith.constant 0 : index
    %c0_460 = arith.constant 0 : index
    %1193 = vector.load %arg2[%c61, %c0_459, %c0_460] : memref<105x8x128xf32, #tpu.memory_space<vmem>>, vector<1x8x128xf32>
    %1194 = vector.shape_cast %1193 : vector<1x8x128xf32> to vector<8x128xf32>
    %1195 = vector.shape_cast %1192 : vector<8x128xf32> to vector<1x8x128xf32>
    tpu.vector_store %arg2[%c61, %c0_459, %c0_460], %1195 {strides = array<i32>} : memref<105x8x128xf32, #tpu.memory_space<vmem>>, vector<1x8x128xf32>,
    %1196 = arith.mulf %1176, %1187 : vector<8x128xf32>
    %c62 = arith.constant 62 : index
    %c0_461 = arith.constant 0 : index
    %c0_462 = arith.constant 0 : index
    %1197 = vector.load %arg2[%c62, %c0_461, %c0_462] : memref<105x8x128xf32, #tpu.memory_space<vmem>>, vector<1x8x128xf32>
    %1198 = vector.shape_cast %1197 : vector<1x8x128xf32> to vector<8x128xf32>
    %1199 = vector.shape_cast %1196 : vector<8x128xf32> to vector<1x8x128xf32>
    tpu.vector_store %arg2[%c62, %c0_461, %c0_462], %1199 {strides = array<i32>} : memref<105x8x128xf32, #tpu.memory_space<vmem>>, vector<1x8x128xf32>,
    %1200 = arith.mulf %1179, %1187 : vector<8x128xf32>
    %c63 = arith.constant 63 : index
    %c0_463 = arith.constant 0 : index
    %c0_464 = arith.constant 0 : index
    %1201 = vector.load %arg2[%c63, %c0_463, %c0_464] : memref<105x8x128xf32, #tpu.memory_space<vmem>>, vector<1x8x128xf32>
    %1202 = vector.shape_cast %1201 : vector<1x8x128xf32> to vector<8x128xf32>
    %1203 = vector.shape_cast %1200 : vector<8x128xf32> to vector<1x8x128xf32>
    tpu.vector_store %arg2[%c63, %c0_463, %c0_464], %1203 {strides = array<i32>} : memref<105x8x128xf32, #tpu.memory_space<vmem>>, vector<1x8x128xf32>,
    %c39_465 = arith.constant 39 : index
    %c0_466 = arith.constant 0 : index
    %c0_467 = arith.constant 0 : index
    %1204 = vector.load %arg1[%c39_465, %c0_466, %c0_467] : memref<63x8x128xf32, #tpu.memory_space<vmem>>, vector<1x8x128xf32>
    %1205 = vector.shape_cast %1204 : vector<1x8x128xf32> to vector<8x128xf32>
    %c40_468 = arith.constant 40 : index
    %c0_469 = arith.constant 0 : index
    %c0_470 = arith.constant 0 : index
    %1206 = vector.load %arg1[%c40_468, %c0_469, %c0_470] : memref<63x8x128xf32, #tpu.memory_space<vmem>>, vector<1x8x128xf32>
    %1207 = vector.shape_cast %1206 : vector<1x8x128xf32> to vector<8x128xf32>
    %c41_471 = arith.constant 41 : index
    %c0_472 = arith.constant 0 : index
    %c0_473 = arith.constant 0 : index
    %1208 = vector.load %arg1[%c41_471, %c0_472, %c0_473] : memref<63x8x128xf32, #tpu.memory_space<vmem>>, vector<1x8x128xf32>
    %1209 = vector.shape_cast %1208 : vector<1x8x128xf32> to vector<8x128xf32>
    %c51_474 = arith.constant 51 : index
    %c0_475 = arith.constant 0 : index
    %c0_476 = arith.constant 0 : index
    %1210 = vector.load %arg1[%c51_474, %c0_475, %c0_476] : memref<63x8x128xf32, #tpu.memory_space<vmem>>, vector<1x8x128xf32>
    %1211 = vector.shape_cast %1210 : vector<1x8x128xf32> to vector<8x128xf32>
    %c52_477 = arith.constant 52 : index
    %c0_478 = arith.constant 0 : index
    %c0_479 = arith.constant 0 : index
    %1212 = vector.load %arg1[%c52_477, %c0_478, %c0_479] : memref<63x8x128xf32, #tpu.memory_space<vmem>>, vector<1x8x128xf32>
    %1213 = vector.shape_cast %1212 : vector<1x8x128xf32> to vector<8x128xf32>
    %c53_480 = arith.constant 53 : index
    %c0_481 = arith.constant 0 : index
    %c0_482 = arith.constant 0 : index
    %1214 = vector.load %arg1[%c53_480, %c0_481, %c0_482] : memref<63x8x128xf32, #tpu.memory_space<vmem>>, vector<1x8x128xf32>
    %1215 = vector.shape_cast %1214 : vector<1x8x128xf32> to vector<8x128xf32>
    %1216 = arith.subf %1211, %1205 : vector<8x128xf32>
    %1217 = arith.subf %1213, %1207 : vector<8x128xf32>
    %1218 = arith.subf %1215, %1209 : vector<8x128xf32>
    %1219 = arith.mulf %1216, %1216 : vector<8x128xf32>
    %1220 = arith.mulf %1217, %1217 : vector<8x128xf32>
    %1221 = arith.addf %1219, %1220 : vector<8x128xf32>
    %1222 = arith.mulf %1218, %1218 : vector<8x128xf32>
    %1223 = arith.addf %1221, %1222 : vector<8x128xf32>
    %1224 = math.rsqrt %1223 : vector<8x128xf32>
    %1225 = arith.mulf %1223, %1224 : vector<8x128xf32>
    %c100 = arith.constant 100 : index
    %c0_483 = arith.constant 0 : index
    %c0_484 = arith.constant 0 : index
    %1226 = vector.load %arg2[%c100, %c0_483, %c0_484] : memref<105x8x128xf32, #tpu.memory_space<vmem>>, vector<1x8x128xf32>
    %1227 = vector.shape_cast %1226 : vector<1x8x128xf32> to vector<8x128xf32>
    %1228 = vector.shape_cast %1225 : vector<8x128xf32> to vector<1x8x128xf32>
    tpu.vector_store %arg2[%c100, %c0_483, %c0_484], %1228 {strides = array<i32>} : memref<105x8x128xf32, #tpu.memory_space<vmem>>, vector<1x8x128xf32>,
    %1229 = arith.mulf %1216, %1224 : vector<8x128xf32>
    %1230 = arith.mulf %1217, %1224 : vector<8x128xf32>
    %1231 = arith.mulf %1218, %1224 : vector<8x128xf32>
    %1232 = arith.mulf %1229, %1229 : vector<8x128xf32>
    %1233 = arith.mulf %1230, %1230 : vector<8x128xf32>
    %1234 = arith.addf %1232, %1233 : vector<8x128xf32>
    %1235 = arith.mulf %1231, %1231 : vector<8x128xf32>
    %1236 = arith.addf %1234, %1235 : vector<8x128xf32>
    %1237 = arith.mulf %921, %1229 : vector<8x128xf32>
    %1238 = arith.mulf %922, %1230 : vector<8x128xf32>
    %1239 = arith.addf %1237, %1238 : vector<8x128xf32>
    %1240 = arith.mulf %923, %1231 : vector<8x128xf32>
    %1241 = arith.addf %1239, %1240 : vector<8x128xf32>
    %cst_485 = arith.constant 0.000000e+00 : f32
    %1242 = vector.broadcast %cst_485 : f32 to vector<8x128xf32>
    %1243 = arith.subf %1242, %1241 : vector<8x128xf32>
    %1244 = arith.mulf %928, %1236 : vector<8x128xf32>
    %1245 = math.rsqrt %1244 : vector<8x128xf32>
    %1246 = math.rsqrt %1245 : vector<8x128xf32>
    %1247 = arith.addf %1243, %1246 : vector<8x128xf32>
    %1248 = arith.mulf %1230, %923 : vector<8x128xf32>
    %1249 = arith.mulf %1231, %922 : vector<8x128xf32>
    %1250 = arith.subf %1248, %1249 : vector<8x128xf32>
    %1251 = arith.mulf %1231, %921 : vector<8x128xf32>
    %1252 = arith.mulf %1229, %923 : vector<8x128xf32>
    %1253 = arith.subf %1251, %1252 : vector<8x128xf32>
    %1254 = arith.mulf %1229, %922 : vector<8x128xf32>
    %1255 = arith.mulf %1230, %921 : vector<8x128xf32>
    %1256 = arith.subf %1254, %1255 : vector<8x128xf32>
    %1257 = arith.mulf %1247, %1247 : vector<8x128xf32>
    %1258 = arith.mulf %1250, %1250 : vector<8x128xf32>
    %1259 = arith.addf %1257, %1258 : vector<8x128xf32>
    %1260 = arith.mulf %1253, %1253 : vector<8x128xf32>
    %1261 = arith.addf %1259, %1260 : vector<8x128xf32>
    %1262 = arith.mulf %1256, %1256 : vector<8x128xf32>
    %1263 = arith.addf %1261, %1262 : vector<8x128xf32>
    %1264 = math.rsqrt %1263 : vector<8x128xf32>
    %1265 = arith.mulf %1247, %1264 : vector<8x128xf32>
    %c64 = arith.constant 64 : index
    %c0_486 = arith.constant 0 : index
    %c0_487 = arith.constant 0 : index
    %1266 = vector.load %arg2[%c64, %c0_486, %c0_487] : memref<105x8x128xf32, #tpu.memory_space<vmem>>, vector<1x8x128xf32>
    %1267 = vector.shape_cast %1266 : vector<1x8x128xf32> to vector<8x128xf32>
    %1268 = vector.shape_cast %1265 : vector<8x128xf32> to vector<1x8x128xf32>
    tpu.vector_store %arg2[%c64, %c0_486, %c0_487], %1268 {strides = array<i32>} : memref<105x8x128xf32, #tpu.memory_space<vmem>>, vector<1x8x128xf32>,
    %1269 = arith.mulf %1250, %1264 : vector<8x128xf32>
    %c65 = arith.constant 65 : index
    %c0_488 = arith.constant 0 : index
    %c0_489 = arith.constant 0 : index
    %1270 = vector.load %arg2[%c65, %c0_488, %c0_489] : memref<105x8x128xf32, #tpu.memory_space<vmem>>, vector<1x8x128xf32>
    %1271 = vector.shape_cast %1270 : vector<1x8x128xf32> to vector<8x128xf32>
    %1272 = vector.shape_cast %1269 : vector<8x128xf32> to vector<1x8x128xf32>
    tpu.vector_store %arg2[%c65, %c0_488, %c0_489], %1272 {strides = array<i32>} : memref<105x8x128xf32, #tpu.memory_space<vmem>>, vector<1x8x128xf32>,
    %1273 = arith.mulf %1253, %1264 : vector<8x128xf32>
    %c66 = arith.constant 66 : index
    %c0_490 = arith.constant 0 : index
    %c0_491 = arith.constant 0 : index
    %1274 = vector.load %arg2[%c66, %c0_490, %c0_491] : memref<105x8x128xf32, #tpu.memory_space<vmem>>, vector<1x8x128xf32>
    %1275 = vector.shape_cast %1274 : vector<1x8x128xf32> to vector<8x128xf32>
    %1276 = vector.shape_cast %1273 : vector<8x128xf32> to vector<1x8x128xf32>
    tpu.vector_store %arg2[%c66, %c0_490, %c0_491], %1276 {strides = array<i32>} : memref<105x8x128xf32, #tpu.memory_space<vmem>>, vector<1x8x128xf32>,
    %1277 = arith.mulf %1256, %1264 : vector<8x128xf32>
    %c67 = arith.constant 67 : index
    %c0_492 = arith.constant 0 : index
    %c0_493 = arith.constant 0 : index
    %1278 = vector.load %arg2[%c67, %c0_492, %c0_493] : memref<105x8x128xf32, #tpu.memory_space<vmem>>, vector<1x8x128xf32>
    %1279 = vector.shape_cast %1278 : vector<1x8x128xf32> to vector<8x128xf32>
    %1280 = vector.shape_cast %1277 : vector<8x128xf32> to vector<1x8x128xf32>
    tpu.vector_store %arg2[%c67, %c0_492, %c0_493], %1280 {strides = array<i32>} : memref<105x8x128xf32, #tpu.memory_space<vmem>>, vector<1x8x128xf32>,
    %c51_494 = arith.constant 51 : index
    %c0_495 = arith.constant 0 : index
    %c0_496 = arith.constant 0 : index
    %1281 = vector.load %arg1[%c51_494, %c0_495, %c0_496] : memref<63x8x128xf32, #tpu.memory_space<vmem>>, vector<1x8x128xf32>
    %1282 = vector.shape_cast %1281 : vector<1x8x128xf32> to vector<8x128xf32>
    %c52_497 = arith.constant 52 : index
    %c0_498 = arith.constant 0 : index
    %c0_499 = arith.constant 0 : index
    %1283 = vector.load %arg1[%c52_497, %c0_498, %c0_499] : memref<63x8x128xf32, #tpu.memory_space<vmem>>, vector<1x8x128xf32>
    %1284 = vector.shape_cast %1283 : vector<1x8x128xf32> to vector<8x128xf32>
    %c53_500 = arith.constant 53 : index
    %c0_501 = arith.constant 0 : index
    %c0_502 = arith.constant 0 : index
    %1285 = vector.load %arg1[%c53_500, %c0_501, %c0_502] : memref<63x8x128xf32, #tpu.memory_space<vmem>>, vector<1x8x128xf32>
    %1286 = vector.shape_cast %1285 : vector<1x8x128xf32> to vector<8x128xf32>
    %c54_503 = arith.constant 54 : index
    %c0_504 = arith.constant 0 : index
    %c0_505 = arith.constant 0 : index
    %1287 = vector.load %arg1[%c54_503, %c0_504, %c0_505] : memref<63x8x128xf32, #tpu.memory_space<vmem>>, vector<1x8x128xf32>
    %1288 = vector.shape_cast %1287 : vector<1x8x128xf32> to vector<8x128xf32>
    %c55_506 = arith.constant 55 : index
    %c0_507 = arith.constant 0 : index
    %c0_508 = arith.constant 0 : index
    %1289 = vector.load %arg1[%c55_506, %c0_507, %c0_508] : memref<63x8x128xf32, #tpu.memory_space<vmem>>, vector<1x8x128xf32>
    %1290 = vector.shape_cast %1289 : vector<1x8x128xf32> to vector<8x128xf32>
    %c56_509 = arith.constant 56 : index
    %c0_510 = arith.constant 0 : index
    %c0_511 = arith.constant 0 : index
    %1291 = vector.load %arg1[%c56_509, %c0_510, %c0_511] : memref<63x8x128xf32, #tpu.memory_space<vmem>>, vector<1x8x128xf32>
    %1292 = vector.shape_cast %1291 : vector<1x8x128xf32> to vector<8x128xf32>
    %1293 = arith.subf %1288, %1282 : vector<8x128xf32>
    %1294 = arith.subf %1290, %1284 : vector<8x128xf32>
    %1295 = arith.subf %1292, %1286 : vector<8x128xf32>
    %1296 = arith.mulf %1293, %1293 : vector<8x128xf32>
    %1297 = arith.mulf %1294, %1294 : vector<8x128xf32>
    %1298 = arith.addf %1296, %1297 : vector<8x128xf32>
    %1299 = arith.mulf %1295, %1295 : vector<8x128xf32>
    %1300 = arith.addf %1298, %1299 : vector<8x128xf32>
    %1301 = math.rsqrt %1300 : vector<8x128xf32>
    %1302 = arith.mulf %1300, %1301 : vector<8x128xf32>
    %c101 = arith.constant 101 : index
    %c0_512 = arith.constant 0 : index
    %c0_513 = arith.constant 0 : index
    %1303 = vector.load %arg2[%c101, %c0_512, %c0_513] : memref<105x8x128xf32, #tpu.memory_space<vmem>>, vector<1x8x128xf32>
    %1304 = vector.shape_cast %1303 : vector<1x8x128xf32> to vector<8x128xf32>
    %1305 = vector.shape_cast %1302 : vector<8x128xf32> to vector<1x8x128xf32>
    tpu.vector_store %arg2[%c101, %c0_512, %c0_513], %1305 {strides = array<i32>} : memref<105x8x128xf32, #tpu.memory_space<vmem>>, vector<1x8x128xf32>,
    %1306 = arith.mulf %1293, %1301 : vector<8x128xf32>
    %1307 = arith.mulf %1294, %1301 : vector<8x128xf32>
    %1308 = arith.mulf %1295, %1301 : vector<8x128xf32>
    %1309 = arith.mulf %1306, %1306 : vector<8x128xf32>
    %1310 = arith.mulf %1307, %1307 : vector<8x128xf32>
    %1311 = arith.addf %1309, %1310 : vector<8x128xf32>
    %1312 = arith.mulf %1308, %1308 : vector<8x128xf32>
    %1313 = arith.addf %1311, %1312 : vector<8x128xf32>
    %1314 = arith.mulf %1229, %1306 : vector<8x128xf32>
    %1315 = arith.mulf %1230, %1307 : vector<8x128xf32>
    %1316 = arith.addf %1314, %1315 : vector<8x128xf32>
    %1317 = arith.mulf %1231, %1308 : vector<8x128xf32>
    %1318 = arith.addf %1316, %1317 : vector<8x128xf32>
    %cst_514 = arith.constant 0.000000e+00 : f32
    %1319 = vector.broadcast %cst_514 : f32 to vector<8x128xf32>
    %1320 = arith.subf %1319, %1318 : vector<8x128xf32>
    %1321 = arith.mulf %1236, %1313 : vector<8x128xf32>
    %1322 = math.rsqrt %1321 : vector<8x128xf32>
    %1323 = math.rsqrt %1322 : vector<8x128xf32>
    %1324 = arith.addf %1320, %1323 : vector<8x128xf32>
    %1325 = arith.mulf %1307, %1231 : vector<8x128xf32>
    %1326 = arith.mulf %1308, %1230 : vector<8x128xf32>
    %1327 = arith.subf %1325, %1326 : vector<8x128xf32>
    %1328 = arith.mulf %1308, %1229 : vector<8x128xf32>
    %1329 = arith.mulf %1306, %1231 : vector<8x128xf32>
    %1330 = arith.subf %1328, %1329 : vector<8x128xf32>
    %1331 = arith.mulf %1306, %1230 : vector<8x128xf32>
    %1332 = arith.mulf %1307, %1229 : vector<8x128xf32>
    %1333 = arith.subf %1331, %1332 : vector<8x128xf32>
    %1334 = arith.mulf %1324, %1324 : vector<8x128xf32>
    %1335 = arith.mulf %1327, %1327 : vector<8x128xf32>
    %1336 = arith.addf %1334, %1335 : vector<8x128xf32>
    %1337 = arith.mulf %1330, %1330 : vector<8x128xf32>
    %1338 = arith.addf %1336, %1337 : vector<8x128xf32>
    %1339 = arith.mulf %1333, %1333 : vector<8x128xf32>
    %1340 = arith.addf %1338, %1339 : vector<8x128xf32>
    %1341 = math.rsqrt %1340 : vector<8x128xf32>
    %1342 = arith.mulf %1324, %1341 : vector<8x128xf32>
    %c68 = arith.constant 68 : index
    %c0_515 = arith.constant 0 : index
    %c0_516 = arith.constant 0 : index
    %1343 = vector.load %arg2[%c68, %c0_515, %c0_516] : memref<105x8x128xf32, #tpu.memory_space<vmem>>, vector<1x8x128xf32>
    %1344 = vector.shape_cast %1343 : vector<1x8x128xf32> to vector<8x128xf32>
    %1345 = vector.shape_cast %1342 : vector<8x128xf32> to vector<1x8x128xf32>
    tpu.vector_store %arg2[%c68, %c0_515, %c0_516], %1345 {strides = array<i32>} : memref<105x8x128xf32, #tpu.memory_space<vmem>>, vector<1x8x128xf32>,
    %1346 = arith.mulf %1327, %1341 : vector<8x128xf32>
    %c69 = arith.constant 69 : index
    %c0_517 = arith.constant 0 : index
    %c0_518 = arith.constant 0 : index
    %1347 = vector.load %arg2[%c69, %c0_517, %c0_518] : memref<105x8x128xf32, #tpu.memory_space<vmem>>, vector<1x8x128xf32>
    %1348 = vector.shape_cast %1347 : vector<1x8x128xf32> to vector<8x128xf32>
    %1349 = vector.shape_cast %1346 : vector<8x128xf32> to vector<1x8x128xf32>
    tpu.vector_store %arg2[%c69, %c0_517, %c0_518], %1349 {strides = array<i32>} : memref<105x8x128xf32, #tpu.memory_space<vmem>>, vector<1x8x128xf32>,
    %1350 = arith.mulf %1330, %1341 : vector<8x128xf32>
    %c70 = arith.constant 70 : index
    %c0_519 = arith.constant 0 : index
    %c0_520 = arith.constant 0 : index
    %1351 = vector.load %arg2[%c70, %c0_519, %c0_520] : memref<105x8x128xf32, #tpu.memory_space<vmem>>, vector<1x8x128xf32>
    %1352 = vector.shape_cast %1351 : vector<1x8x128xf32> to vector<8x128xf32>
    %1353 = vector.shape_cast %1350 : vector<8x128xf32> to vector<1x8x128xf32>
    tpu.vector_store %arg2[%c70, %c0_519, %c0_520], %1353 {strides = array<i32>} : memref<105x8x128xf32, #tpu.memory_space<vmem>>, vector<1x8x128xf32>,
    %1354 = arith.mulf %1333, %1341 : vector<8x128xf32>
    %c71 = arith.constant 71 : index
    %c0_521 = arith.constant 0 : index
    %c0_522 = arith.constant 0 : index
    %1355 = vector.load %arg2[%c71, %c0_521, %c0_522] : memref<105x8x128xf32, #tpu.memory_space<vmem>>, vector<1x8x128xf32>
    %1356 = vector.shape_cast %1355 : vector<1x8x128xf32> to vector<8x128xf32>
    %1357 = vector.shape_cast %1354 : vector<8x128xf32> to vector<1x8x128xf32>
    tpu.vector_store %arg2[%c71, %c0_521, %c0_522], %1357 {strides = array<i32>} : memref<105x8x128xf32, #tpu.memory_space<vmem>>, vector<1x8x128xf32>,
    %c54_523 = arith.constant 54 : index
    %c0_524 = arith.constant 0 : index
    %c0_525 = arith.constant 0 : index
    %1358 = vector.load %arg1[%c54_523, %c0_524, %c0_525] : memref<63x8x128xf32, #tpu.memory_space<vmem>>, vector<1x8x128xf32>
    %1359 = vector.shape_cast %1358 : vector<1x8x128xf32> to vector<8x128xf32>
    %c55_526 = arith.constant 55 : index
    %c0_527 = arith.constant 0 : index
    %c0_528 = arith.constant 0 : index
    %1360 = vector.load %arg1[%c55_526, %c0_527, %c0_528] : memref<63x8x128xf32, #tpu.memory_space<vmem>>, vector<1x8x128xf32>
    %1361 = vector.shape_cast %1360 : vector<1x8x128xf32> to vector<8x128xf32>
    %c56_529 = arith.constant 56 : index
    %c0_530 = arith.constant 0 : index
    %c0_531 = arith.constant 0 : index
    %1362 = vector.load %arg1[%c56_529, %c0_530, %c0_531] : memref<63x8x128xf32, #tpu.memory_space<vmem>>, vector<1x8x128xf32>
    %1363 = vector.shape_cast %1362 : vector<1x8x128xf32> to vector<8x128xf32>
    %c57_532 = arith.constant 57 : index
    %c0_533 = arith.constant 0 : index
    %c0_534 = arith.constant 0 : index
    %1364 = vector.load %arg1[%c57_532, %c0_533, %c0_534] : memref<63x8x128xf32, #tpu.memory_space<vmem>>, vector<1x8x128xf32>
    %1365 = vector.shape_cast %1364 : vector<1x8x128xf32> to vector<8x128xf32>
    %c58_535 = arith.constant 58 : index
    %c0_536 = arith.constant 0 : index
    %c0_537 = arith.constant 0 : index
    %1366 = vector.load %arg1[%c58_535, %c0_536, %c0_537] : memref<63x8x128xf32, #tpu.memory_space<vmem>>, vector<1x8x128xf32>
    %1367 = vector.shape_cast %1366 : vector<1x8x128xf32> to vector<8x128xf32>
    %c59_538 = arith.constant 59 : index
    %c0_539 = arith.constant 0 : index
    %c0_540 = arith.constant 0 : index
    %1368 = vector.load %arg1[%c59_538, %c0_539, %c0_540] : memref<63x8x128xf32, #tpu.memory_space<vmem>>, vector<1x8x128xf32>
    %1369 = vector.shape_cast %1368 : vector<1x8x128xf32> to vector<8x128xf32>
    %1370 = arith.subf %1365, %1359 : vector<8x128xf32>
    %1371 = arith.subf %1367, %1361 : vector<8x128xf32>
    %1372 = arith.subf %1369, %1363 : vector<8x128xf32>
    %1373 = arith.mulf %1370, %1370 : vector<8x128xf32>
    %1374 = arith.mulf %1371, %1371 : vector<8x128xf32>
    %1375 = arith.addf %1373, %1374 : vector<8x128xf32>
    %1376 = arith.mulf %1372, %1372 : vector<8x128xf32>
    %1377 = arith.addf %1375, %1376 : vector<8x128xf32>
    %1378 = math.rsqrt %1377 : vector<8x128xf32>
    %1379 = arith.mulf %1377, %1378 : vector<8x128xf32>
    %c102 = arith.constant 102 : index
    %c0_541 = arith.constant 0 : index
    %c0_542 = arith.constant 0 : index
    %1380 = vector.load %arg2[%c102, %c0_541, %c0_542] : memref<105x8x128xf32, #tpu.memory_space<vmem>>, vector<1x8x128xf32>
    %1381 = vector.shape_cast %1380 : vector<1x8x128xf32> to vector<8x128xf32>
    %1382 = vector.shape_cast %1379 : vector<8x128xf32> to vector<1x8x128xf32>
    tpu.vector_store %arg2[%c102, %c0_541, %c0_542], %1382 {strides = array<i32>} : memref<105x8x128xf32, #tpu.memory_space<vmem>>, vector<1x8x128xf32>,
    %1383 = arith.mulf %1370, %1378 : vector<8x128xf32>
    %1384 = arith.mulf %1371, %1378 : vector<8x128xf32>
    %1385 = arith.mulf %1372, %1378 : vector<8x128xf32>
    %1386 = arith.mulf %1383, %1383 : vector<8x128xf32>
    %1387 = arith.mulf %1384, %1384 : vector<8x128xf32>
    %1388 = arith.addf %1386, %1387 : vector<8x128xf32>
    %1389 = arith.mulf %1385, %1385 : vector<8x128xf32>
    %1390 = arith.addf %1388, %1389 : vector<8x128xf32>
    %1391 = arith.mulf %1306, %1383 : vector<8x128xf32>
    %1392 = arith.mulf %1307, %1384 : vector<8x128xf32>
    %1393 = arith.addf %1391, %1392 : vector<8x128xf32>
    %1394 = arith.mulf %1308, %1385 : vector<8x128xf32>
    %1395 = arith.addf %1393, %1394 : vector<8x128xf32>
    %cst_543 = arith.constant 0.000000e+00 : f32
    %1396 = vector.broadcast %cst_543 : f32 to vector<8x128xf32>
    %1397 = arith.subf %1396, %1395 : vector<8x128xf32>
    %1398 = arith.mulf %1313, %1390 : vector<8x128xf32>
    %1399 = math.rsqrt %1398 : vector<8x128xf32>
    %1400 = math.rsqrt %1399 : vector<8x128xf32>
    %1401 = arith.addf %1397, %1400 : vector<8x128xf32>
    %1402 = arith.mulf %1384, %1308 : vector<8x128xf32>
    %1403 = arith.mulf %1385, %1307 : vector<8x128xf32>
    %1404 = arith.subf %1402, %1403 : vector<8x128xf32>
    %1405 = arith.mulf %1385, %1306 : vector<8x128xf32>
    %1406 = arith.mulf %1383, %1308 : vector<8x128xf32>
    %1407 = arith.subf %1405, %1406 : vector<8x128xf32>
    %1408 = arith.mulf %1383, %1307 : vector<8x128xf32>
    %1409 = arith.mulf %1384, %1306 : vector<8x128xf32>
    %1410 = arith.subf %1408, %1409 : vector<8x128xf32>
    %1411 = arith.mulf %1401, %1401 : vector<8x128xf32>
    %1412 = arith.mulf %1404, %1404 : vector<8x128xf32>
    %1413 = arith.addf %1411, %1412 : vector<8x128xf32>
    %1414 = arith.mulf %1407, %1407 : vector<8x128xf32>
    %1415 = arith.addf %1413, %1414 : vector<8x128xf32>
    %1416 = arith.mulf %1410, %1410 : vector<8x128xf32>
    %1417 = arith.addf %1415, %1416 : vector<8x128xf32>
    %1418 = math.rsqrt %1417 : vector<8x128xf32>
    %1419 = arith.mulf %1401, %1418 : vector<8x128xf32>
    %c72 = arith.constant 72 : index
    %c0_544 = arith.constant 0 : index
    %c0_545 = arith.constant 0 : index
    %1420 = vector.load %arg2[%c72, %c0_544, %c0_545] : memref<105x8x128xf32, #tpu.memory_space<vmem>>, vector<1x8x128xf32>
    %1421 = vector.shape_cast %1420 : vector<1x8x128xf32> to vector<8x128xf32>
    %1422 = vector.shape_cast %1419 : vector<8x128xf32> to vector<1x8x128xf32>
    tpu.vector_store %arg2[%c72, %c0_544, %c0_545], %1422 {strides = array<i32>} : memref<105x8x128xf32, #tpu.memory_space<vmem>>, vector<1x8x128xf32>,
    %1423 = arith.mulf %1404, %1418 : vector<8x128xf32>
    %c73 = arith.constant 73 : index
    %c0_546 = arith.constant 0 : index
    %c0_547 = arith.constant 0 : index
    %1424 = vector.load %arg2[%c73, %c0_546, %c0_547] : memref<105x8x128xf32, #tpu.memory_space<vmem>>, vector<1x8x128xf32>
    %1425 = vector.shape_cast %1424 : vector<1x8x128xf32> to vector<8x128xf32>
    %1426 = vector.shape_cast %1423 : vector<8x128xf32> to vector<1x8x128xf32>
    tpu.vector_store %arg2[%c73, %c0_546, %c0_547], %1426 {strides = array<i32>} : memref<105x8x128xf32, #tpu.memory_space<vmem>>, vector<1x8x128xf32>,
    %1427 = arith.mulf %1407, %1418 : vector<8x128xf32>
    %c74 = arith.constant 74 : index
    %c0_548 = arith.constant 0 : index
    %c0_549 = arith.constant 0 : index
    %1428 = vector.load %arg2[%c74, %c0_548, %c0_549] : memref<105x8x128xf32, #tpu.memory_space<vmem>>, vector<1x8x128xf32>
    %1429 = vector.shape_cast %1428 : vector<1x8x128xf32> to vector<8x128xf32>
    %1430 = vector.shape_cast %1427 : vector<8x128xf32> to vector<1x8x128xf32>
    tpu.vector_store %arg2[%c74, %c0_548, %c0_549], %1430 {strides = array<i32>} : memref<105x8x128xf32, #tpu.memory_space<vmem>>, vector<1x8x128xf32>,
    %1431 = arith.mulf %1410, %1418 : vector<8x128xf32>
    %c75 = arith.constant 75 : index
    %c0_550 = arith.constant 0 : index
    %c0_551 = arith.constant 0 : index
    %1432 = vector.load %arg2[%c75, %c0_550, %c0_551] : memref<105x8x128xf32, #tpu.memory_space<vmem>>, vector<1x8x128xf32>
    %1433 = vector.shape_cast %1432 : vector<1x8x128xf32> to vector<8x128xf32>
    %1434 = vector.shape_cast %1431 : vector<8x128xf32> to vector<1x8x128xf32>
    tpu.vector_store %arg2[%c75, %c0_550, %c0_551], %1434 {strides = array<i32>} : memref<105x8x128xf32, #tpu.memory_space<vmem>>, vector<1x8x128xf32>,
    %c57_552 = arith.constant 57 : index
    %c0_553 = arith.constant 0 : index
    %c0_554 = arith.constant 0 : index
    %1435 = vector.load %arg1[%c57_552, %c0_553, %c0_554] : memref<63x8x128xf32, #tpu.memory_space<vmem>>, vector<1x8x128xf32>
    %1436 = vector.shape_cast %1435 : vector<1x8x128xf32> to vector<8x128xf32>
    %c58_555 = arith.constant 58 : index
    %c0_556 = arith.constant 0 : index
    %c0_557 = arith.constant 0 : index
    %1437 = vector.load %arg1[%c58_555, %c0_556, %c0_557] : memref<63x8x128xf32, #tpu.memory_space<vmem>>, vector<1x8x128xf32>
    %1438 = vector.shape_cast %1437 : vector<1x8x128xf32> to vector<8x128xf32>
    %c59_558 = arith.constant 59 : index
    %c0_559 = arith.constant 0 : index
    %c0_560 = arith.constant 0 : index
    %1439 = vector.load %arg1[%c59_558, %c0_559, %c0_560] : memref<63x8x128xf32, #tpu.memory_space<vmem>>, vector<1x8x128xf32>
    %1440 = vector.shape_cast %1439 : vector<1x8x128xf32> to vector<8x128xf32>
    %c60_561 = arith.constant 60 : index
    %c0_562 = arith.constant 0 : index
    %c0_563 = arith.constant 0 : index
    %1441 = vector.load %arg1[%c60_561, %c0_562, %c0_563] : memref<63x8x128xf32, #tpu.memory_space<vmem>>, vector<1x8x128xf32>
    %1442 = vector.shape_cast %1441 : vector<1x8x128xf32> to vector<8x128xf32>
    %c61_564 = arith.constant 61 : index
    %c0_565 = arith.constant 0 : index
    %c0_566 = arith.constant 0 : index
    %1443 = vector.load %arg1[%c61_564, %c0_565, %c0_566] : memref<63x8x128xf32, #tpu.memory_space<vmem>>, vector<1x8x128xf32>
    %1444 = vector.shape_cast %1443 : vector<1x8x128xf32> to vector<8x128xf32>
    %c62_567 = arith.constant 62 : index
    %c0_568 = arith.constant 0 : index
    %c0_569 = arith.constant 0 : index
    %1445 = vector.load %arg1[%c62_567, %c0_568, %c0_569] : memref<63x8x128xf32, #tpu.memory_space<vmem>>, vector<1x8x128xf32>
    %1446 = vector.shape_cast %1445 : vector<1x8x128xf32> to vector<8x128xf32>
    %1447 = arith.subf %1442, %1436 : vector<8x128xf32>
    %1448 = arith.subf %1444, %1438 : vector<8x128xf32>
    %1449 = arith.subf %1446, %1440 : vector<8x128xf32>
    %1450 = arith.mulf %1447, %1447 : vector<8x128xf32>
    %1451 = arith.mulf %1448, %1448 : vector<8x128xf32>
    %1452 = arith.addf %1450, %1451 : vector<8x128xf32>
    %1453 = arith.mulf %1449, %1449 : vector<8x128xf32>
    %1454 = arith.addf %1452, %1453 : vector<8x128xf32>
    %1455 = math.rsqrt %1454 : vector<8x128xf32>
    %1456 = arith.mulf %1454, %1455 : vector<8x128xf32>
    %c103 = arith.constant 103 : index
    %c0_570 = arith.constant 0 : index
    %c0_571 = arith.constant 0 : index
    %1457 = vector.load %arg2[%c103, %c0_570, %c0_571] : memref<105x8x128xf32, #tpu.memory_space<vmem>>, vector<1x8x128xf32>
    %1458 = vector.shape_cast %1457 : vector<1x8x128xf32> to vector<8x128xf32>
    %1459 = vector.shape_cast %1456 : vector<8x128xf32> to vector<1x8x128xf32>
    tpu.vector_store %arg2[%c103, %c0_570, %c0_571], %1459 {strides = array<i32>} : memref<105x8x128xf32, #tpu.memory_space<vmem>>, vector<1x8x128xf32>,
    %1460 = arith.mulf %1447, %1455 : vector<8x128xf32>
    %1461 = arith.mulf %1448, %1455 : vector<8x128xf32>
    %1462 = arith.mulf %1449, %1455 : vector<8x128xf32>
    %1463 = arith.mulf %1460, %1460 : vector<8x128xf32>
    %1464 = arith.mulf %1461, %1461 : vector<8x128xf32>
    %1465 = arith.addf %1463, %1464 : vector<8x128xf32>
    %1466 = arith.mulf %1462, %1462 : vector<8x128xf32>
    %1467 = arith.addf %1465, %1466 : vector<8x128xf32>
    %1468 = arith.mulf %1383, %1460 : vector<8x128xf32>
    %1469 = arith.mulf %1384, %1461 : vector<8x128xf32>
    %1470 = arith.addf %1468, %1469 : vector<8x128xf32>
    %1471 = arith.mulf %1385, %1462 : vector<8x128xf32>
    %1472 = arith.addf %1470, %1471 : vector<8x128xf32>
    %cst_572 = arith.constant 0.000000e+00 : f32
    %1473 = vector.broadcast %cst_572 : f32 to vector<8x128xf32>
    %1474 = arith.subf %1473, %1472 : vector<8x128xf32>
    %1475 = arith.mulf %1390, %1467 : vector<8x128xf32>
    %1476 = math.rsqrt %1475 : vector<8x128xf32>
    %1477 = math.rsqrt %1476 : vector<8x128xf32>
    %1478 = arith.addf %1474, %1477 : vector<8x128xf32>
    %1479 = arith.mulf %1461, %1385 : vector<8x128xf32>
    %1480 = arith.mulf %1462, %1384 : vector<8x128xf32>
    %1481 = arith.subf %1479, %1480 : vector<8x128xf32>
    %1482 = arith.mulf %1462, %1383 : vector<8x128xf32>
    %1483 = arith.mulf %1460, %1385 : vector<8x128xf32>
    %1484 = arith.subf %1482, %1483 : vector<8x128xf32>
    %1485 = arith.mulf %1460, %1384 : vector<8x128xf32>
    %1486 = arith.mulf %1461, %1383 : vector<8x128xf32>
    %1487 = arith.subf %1485, %1486 : vector<8x128xf32>
    %1488 = arith.mulf %1478, %1478 : vector<8x128xf32>
    %1489 = arith.mulf %1481, %1481 : vector<8x128xf32>
    %1490 = arith.addf %1488, %1489 : vector<8x128xf32>
    %1491 = arith.mulf %1484, %1484 : vector<8x128xf32>
    %1492 = arith.addf %1490, %1491 : vector<8x128xf32>
    %1493 = arith.mulf %1487, %1487 : vector<8x128xf32>
    %1494 = arith.addf %1492, %1493 : vector<8x128xf32>
    %1495 = math.rsqrt %1494 : vector<8x128xf32>
    %1496 = arith.mulf %1478, %1495 : vector<8x128xf32>
    %c76 = arith.constant 76 : index
    %c0_573 = arith.constant 0 : index
    %c0_574 = arith.constant 0 : index
    %1497 = vector.load %arg2[%c76, %c0_573, %c0_574] : memref<105x8x128xf32, #tpu.memory_space<vmem>>, vector<1x8x128xf32>
    %1498 = vector.shape_cast %1497 : vector<1x8x128xf32> to vector<8x128xf32>
    %1499 = vector.shape_cast %1496 : vector<8x128xf32> to vector<1x8x128xf32>
    tpu.vector_store %arg2[%c76, %c0_573, %c0_574], %1499 {strides = array<i32>} : memref<105x8x128xf32, #tpu.memory_space<vmem>>, vector<1x8x128xf32>,
    %1500 = arith.mulf %1481, %1495 : vector<8x128xf32>
    %c77 = arith.constant 77 : index
    %c0_575 = arith.constant 0 : index
    %c0_576 = arith.constant 0 : index
    %1501 = vector.load %arg2[%c77, %c0_575, %c0_576] : memref<105x8x128xf32, #tpu.memory_space<vmem>>, vector<1x8x128xf32>
    %1502 = vector.shape_cast %1501 : vector<1x8x128xf32> to vector<8x128xf32>
    %1503 = vector.shape_cast %1500 : vector<8x128xf32> to vector<1x8x128xf32>
    tpu.vector_store %arg2[%c77, %c0_575, %c0_576], %1503 {strides = array<i32>} : memref<105x8x128xf32, #tpu.memory_space<vmem>>, vector<1x8x128xf32>,
    %1504 = arith.mulf %1484, %1495 : vector<8x128xf32>
    %c78 = arith.constant 78 : index
    %c0_577 = arith.constant 0 : index
    %c0_578 = arith.constant 0 : index
    %1505 = vector.load %arg2[%c78, %c0_577, %c0_578] : memref<105x8x128xf32, #tpu.memory_space<vmem>>, vector<1x8x128xf32>
    %1506 = vector.shape_cast %1505 : vector<1x8x128xf32> to vector<8x128xf32>
    %1507 = vector.shape_cast %1504 : vector<8x128xf32> to vector<1x8x128xf32>
    tpu.vector_store %arg2[%c78, %c0_577, %c0_578], %1507 {strides = array<i32>} : memref<105x8x128xf32, #tpu.memory_space<vmem>>, vector<1x8x128xf32>,
    %1508 = arith.mulf %1487, %1495 : vector<8x128xf32>
    %c79 = arith.constant 79 : index
    %c0_579 = arith.constant 0 : index
    %c0_580 = arith.constant 0 : index
    %1509 = vector.load %arg2[%c79, %c0_579, %c0_580] : memref<105x8x128xf32, #tpu.memory_space<vmem>>, vector<1x8x128xf32>
    %1510 = vector.shape_cast %1509 : vector<1x8x128xf32> to vector<8x128xf32>
    %1511 = vector.shape_cast %1508 : vector<8x128xf32> to vector<1x8x128xf32>
    tpu.vector_store %arg2[%c79, %c0_579, %c0_580], %1511 {strides = array<i32>} : memref<105x8x128xf32, #tpu.memory_space<vmem>>, vector<1x8x128xf32>,
    %c0_581 = arith.constant 0 : index
    %c0_582 = arith.constant 0 : index
    %c0_583 = arith.constant 0 : index
    %1512 = vector.load %arg1[%c0_581, %c0_582, %c0_583] : memref<63x8x128xf32, #tpu.memory_space<vmem>>, vector<1x8x128xf32>
    %1513 = vector.shape_cast %1512 : vector<1x8x128xf32> to vector<8x128xf32>
    %c1_584 = arith.constant 1 : index
    %c0_585 = arith.constant 0 : index
    %c0_586 = arith.constant 0 : index
    %1514 = vector.load %arg1[%c1_584, %c0_585, %c0_586] : memref<63x8x128xf32, #tpu.memory_space<vmem>>, vector<1x8x128xf32>
    %1515 = vector.shape_cast %1514 : vector<1x8x128xf32> to vector<8x128xf32>
    %c2_587 = arith.constant 2 : index
    %c0_588 = arith.constant 0 : index
    %c0_589 = arith.constant 0 : index
    %1516 = vector.load %arg1[%c2_587, %c0_588, %c0_589] : memref<63x8x128xf32, #tpu.memory_space<vmem>>, vector<1x8x128xf32>
    %1517 = vector.shape_cast %1516 : vector<1x8x128xf32> to vector<8x128xf32>
    %c51_590 = arith.constant 51 : index
    %c0_591 = arith.constant 0 : index
    %c0_592 = arith.constant 0 : index
    %1518 = vector.load %arg1[%c51_590, %c0_591, %c0_592] : memref<63x8x128xf32, #tpu.memory_space<vmem>>, vector<1x8x128xf32>
    %1519 = vector.shape_cast %1518 : vector<1x8x128xf32> to vector<8x128xf32>
    %c52_593 = arith.constant 52 : index
    %c0_594 = arith.constant 0 : index
    %c0_595 = arith.constant 0 : index
    %1520 = vector.load %arg1[%c52_593, %c0_594, %c0_595] : memref<63x8x128xf32, #tpu.memory_space<vmem>>, vector<1x8x128xf32>
    %1521 = vector.shape_cast %1520 : vector<1x8x128xf32> to vector<8x128xf32>
    %c53_596 = arith.constant 53 : index
    %c0_597 = arith.constant 0 : index
    %c0_598 = arith.constant 0 : index
    %1522 = vector.load %arg1[%c53_596, %c0_597, %c0_598] : memref<63x8x128xf32, #tpu.memory_space<vmem>>, vector<1x8x128xf32>
    %1523 = vector.shape_cast %1522 : vector<1x8x128xf32> to vector<8x128xf32>
    %1524 = arith.subf %1519, %1513 : vector<8x128xf32>
    %1525 = arith.subf %1521, %1515 : vector<8x128xf32>
    %1526 = arith.subf %1523, %1517 : vector<8x128xf32>
    %1527 = arith.mulf %1524, %1524 : vector<8x128xf32>
    %1528 = arith.mulf %1525, %1525 : vector<8x128xf32>
    %1529 = arith.addf %1527, %1528 : vector<8x128xf32>
    %1530 = arith.mulf %1526, %1526 : vector<8x128xf32>
    %1531 = arith.addf %1529, %1530 : vector<8x128xf32>
    %1532 = math.rsqrt %1531 : vector<8x128xf32>
    %1533 = arith.mulf %1531, %1532 : vector<8x128xf32>
    %c104 = arith.constant 104 : index
    %c0_599 = arith.constant 0 : index
    %c0_600 = arith.constant 0 : index
    %1534 = vector.load %arg2[%c104, %c0_599, %c0_600] : memref<105x8x128xf32, #tpu.memory_space<vmem>>, vector<1x8x128xf32>
    %1535 = vector.shape_cast %1534 : vector<1x8x128xf32> to vector<8x128xf32>
    %1536 = vector.shape_cast %1533 : vector<8x128xf32> to vector<1x8x128xf32>
    tpu.vector_store %arg2[%c104, %c0_599, %c0_600], %1536 {strides = array<i32>} : memref<105x8x128xf32, #tpu.memory_space<vmem>>, vector<1x8x128xf32>,
    %1537 = arith.mulf %1524, %1532 : vector<8x128xf32>
    %1538 = arith.mulf %1525, %1532 : vector<8x128xf32>
    %1539 = arith.mulf %1526, %1532 : vector<8x128xf32>
    %1540 = arith.mulf %1537, %1537 : vector<8x128xf32>
    %1541 = arith.mulf %1538, %1538 : vector<8x128xf32>
    %1542 = arith.addf %1540, %1541 : vector<8x128xf32>
    %1543 = arith.mulf %1539, %1539 : vector<8x128xf32>
    %1544 = arith.addf %1542, %1543 : vector<8x128xf32>
    %1545 = math.rsqrt %1544 : vector<8x128xf32>
    %1546 = math.rsqrt %1545 : vector<8x128xf32>
    %1547 = arith.addf %1537, %1546 : vector<8x128xf32>
    %cst_601 = arith.constant 0.000000e+00 : f32
    %1548 = vector.broadcast %cst_601 : f32 to vector<8x128xf32>
    %cst_602 = arith.constant 0.000000e+00 : f32
    %1549 = vector.broadcast %cst_602 : f32 to vector<8x128xf32>
    %1550 = arith.subf %1549, %1539 : vector<8x128xf32>
    %1551 = arith.mulf %1547, %1547 : vector<8x128xf32>
    %1552 = arith.mulf %1548, %1548 : vector<8x128xf32>
    %1553 = arith.addf %1551, %1552 : vector<8x128xf32>
    %1554 = arith.mulf %1550, %1550 : vector<8x128xf32>
    %1555 = arith.addf %1553, %1554 : vector<8x128xf32>
    %1556 = arith.mulf %1538, %1538 : vector<8x128xf32>
    %1557 = arith.addf %1555, %1556 : vector<8x128xf32>
    %1558 = math.rsqrt %1557 : vector<8x128xf32>
    %1559 = arith.mulf %1547, %1558 : vector<8x128xf32>
    %c80 = arith.constant 80 : index
    %c0_603 = arith.constant 0 : index
    %c0_604 = arith.constant 0 : index
    %1560 = vector.load %arg2[%c80, %c0_603, %c0_604] : memref<105x8x128xf32, #tpu.memory_space<vmem>>, vector<1x8x128xf32>
    %1561 = vector.shape_cast %1560 : vector<1x8x128xf32> to vector<8x128xf32>
    %1562 = vector.shape_cast %1559 : vector<8x128xf32> to vector<1x8x128xf32>
    tpu.vector_store %arg2[%c80, %c0_603, %c0_604], %1562 {strides = array<i32>} : memref<105x8x128xf32, #tpu.memory_space<vmem>>, vector<1x8x128xf32>,
    %1563 = arith.mulf %1548, %1558 : vector<8x128xf32>
    %c81 = arith.constant 81 : index
    %c0_605 = arith.constant 0 : index
    %c0_606 = arith.constant 0 : index
    %1564 = vector.load %arg2[%c81, %c0_605, %c0_606] : memref<105x8x128xf32, #tpu.memory_space<vmem>>, vector<1x8x128xf32>
    %1565 = vector.shape_cast %1564 : vector<1x8x128xf32> to vector<8x128xf32>
    %1566 = vector.shape_cast %1563 : vector<8x128xf32> to vector<1x8x128xf32>
    tpu.vector_store %arg2[%c81, %c0_605, %c0_606], %1566 {strides = array<i32>} : memref<105x8x128xf32, #tpu.memory_space<vmem>>, vector<1x8x128xf32>,
    %1567 = arith.mulf %1550, %1558 : vector<8x128xf32>
    %c82 = arith.constant 82 : index
    %c0_607 = arith.constant 0 : index
    %c0_608 = arith.constant 0 : index
    %1568 = vector.load %arg2[%c82, %c0_607, %c0_608] : memref<105x8x128xf32, #tpu.memory_space<vmem>>, vector<1x8x128xf32>
    %1569 = vector.shape_cast %1568 : vector<1x8x128xf32> to vector<8x128xf32>
    %1570 = vector.shape_cast %1567 : vector<8x128xf32> to vector<1x8x128xf32>
    tpu.vector_store %arg2[%c82, %c0_607, %c0_608], %1570 {strides = array<i32>} : memref<105x8x128xf32, #tpu.memory_space<vmem>>, vector<1x8x128xf32>,
    %1571 = arith.mulf %1538, %1558 : vector<8x128xf32>
    %c83 = arith.constant 83 : index
    %c0_609 = arith.constant 0 : index
    %c0_610 = arith.constant 0 : index
    %1572 = vector.load %arg2[%c83, %c0_609, %c0_610] : memref<105x8x128xf32, #tpu.memory_space<vmem>>, vector<1x8x128xf32>
    %1573 = vector.shape_cast %1572 : vector<1x8x128xf32> to vector<8x128xf32>
    %1574 = vector.shape_cast %1571 : vector<8x128xf32> to vector<1x8x128xf32>
    tpu.vector_store %arg2[%c83, %c0_609, %c0_610], %1574 {strides = array<i32>} : memref<105x8x128xf32, #tpu.memory_space<vmem>>, vector<1x8x128xf32>,
    return
  }
  func.func @transform_0(%arg0: i32) -> (i32, i32, i32) {
    %c0_i32 = arith.constant 0 : i32
    %c0_i32_0 = arith.constant 0 : i32
    %c0_i32_1 = arith.constant 0 : i32
    return %c0_i32, %arg0, %c0_i32_0 : i32, i32, i32
  }
  func.func @transform_1(%arg0: i32) -> (i32, i32, i32) {
    %c0_i32 = arith.constant 0 : i32
    %c0_i32_0 = arith.constant 0 : i32
    %c0_i32_1 = arith.constant 0 : i32
    return %c0_i32, %arg0, %c0_i32_0 : i32, i32, i32
  }
}

</mosaic_0001>

<bundles_post_ra>
// kernel: quaternion_progress_pallas.1
= control target key start
LH: loop header
LB: loop body
LE: loop exit
PB: predicated region body
PF: predicated region fallthrough
CT: control target
= control target key end

     0   :  { %s3872_s0 = inlined_call_operand.vmem [shape: f32[63,8,128], index: 0, kind: input, shape index: {}]   ;;  %s3873_s1 = inlined_call_operand.vmem [shape: f32[105,8,128], index: 1, kind: output, shape index: {}]  }
   0x1   :  { %v8_v0 = vld [vmem:[%s3872_s0] sm:$0xff]  ;;  %v1387_v1 = vld [vmem:[%s3872_s0 + $0x8] sm:$0xff]  ;;  %v1388_v2 = vld [vmem:[%s3872_s0 + $0x10] sm:$0xff] }
   0x2   :  { %v1389_v3 = vld [vmem:[%s3872_s0 + $0x18] sm:$0xff]  ;;  %v1390_v4 = vld [vmem:[%s3872_s0 + $0x20] sm:$0xff]  ;;  %v1391_v5 = vld [vmem:[%s3872_s0 + $0x28] sm:$0xff] }
   0x3   :  { %v1810_v6 = vsub.f32 %v1389_v3, %v8_v0  ;;  %v1812_v7 = vsub.f32 %v1390_v4, %v1387_v1  ;;  %v1814_v8 = vsub.f32 %v1391_v5, %v1388_v2  ;;  %v1399_v9 = vld [vmem:[%s3872_s0 + $0x30] sm:$0xff]  ;;  %v1400_v10 = vld [vmem:[%s3872_s0 + $0x38] sm:$0xff]  ;;  %v1401_v11 = vld [vmem:[%s3872_s0 + $0x40] sm:$0xff] }
   0x4   :  { %v1825_v12 = vsub.f32 %v1399_v9, %v1389_v3  ;;  %v1827_v13 = vsub.f32 %v1400_v10, %v1390_v4  ;;  %v1829_v14 = vsub.f32 %v1401_v11, %v1391_v5  ;;  %v1410_v15 = vld [vmem:[%s3872_s0 + $0x48] sm:$0xff]  ;;  %v1411_v16 = vld [vmem:[%s3872_s0 + $0x50] sm:$0xff]  ;;  %v1412_v17 = vld [vmem:[%s3872_s0 + $0x58] sm:$0xff] }
   0x5   :  { %v22_v18 = vmul.f32 %v1810_v6, %v1810_v6  ;;  %v23_v19 = vmul.f32 %v1812_v7, %v1812_v7  ;;  %v25_v20 = vmul.f32 %v1814_v8, %v1814_v8  ;;  %v1846_v21 = vsub.f32 %v1410_v15, %v1399_v9  ;;  %v1421_v22 = vld [vmem:[%s3872_s0 + $0x60] sm:$0xff]  ;;  %v1422_v23 = vld [vmem:[%s3872_s0 + $0x68] sm:$0xff]  ;;  %v1423_v24 = vld [vmem:[%s3872_s0 + $0x70] sm:$0xff] }
   0x6   :  { %v72_v25 = vmul.f32 %v1825_v12, %v1825_v12  ;;  %v73_v26 = vmul.f32 %v1827_v13, %v1827_v13  ;;  %v75_v27 = vmul.f32 %v1829_v14, %v1829_v14  ;;  %v1863_v28 = vsub.f32 %v1411_v16, %v1400_v10  ;;  %v1431_v29 = vld [vmem:[%s3872_s0 + $0x78] sm:$0xff]  ;;  %v1883_v38 = vld [vmem:[%s3872_s0 + $0x80] sm:$0xff]  ;;  %v1888_v39 = vld [vmem:[%s3872_s0 + $0x88] sm:$0xff] }
   0x7   :  { %v24_v30 = vadd.f32 %v23_v19, %v22_v18  ;;  %v1868_v31 = vsub.f32 %v1412_v17, %v1401_v11  ;;  %v140_v32 = vmul.f32 %v1846_v21, %v1846_v21  ;;  %v1872_v33 = vsub.f32 %v1421_v22, %v1410_v15  ;;  %v1442_v44 = vld [vmem:[%s3872_s0 + $0x90] sm:$0xff]  ;;  %v1443_v48 = vld [vmem:[%s3872_s0 + $0x98] sm:$0xff]  ;;  %v1444_v54 = vld [vmem:[%s3872_s0 + $0xa0] sm:$0xff] }
   0x8   :  { %v74_v34 = vadd.f32 %v73_v26, %v72_v25  ;;  %v141_v35 = vmul.f32 %v1863_v28, %v1863_v28  ;;  %v1876_v36 = vsub.f32 %v1422_v23, %v1411_v16  ;;  %v1878_v37 = vsub.f32 %v1423_v24, %v1412_v17  ;;  %v1453_v56 = vld [vmem:[%s3872_s0 + $0xa8] sm:$0xff]  ;;  %v1454_v60 = vld [vmem:[%s3872_s0 + $0xb0] sm:$0xff]  ;;  %v1455_v61 = vld [vmem:[%s3872_s0 + $0xb8] sm:$0xff] }
   0x9   :  { %v26_v40 = vadd.f32 %v25_v20, %v24_v30  ;;  %v143_v41 = vmul.f32 %v1868_v31, %v1868_v31  ;;  %v208_v42 = vmul.f32 %v1872_v33, %v1872_v33  ;;  %v1894_v43 = vsub.f32 %v1431_v29, %v8_v0  ;;  %v1464_v62 = vld [vmem:[%s3872_s0 + $0xc0] sm:$0xff]  ;;  %v1465_v11 = vld [vmem:[%s3872_s0 + $0xc8] sm:$0xff]  ;;  %v1466_v16 = vld [vmem:[%s3872_s0 + $0xd0] sm:$0xff] }
   0xa   :  { %v76_v45 = vadd.f32 %v75_v27, %v74_v34  ;;  %v142_v46 = vadd.f32 %v141_v35, %v140_v32  ;;  %v209_v47 = vmul.f32 %v1876_v36, %v1876_v36  ;;  %v211_v49 = vmul.f32 %v1878_v37, %v1878_v37  ;;  %v1967_v17 = vld [vmem:[%s3872_s0 + $0xd8] sm:$0xff] }
   0xb   :  { %1614 = vrsqrt.f32 %v26_v40  ;;  %v1907_v50 = vsub.f32 %v1883_v38, %v1387_v1  ;;  %v1910_v51 = vsub.f32 %v1888_v39, %v1388_v2  ;;  %v276_v53 = vmul.f32 %v1894_v43, %v1894_v43  ;;  %3891 = vst [vmem:[#allocation2_spill] sm:$0xff] %v1967_v17 }
   0xc   :  { %1616 = vrsqrt.f32 %v76_v45  ;;  %v210_v52 = vadd.f32 %v209_v47, %v208_v42  ;;  %v1917_v55 = vsub.f32 %v1442_v44, %v1431_v29  ;;  %v1922_v57 = vadd.f32 %v143_v41, %v142_v46 }
   0xd   :  { %v277_v58 = vmul.f32 %v1907_v50, %v1907_v50  ;;  %v1927_v59 = vsub.f32 %v1443_v48, %v1883_v38  ;;  %v279_v0 = vmul.f32 %v1910_v51, %v1910_v51  ;;  %v1943_v1 = vsub.f32 %v1444_v54, %v1888_v39 }
   0xe   :  { %v1938_v63 = vadd.f32 %v211_v49, %v210_v52  ;;  %v1945_v2 = vsub.f32 %v1453_v56, %v1442_v44  ;;  %v327_v4 = vmul.f32 %v1917_v55, %v1917_v55  ;;  %v1951_v9 = vsub.f32 %v1454_v60, %v1443_v48  ;;  %v2035_v52 = vld [vmem:[%s3872_s0 + $0xe8] sm:$0xff] }
   0xf   :  { %v278_v3 = vadd.f32 %v277_v58, %v276_v53  ;;  %v328_v5 = vmul.f32 %v1927_v59, %v1927_v59  ;;  %1618 = vrsqrt.f32 %v1922_v57  ;;  %v1954_v10 = vsub.f32 %v1455_v61, %v1444_v54 }
  0x10   :  { %v1959_v15 = vsub.f32 %v1464_v62, %v1453_v56  ;;  %1620 = vrsqrt.f32 %v1938_v63  ;;  %v330_v18 = vmul.f32 %v1943_v1, %v1943_v1  ;;  %v395_v19 = vmul.f32 %v1945_v2, %v1945_v2 }
  0x11   :  { %v1974_v20 = vadd.f32 %v279_v0, %v278_v3  ;;  %v329_v22 = vadd.f32 %v328_v5, %v327_v4  ;;  %v396_v23 = vmul.f32 %v1951_v9, %v1951_v9  ;;  %v1978_v24 = vsub.f32 %v1465_v11, %v1454_v60 }
  0x12   :  { %v398_v26 = vmul.f32 %v1954_v10, %v1954_v10  ;;  %v1982_v27 = vsub.f32 %v1466_v16, %v1455_v61  ;;  %v1986_v30 = vmul.f32 %v1959_v15, %v1959_v15  ;;  %v1989_v32 = vsub.f32 %v1967_v17, %v1431_v29 }
  0x13   :  { %v397_v49 = vadd.f32 %v396_v23, %v395_v19  ;;  %1622 = vrsqrt.f32 %v1974_v20  ;;  %v2041_v54 = vmul.f32 %v1978_v24, %v1978_v24  ;;  %v2058_v4 = vsub.f32 %v2035_v52, %v1888_v39 }
  0x14   :  { %3892 = vst [vmem:[#allocation3_spill] sm:$0xff] %v1989_v32  ;;  %v2045_v56 = vmul.f32 %v1982_v27, %v1982_v27  ;;  %v2062_v5 = vmul.f32 %v1989_v32, %v1989_v32 }
  0x15   :  { %v1615_v25 = vpop.eup %1614 }
  0x16   :  { %v1617_v34 = vpop.eup %1616  ;;  %v28_v35 = vmul.f32 %v1615_v25, %v26_v40  ;;  %v1992_v41 = vmul.f32 %v1615_v25, %v1810_v6  ;;  %v1995_v42 = vmul.f32 %v1615_v25, %v1812_v7  ;;  %v33_v44 = vmul.f32 %v1615_v25, %v1814_v8 }
  0x17   :  { %v78_v46 = vmul.f32 %v1617_v34, %v76_v45  ;;  %v1999_v47 = vmul.f32 %v1617_v34, %v1825_v12  ;;  %v2002_v48 = vmul.f32 %v1617_v34, %v1827_v13  ;;  %v2005_v29 = vmul.f32 %v1617_v34, %v1829_v14  ;;  %v2021_v13 = vld [vmem:[%s3872_s0 + $0xe0] sm:$0xff] }
  0x18   :  { %1392 = vst [vmem:[%s3873_s1 + $0x2a0] sm:$0xff] %v28_v35  ;;  %v34_v6 = vmul.f32 %v1992_v41, %v1992_v41  ;;  %v2014_v7 = vmul.f32 %v1995_v42, %v1995_v42  ;;  %v37_v8 = vmul.f32 %v33_v44, %v33_v44  ;;  %v2016_v12 = vadd.f32 %v330_v18, %v329_v22 }
  0x19   :  { %3893 = vst [vmem:[#allocation4_spill] sm:$0xff] %v2021_v13  ;;  %1402 = vst [vmem:[%s3873_s1 + $0x2a8] sm:$0xff] %v78_v46  ;;  %v84_v14 = vmul.f32 %v1999_v47, %v1999_v47  ;;  %v85_v40 = vmul.f32 %v2002_v48, %v2002_v48  ;;  %v87_v45 = vmul.f32 %v2005_v29, %v2005_v29  ;;  %v1619_v58 = vpop.eup %1618  ;;  %v2064_v16 = vsub.f32 0.0, %v33_v44 }
  0x1a   :  { %v36_v53 = vadd.f32 %v2014_v7, %v34_v6  ;;  %v89_v61 = vmul.f32 %v1999_v47, %v1992_v41  ;;  %v90_v62 = vmul.f32 %v2002_v48, %v1995_v42  ;;  %v2053_v0 = vsub.f32 %v2021_v13, %v1883_v38  ;;  %v1621_v11 = vpop.eup %1620 }
  0x1b   :  { %v86_v60 = vadd.f32 %v85_v40, %v84_v14  ;;  %1624 = vrsqrt.f32 %v2016_v12  ;;  %v146_v19 = vmul.f32 %v1619_v58, %v1922_v57  ;;  %v2067_v22 = vadd.f32 %v398_v26, %v397_v49 }
  0x1c   :  { %v38_v3 = vadd.f32 %v37_v8, %v36_v53  ;;  %v99_v38 = vmul.f32 %v2002_v48, %v33_v44  ;;  %v100_v23 = vmul.f32 %v2005_v29, %v1995_v42  ;;  %v2073_v39 = vmul.f32 %v1619_v58, %v1846_v21 }
  0x1d   :  { %v88_v18 = vadd.f32 %v87_v45, %v86_v60  ;;  %v91_v25 = vadd.f32 %v90_v62, %v89_v61  ;;  %v92_v34 = vmul.f32 %v2005_v29, %v33_v44  ;;  %1413 = vst [vmem:[%s3873_s1 + $0x2b0] sm:$0xff] %v146_v19  ;;  %v2080_v57 = vmul.f32 %v1619_v58, %v1863_v28  ;;  %v1623_v61 = vpop.eup %1622 }
  0x1e   :  { %1626 = vrsqrt.f32 %v38_v3  ;;  %v102_v26 = vmul.f32 %v2005_v29, %v1992_v41  ;;  %v103_v46 = vmul.f32 %v1999_v47, %v33_v44  ;;  %v2086_v6 = vmul.f32 %v1619_v58, %v1868_v31 }
  0x1f   :  { %v95_v35 = vmul.f32 %v88_v18, %v38_v3  ;;  %v152_v21 = vmul.f32 %v2073_v39, %v2073_v39  ;;  %v105_v8 = vmul.f32 %v1999_v47, %v1995_v42  ;;  %v153_v14 = vmul.f32 %v2080_v57, %v2080_v57 }
  0x20   :  { %v157_v28 = vmul.f32 %v2073_v39, %v1999_v47  ;;  %v2096_v40 = vsub.f32 %v99_v38, %v100_v23  ;;  %v106_v44 = vmul.f32 %v2002_v48, %v1992_v41  ;;  %v155_v31 = vmul.f32 %v2086_v6, %v2086_v6 }
  0x21   :  { %1628 = vrsqrt.f32 %v95_v35  ;;  %v158_v45 = vmul.f32 %v2080_v57, %v2002_v48  ;;  %v2104_v49 = vadd.f32 %v92_v34, %v91_v25  ;;  %v154_v53 = vadd.f32 %v153_v14, %v152_v21 }
  0x22   :  { %v167_v58 = vmul.f32 %v2080_v57, %v2005_v29  ;;  %v168_v60 = vmul.f32 %v2086_v6, %v2002_v48  ;;  %v2110_v62 = vsub.f32 %v102_v26, %v103_v46  ;;  %v160_v3 = vmul.f32 %v2086_v6, %v2005_v29  ;;  %v2123_v26 = vld [vmem:[%s3872_s0 + $0xf0] sm:$0xff] }
  0x23   :  { %v170_v19 = vmul.f32 %v2086_v6, %v1999_v47  ;;  %v214_v38 = vmul.f32 %v1621_v11, %v1938_v63  ;;  %v156_v23 = vadd.f32 %v155_v31, %v154_v53  ;;  %v159_v25 = vadd.f32 %v158_v45, %v157_v28 }
  0x24   :  { %v171_v34 = vmul.f32 %v2073_v39, %v2005_v29  ;;  %v217_v35 = vmul.f32 %v1621_v11, %v1872_v33  ;;  %v173_v21 = vmul.f32 %v2073_v39, %v2002_v48  ;;  %v174_v14 = vmul.f32 %v2080_v57, %v1999_v47 }
  0x25   :  { %v1625_v46 = vpop.eup %1624  ;;  %1424 = vst [vmem:[%s3873_s1 + $0x2b8] sm:$0xff] %v214_v38  ;;  %v218_v63 = vmul.f32 %v1621_v11, %v1876_v36  ;;  %v219_v33 = vmul.f32 %v1621_v11, %v1878_v37  ;;  %v2134_v29 = vsub.f32 %v105_v8, %v106_v44  ;;  %v163_v28 = vmul.f32 %v156_v23, %v88_v18 }
  0x26   :  { %v2136_v31 = vsub.f32 %v167_v58, %v168_v60  ;;  %v220_v45 = vmul.f32 %v217_v35, %v217_v35  ;;  %v2140_v47 = vadd.f32 %v2041_v54, %v1986_v30  ;;  %v2144_v38 = vsub.f32 %v2123_v26, %v1967_v17 }
  0x27   :  { %v221_v32 = vmul.f32 %v218_v63, %v218_v63  ;;  %v223_v48 = vmul.f32 %v219_v33, %v219_v33  ;;  %v2148_v36 = vmul.f32 %v2064_v16, %v2064_v16  ;;  %v2150_v37 = vadd.f32 %v160_v3, %v159_v25 }
  0x28   :  { %v1627_v53 = vpop.eup %1626  ;;  %3894 = vst [vmem:[#allocation5_spill] sm:$0xff] %v2144_v38  ;;  %v2152_v11 = vsub.f32 %v170_v19, %v171_v34  ;;  %v2156_v18 = vmul.f32 %v2096_v40, %v2096_v40  ;;  %v2158_v30 = vsub.f32 %v173_v21, %v174_v14  ;;  %v94_v44 = vsub.f32 0.0, %v2104_v49 }
  0x29   :  { %1630 = vrsqrt.f32 %v1627_v53  ;;  %v222_v54 = vadd.f32 %v221_v32, %v220_v45  ;;  %v2163_v58 = vmul.f32 %v2110_v62, %v2110_v62  ;;  %v2167_v60 = vmul.f32 %v2134_v29, %v2134_v29 }
  0x2a   :  { %1632 = vrsqrt.f32 %v163_v28  ;;  %v2171_v3 = vmul.f32 %v2136_v31, %v2136_v31  ;;  %v225_v25 = vmul.f32 %v217_v35, %v2073_v39  ;;  %v226_v32 = vmul.f32 %v218_v63, %v2080_v57 }
  0x2b   :  { %v1629_v8 = vpop.eup %1628  ;;  %v224_v19 = vadd.f32 %v223_v48, %v222_v54  ;;  %v2178_v34 = vmul.f32 %v2152_v11, %v2152_v11  ;;  %v282_v21 = vmul.f32 %v1623_v61, %v1974_v20  ;;  %v2182_v14 = vmul.f32 %v1623_v61, %v1894_v43 }
  0x2c   :  { %1634 = vrsqrt.f32 %v1629_v8  ;;  %v2186_v28 = vmul.f32 %v2158_v30, %v2158_v30  ;;  %v228_v45 = vmul.f32 %v219_v33, %v2086_v6  ;;  %v2190_v48 = vmul.f32 %v1623_v61, %v1907_v50 }
  0x2d   :  { %v231_v53 = vmul.f32 %v224_v19, %v156_v23  ;;  %v235_v54 = vmul.f32 %v218_v63, %v2086_v6  ;;  %v236_v8 = vmul.f32 %v219_v33, %v2080_v57  ;;  %1434 = vst [vmem:[%s3873_s1 + $0x2c0] sm:$0xff] %v282_v21  ;;  %v2198_v43 = vmul.f32 %v1623_v61, %v1910_v51 }
  0x2e   :  { %3895 = vst [vmem:[#allocation6_spill] sm:$0xff] %v2190_v48  ;;  %v288_v20 = vmul.f32 %v2182_v14, %v2182_v14  ;;  %v227_v49 = vadd.f32 %v226_v32, %v225_v25  ;;  %v2204_v50 = vmul.f32 %v2190_v48, %v2190_v48  ;;  %v333_v23 = vmul.f32 %v1625_v46, %v2016_v12 }
  0x2f   :  { %3896 = vst [vmem:[#allocation7_spill] sm:$0xff] %v2198_v43  ;;  %1636 = vrsqrt.f32 %v231_v53  ;;  %v238_v19 = vmul.f32 %v219_v33, %v2073_v39  ;;  %v291_v17 = vmul.f32 %v2198_v43, %v2198_v43  ;;  %v2211_v21 = vmul.f32 %v1625_v46, %v1917_v55 }
  0x30   :  { %v2214_v51 = vmul.f32 %v1625_v46, %v1927_v59  ;;  %v239_v61 = vmul.f32 %v217_v35, %v2086_v6  ;;  %v290_v25 = vadd.f32 %v2204_v50, %v288_v20  ;;  %1445 = vst [vmem:[%s3873_s1 + $0x2c8] sm:$0xff] %v333_v23  ;;  %v2222_v12 = vmul.f32 %v1625_v46, %v1943_v1 }
  0x31   :  { %1638 = vrsqrt.f32 %v2067_v22  ;;  %v241_v55 = vmul.f32 %v217_v35, %v2080_v57  ;;  %v242_v32 = vmul.f32 %v218_v63, %v2073_v39  ;;  %v339_v59 = vmul.f32 %v2211_v21, %v2211_v21 }
  0x32   :  { %v340_v6 = vmul.f32 %v2214_v51, %v2214_v51  ;;  %v2234_v23 = vsub.f32 %v235_v54, %v236_v8  ;;  %v2236_v1 = vadd.f32 %v291_v17, %v290_v25  ;;  %v342_v46 = vmul.f32 %v2222_v12, %v2222_v12 }
  0x33   :  { %v1631_v33 = vpop.eup %1630  ;;  %v344_v39 = vmul.f32 %v2211_v21, %v2182_v14  ;;  %v345_v35 = vmul.f32 %v2214_v51, %v2190_v48  ;;  %v2251_v17 = vadd.f32 %v2045_v56, %v2140_v47  ;;  %v2255_v8 = vsub.f32 %v238_v19, %v239_v61 }
  0x34   :  { %v1633_v53 = vpop.eup %1632  ;;  %v2232_v20 = vadd.f32 %v1631_v33, %v1992_v41  ;;  %3897 = vst [vmem:[#allocation8_spill] sm:$0xff] %v2236_v1  ;;  %v341_v57 = vadd.f32 %v340_v6, %v339_v59  ;;  %v2246_v33 = vadd.f32 %v228_v45, %v227_v49  ;;  %v2257_v25 = vsub.f32 %v241_v55, %v242_v32 }
  0x35   :  { %1640 = vrsqrt.f32 %v1633_v53  ;;  %v2264_v49 = vmul.f32 %v2234_v23, %v2234_v23  ;;  %v347_v45 = vmul.f32 %v2222_v12, %v2198_v43  ;;  %v354_v56 = vmul.f32 %v2214_v51, %v2198_v43 }
  0x36   :  { %v1635_v63 = vpop.eup %1634  ;;  %v43_v41 = vmul.f32 %v2232_v20, %v2232_v20  ;;  %1642 = vrsqrt.f32 %v2236_v1  ;;  %v2259_v59 = vadd.f32 %v342_v46, %v341_v57  ;;  %v357_v32 = vmul.f32 %v2222_v12, %v2182_v14 }
  0x37   :  { %v2253_v54 = vadd.f32 %v1635_v63, %v94_v44  ;;  %v346_v44 = vadd.f32 %v345_v35, %v344_v39  ;;  %v358_v53 = vmul.f32 %v2211_v21, %v2198_v43  ;;  %1644 = vrsqrt.f32 %v2251_v17 }
  0x38   :  { %v46_v6 = vadd.f32 %v2148_v36, %v43_v41  ;;  %v350_v19 = vmul.f32 %v2259_v59, %v2236_v1  ;;  %v355_v36 = vmul.f32 %v2222_v12, %v2190_v48  ;;  %v360_v57 = vmul.f32 %v2211_v21, %v2190_v48 }
  0x39   :  { %v108_v47 = vmul.f32 %v2253_v54, %v2253_v54  ;;  %v1637_v61 = vpop.eup %1636  ;;  %v361_v39 = vmul.f32 %v2214_v51, %v2182_v14  ;;  %v2290_v63 = vmul.f32 %v2255_v8, %v2255_v8  ;;  %v2293_v41 = vsub.f32 0.0, %v2198_v43 }
  0x3a   :  { %v47_v55 = vadd.f32 %v46_v6, %v2014_v7  ;;  %1646 = vrsqrt.f32 %v1637_v61  ;;  %v230_v7 = vsub.f32 0.0, %v2246_v33  ;;  %v2296_v6 = vadd.f32 %v347_v45, %v346_v44 }
  0x3b   :  { %v110_v46 = vadd.f32 %v2156_v18, %v108_v47  ;;  %v1639_v35 = vpop.eup %1638  ;;  %3898 = vst [vmem:[#allocation9_spill] sm:$0xff] %v2293_v41  ;;  %v2299_v61 = vsub.f32 %v354_v56, %v355_v36  ;;  %v2318_v56 = vsub.f32 %v360_v57, %v361_v39  ;;  %v2372_v39 = vmul.f32 %v2144_v38, %v2144_v38 }
  0x3c   :  { %1648 = vrsqrt.f32 %v47_v55  ;;  %v401_v47 = vmul.f32 %v1639_v35, %v2067_v22  ;;  %v2302_v55 = vmul.f32 %v1639_v35, %v1945_v2  ;;  %v2305_v33 = vmul.f32 %v1639_v35, %v1951_v9 }
  0x3d   :  { %v112_v18 = vadd.f32 %v2163_v58, %v110_v46  ;;  %1650 = vrsqrt.f32 %v350_v19  ;;  %3899 = vst [vmem:[#allocation10_spill] sm:$0xff] %v2299_v61  ;;  %v2308_v1 = vmul.f32 %v1639_v35, %v1954_v10  ;;  %v2313_v58 = vld [vmem:[%s3872_s0 + $0xf8] sm:$0xff]  ;;  %v2316_v22 = vsub.f32 %v357_v32, %v358_v53  ;;  %3901 = vst [vmem:[#allocation12_spill] sm:$0xff] %v2318_v56 }
  0x3e   :  { %1456 = vst [vmem:[%s3873_s1 + $0x2d0] sm:$0xff] %v401_v47  ;;  %v532_v2 = vmul.f32 %v2053_v0, %v2053_v0  ;;  %v3902_v10 = vsub.f32 0.0, %v2150_v37  ;;  %v407_v36 = vmul.f32 %v2302_v55, %v2302_v55  ;;  %v2337_v53 = vmul.f32 %v2257_v25, %v2257_v25 }
  0x3f   :  { %v1641_v45 = vpop.eup %1640  ;;  %v114_v44 = vadd.f32 %v2167_v60, %v112_v18  ;;  %3900 = vst [vmem:[#allocation11_spill] sm:$0xff] %v2316_v22  ;;  %v408_v60 = vmul.f32 %v2305_v33, %v2305_v33  ;;  %v410_v32 = vmul.f32 %v2308_v1, %v2308_v1  ;;  %v2341_v46 = vmul.f32 %v2293_v41, %v2293_v41 }
  0x40   :  { %v1643_v9 = vpop.eup %1642  ;;  %v2327_v19 = vadd.f32 %v1641_v45, %v3902_v10  ;;  %v2345_v37 = vsub.f32 %v2313_v58, %v2021_v13  ;;  %v2352_v18 = vmul.f32 %v2299_v61, %v2299_v61  ;;  %v2356_v47 = vmul.f32 %v2316_v22, %v2316_v22 }
  0x41   :  { %1652 = vrsqrt.f32 %v114_v44  ;;  %v409_v35 = vadd.f32 %v408_v60, %v407_v36  ;;  %v2360_v45 = vmul.f32 %v2318_v56, %v2318_v56  ;;  %v2364_v44 = vmul.f32 %v2058_v4, %v2058_v4 }
  0x42   :  { %v176_v57 = vmul.f32 %v2327_v19, %v2327_v19  ;;  %1654 = vrsqrt.f32 %v1643_v9  ;;  %v1645_v9 = vpop.eup %1644  ;;  %v533_v60 = vadd.f32 %v532_v2, %v2062_v5  ;;  %v412_v56 = vmul.f32 %v2302_v55, %v2211_v21 }
  0x43   :  { %v2367_v36 = vadd.f32 %v410_v32, %v409_v35  ;;  %v413_v22 = vmul.f32 %v2305_v33, %v2214_v51  ;;  %v469_v61 = vmul.f32 %v1645_v9, %v2251_v17  ;;  %v415_v2 = vmul.f32 %v2308_v1, %v2222_v12 }
  0x44   :  { %v178_v10 = vadd.f32 %v2171_v3, %v176_v57  ;;  %v1647_v13 = vpop.eup %1646  ;;  %v600_v3 = vmul.f32 %v2345_v37, %v2345_v37 }
  0x45   :  { %v2382_v5 = vadd.f32 %v1647_v13, %v230_v7  ;;  %v418_v35 = vmul.f32 %v2367_v36, %v2259_v59  ;;  %1467 = vst [vmem:[%s3873_s1 + $0x2d8] sm:$0xff] %v469_v61  ;;  %v422_v59 = vmul.f32 %v2305_v33, %v2222_v12  ;;  %v426_v7 = vmul.f32 %v2302_v55, %v2222_v12 }
  0x46   :  { %v1649_v32 = vpop.eup %1648  ;;  %v180_v57 = vadd.f32 %v2178_v34, %v178_v10  ;;  %v429_v61 = vmul.f32 %v2305_v33, %v2211_v21 }
  0x47   :  { %v1651_v38 = vpop.eup %1650  ;;  %v49_v43 = vmul.f32 %v1649_v32, %v2232_v20  ;;  %v51_v48 = vmul.f32 0.0, %v1649_v32  ;;  %v54_v17 = vmul.f32 %v1649_v32, %v2064_v16  ;;  %v57_v41 = vmul.f32 %v1649_v32, %v1995_v42 }
  0x48   :  { %v182_v13 = vadd.f32 %v2186_v28, %v180_v57  ;;  %v244_v34 = vmul.f32 %v2382_v5, %v2382_v5  ;;  %1656 = vrsqrt.f32 %v1651_v38  ;;  %v414_v42 = vadd.f32 %v413_v22, %v412_v56 }
  0x49   :  { %50 = vst [vmem:[%s3873_s1] sm:$0xff] %v49_v43  ;;  %1393 = vst [vmem:[%s3873_s1 + $0x8] sm:$0xff] %v51_v48  ;;  %1658 = vrsqrt.f32 %v418_v35  ;;  %v423_v16 = vmul.f32 %v2308_v1, %v2214_v51  ;;  %v425_v38 = vmul.f32 %v2308_v1, %v2211_v21  ;;  %v472_v48 = vmul.f32 %v1645_v9, %v1959_v15 }
  0x4a   :  { %1394 = vst [vmem:[%s3873_s1 + $0x10] sm:$0xff] %v54_v17  ;;  %1395 = vst [vmem:[%s3873_s1 + $0x18] sm:$0xff] %v57_v41  ;;  %1660 = vrsqrt.f32 %v182_v13  ;;  %v246_v28 = vadd.f32 %v2264_v49, %v244_v34  ;;  %v2418_v43 = vmul.f32 %v1645_v9, %v1978_v24  ;;  %v428_v41 = vmul.f32 %v2302_v55, %v2214_v51  ;;  %v2430_v49 = vld [vmem:[%s3872_s0 + $0x100] sm:$0xff] }
  0x4b   :  { %v1653_v20 = vpop.eup %1652  ;;  %v474_v22 = vmul.f32 %v1645_v9, %v1982_v27  ;;  %v475_v27 = vmul.f32 %v472_v48, %v472_v48  ;;  %v2465_v35 = vadd.f32 %v2364_v44, %v533_v60  ;;  %v2467_v17 = vadd.f32 %v415_v2, %v414_v42 }
  0x4c   :  { %v1655_v15 = vpop.eup %1654  ;;  %v116_v24 = vmul.f32 %v1653_v20, %v2253_v54  ;;  %v119_v56 = vmul.f32 %v1653_v20, %v2096_v40  ;;  %v122_v12 = vmul.f32 %v1653_v20, %v2110_v62  ;;  %v125_v10 = vmul.f32 %v1653_v20, %v2134_v29 }
  0x4d   :  { %v248_v51 = vadd.f32 %v2290_v63, %v246_v28  ;;  %v2438_v21 = vadd.f32 %v1655_v15, %v2182_v14  ;;  %v476_v9 = vmul.f32 %v2418_v43, %v2418_v43  ;;  %v478_v40 = vmul.f32 %v474_v22, %v474_v22 }
  0x4e   :  { %1403 = vst [vmem:[%s3873_s1 + $0x20] sm:$0xff] %v116_v24  ;;  %1404 = vst [vmem:[%s3873_s1 + $0x28] sm:$0xff] %v119_v56  ;;  %v480_v62 = vmul.f32 %v472_v48, %v2302_v55  ;;  %v481_v29 = vmul.f32 %v2418_v43, %v2305_v33  ;;  %v2459_v54 = vsub.f32 %v2430_v49, %v2035_v52  ;;  %v3903_v42 = vsub.f32 0.0, %v2296_v6 }
  0x4f   :  { %1405 = vst [vmem:[%s3873_s1 + $0x30] sm:$0xff] %v122_v12  ;;  %1406 = vst [vmem:[%s3873_s1 + $0x38] sm:$0xff] %v125_v10  ;;  %v250_v63 = vadd.f32 %v2337_v53, %v248_v51  ;;  %v297_v32 = vmul.f32 %v2438_v21, %v2438_v21  ;;  %v477_v57 = vadd.f32 %v476_v9, %v475_v27 }
  0x50   :  { %v2469_v13 = vsub.f32 %v422_v59, %v423_v16  ;;  %v2471_v34 = vsub.f32 %v425_v38, %v426_v7  ;;  %v2473_v28 = vsub.f32 %v428_v41, %v429_v61  ;;  %v601_v53 = vadd.f32 %v600_v3, %v2372_v39 }
  0x51   :  { %1662 = vrsqrt.f32 %v250_v63  ;;  %v300_v20 = vadd.f32 %v2341_v46, %v297_v32  ;;  %v479_v15 = vadd.f32 %v478_v40, %v477_v57  ;;  %v482_v56 = vadd.f32 %v481_v29, %v480_v62  ;;  %v1510_v57 = vld [vmem:[%s3872_s0 + $0x130] sm:$0xff] }
  0x52   :  { %v1657_v24 = vpop.eup %1656  ;;  %v483_v12 = vmul.f32 %v474_v22, %v2308_v1  ;;  %v490_v44 = vmul.f32 %v2418_v43, %v2308_v1  ;;  %v602_v60 = vmul.f32 %v2459_v54, %v2459_v54  ;;  %1664 = vrsqrt.f32 %v2465_v35 }
  0x53   :  { %v1659_v2 = vpop.eup %1658  ;;  %v301_v59 = vadd.f32 %v300_v20, %v2204_v50  ;;  %v2485_v16 = vadd.f32 %v1657_v24, %v3903_v42  ;;  %v486_v46 = vmul.f32 %v479_v15, %v2367_v36  ;;  %v491_v3 = vmul.f32 %v474_v22, %v2305_v33  ;;  %v1497_v50 = vld [vmem:[%s3872_s0 + $0x108] sm:$0xff] }
  0x54   :  { %v1661_v39 = vpop.eup %1660  ;;  %1666 = vrsqrt.f32 %v1659_v2  ;;  %v493_v38 = vmul.f32 %v474_v22, %v2302_v55  ;;  %v494_v7 = vmul.f32 %v472_v48, %v2308_v1  ;;  %v2501_v51 = vadd.f32 %v483_v12, %v482_v56  ;;  %v1498_v22 = vld [vmem:[%s3872_s0 + $0x110] sm:$0xff] }
  0x55   :  { %v184_v6 = vmul.f32 %v1661_v39, %v2327_v19  ;;  %v187_v41 = vmul.f32 %v1661_v39, %v2136_v31  ;;  %v190_v36 = vmul.f32 %v1661_v39, %v2152_v11  ;;  %v193_v61 = vmul.f32 %v1661_v39, %v2158_v30  ;;  %v1499_v31 = vld [vmem:[%s3872_s0 + $0x118] sm:$0xff] }
  0x56   :  { %1668 = vrsqrt.f32 %v301_v59  ;;  %v363_v10 = vmul.f32 %v2485_v16, %v2485_v16  ;;  %v496_v1 = vmul.f32 %v472_v48, %v2305_v33  ;;  %v497_v11 = vmul.f32 %v2418_v43, %v2302_v55  ;;  %v1508_v55 = vld [vmem:[%s3872_s0 + $0x120] sm:$0xff] }
  0x57   :  { %1414 = vst [vmem:[%s3873_s1 + $0x40] sm:$0xff] %v184_v6  ;;  %1415 = vst [vmem:[%s3873_s1 + $0x48] sm:$0xff] %v187_v41  ;;  %1670 = vrsqrt.f32 %v486_v46  ;;  %v2524_v30 = vadd.f32 %v602_v60, %v601_v53  ;;  %v2527_v33 = vsub.f32 %v1497_v50, %v2123_v26  ;;  %v417_v48 = vsub.f32 0.0, %v2467_v17  ;;  %v1509_v26 = vld [vmem:[%s3872_s0 + $0x128] sm:$0xff] }
  0x58   :  { %1416 = vst [vmem:[%s3873_s1 + $0x50] sm:$0xff] %v190_v36  ;;  %1417 = vst [vmem:[%s3873_s1 + $0x58] sm:$0xff] %v193_v61  ;;  %v365_v19 = vadd.f32 %v2352_v18, %v363_v10  ;;  %v2533_v27 = vmul.f32 %v2469_v13, %v2469_v13  ;;  %v2537_v9 = vmul.f32 %v2471_v34, %v2471_v34  ;;  %v485_v63 = vsub.f32 0.0, %v2501_v51  ;;  %v3905_v36 = vld [vmem:[#allocation9_spill] sm:$0xff]  ;;  %v3906_v10 = vld [vmem:[#allocation6_spill] sm:$0xff] }
  0x59   :  { %v2547_v18 = vmul.f32 %v2473_v28, %v2473_v28  ;;  %v2549_v43 = vsub.f32 %v490_v44, %v491_v3  ;;  %v2552_v40 = vsub.f32 %v1498_v22, %v2313_v58  ;;  %v2555_v62 = vsub.f32 %v1499_v31, %v2430_v49 }
  0x5a   :  { %v367_v29 = vadd.f32 %v2356_v47, %v365_v19  ;;  %v2559_v32 = vsub.f32 %v493_v38, %v494_v7  ;;  %1672 = vrsqrt.f32 %v2524_v30  ;;  %v2565_v20 = vsub.f32 %v496_v1, %v497_v11 }
  0x5b   :  { %v1663_v17 = vpop.eup %1662  ;;  %v2569_v58 = vmul.f32 %v2527_v33, %v2527_v33  ;;  %v2571_v49 = vsub.f32 %v1508_v55, %v1497_v50  ;;  %v2573_v47 = vsub.f32 %v1509_v26, %v1498_v22  ;;  %v668_v60 = vmul.f32 %v2552_v40, %v2552_v40 }
  0x5c   :  { %v252_v15 = vmul.f32 %v1663_v17, %v2382_v5  ;;  %v255_v53 = vmul.f32 %v1663_v17, %v2234_v23  ;;  %v258_v24 = vmul.f32 %v1663_v17, %v2255_v8  ;;  %v261_v56 = vmul.f32 %v1663_v17, %v2257_v25  ;;  %v1665_v12 = vpop.eup %1664  ;;  %v3904_v8 = vld [vmem:[#allocation3_spill] sm:$0xff] }
  0x5d   :  { %v369_v44 = vadd.f32 %v2360_v45, %v367_v29  ;;  %v2584_v2 = vmul.f32 %v2555_v62, %v2555_v62  ;;  %v2586_v59 = vsub.f32 %v1510_v57, %v1499_v31  ;;  %v537_v23 = vmul.f32 %v1665_v12, %v2465_v35 }
  0x5e   :  { %v1667_v42 = vpop.eup %1666  ;;  %1425 = vst [vmem:[%s3873_s1 + $0x60] sm:$0xff] %v252_v15  ;;  %1426 = vst [vmem:[%s3873_s1 + $0x68] sm:$0xff] %v255_v53  ;;  %v2602_v25 = vmul.f32 %v1665_v12, %v3904_v8  ;;  %v2605_v45 = vmul.f32 %v1665_v12, %v2053_v0  ;;  %v2608_v5 = vmul.f32 %v1665_v12, %v2058_v4 }
  0x5f   :  { %1427 = vst [vmem:[%s3873_s1 + $0x70] sm:$0xff] %v258_v24  ;;  %1428 = vst [vmem:[%s3873_s1 + $0x78] sm:$0xff] %v261_v56  ;;  %1674 = vrsqrt.f32 %v369_v44  ;;  %v2610_v46 = vadd.f32 %v1667_v42, %v417_v48  ;;  %v735_v39 = vmul.f32 %v2571_v49, %v2571_v49  ;;  %v736_v3 = vmul.f32 %v2573_v47, %v2573_v47 }
  0x60   :  { %v1669_v38 = vpop.eup %1668  ;;  %1478 = vst [vmem:[%s3873_s1 + $0x2e0] sm:$0xff] %v537_v23  ;;  %v543_v0 = vmul.f32 %v2602_v25, %v2602_v25  ;;  %v544_v4 = vmul.f32 %v2605_v45, %v2605_v45  ;;  %v546_v35 = vmul.f32 %v2608_v5, %v2608_v5  ;;  %v548_v7 = vmul.f32 %v2602_v25, %v2182_v14 }
  0x61   :  { %v1671_v50 = vpop.eup %1670  ;;  %v303_v6 = vmul.f32 %v1669_v38, %v2438_v21  ;;  %v306_v41 = vmul.f32 0.0, %v1669_v38  ;;  %v309_v61 = vmul.f32 %v1669_v38, %v3905_v36  ;;  %v312_v1 = vmul.f32 %v1669_v38, %v3906_v10  ;;  %v3907_v21 = vld [vmem:[#allocation7_spill] sm:$0xff] }
  0x62   :  { %v431_v22 = vmul.f32 %v2610_v46, %v2610_v46  ;;  %1676 = vrsqrt.f32 %v1671_v50  ;;  %v545_v31 = vadd.f32 %v544_v4, %v543_v0  ;;  %v549_v11 = vmul.f32 %v2605_v45, %v3906_v10  ;;  %v2676_v0 = vld [vmem:[%s3872_s0 + $0x138] sm:$0xff] }
  0x63   :  { %1435 = vst [vmem:[%s3873_s1 + $0x80] sm:$0xff] %v303_v6  ;;  %1436 = vst [vmem:[%s3873_s1 + $0x88] sm:$0xff] %v306_v41  ;;  %v551_v19 = vmul.f32 %v2608_v5, %v3907_v21  ;;  %v558_v48 = vmul.f32 %v2605_v45, %v3907_v21  ;;  %v559_v55 = vmul.f32 %v2608_v5, %v3906_v10 }
  0x64   :  { %1437 = vst [vmem:[%s3873_s1 + $0x90] sm:$0xff] %v309_v61  ;;  %1438 = vst [vmem:[%s3873_s1 + $0x98] sm:$0xff] %v312_v1  ;;  %v561_v26 = vmul.f32 %v2608_v5, %v2182_v14  ;;  %v1673_v29 = vpop.eup %1672  ;;  %v433_v57 = vadd.f32 %v2533_v27, %v431_v22  ;;  %v2655_v17 = vadd.f32 %v546_v35, %v545_v31  ;;  %v3908_v27 = vld [vmem:[#allocation8_spill] sm:$0xff] }
  0x65   :  { %v550_v15 = vadd.f32 %v549_v11, %v548_v7  ;;  %v562_v53 = vmul.f32 %v2602_v25, %v3907_v21  ;;  %v2659_v24 = vsub.f32 %v558_v48, %v559_v55  ;;  %v564_v56 = vmul.f32 %v2602_v25, %v3906_v10  ;;  %v3913_v10 = vld [vmem:[#allocation11_spill] sm:$0xff]  ;;  %v3914_v22 = vld [vmem:[#allocation12_spill] sm:$0xff] }
  0x66   :  { %v565_v12 = vmul.f32 %v2605_v45, %v2182_v14  ;;  %v605_v44 = vmul.f32 %v1673_v29, %v2524_v30  ;;  %v435_v42 = vadd.f32 %v2537_v9, %v433_v57  ;;  %v554_v8 = vmul.f32 %v2655_v17, %v3908_v27  ;;  %v3909_v14 = vld [vmem:[#allocation5_spill] sm:$0xff]  ;;  %v2721_v48 = vld [vmem:[%s3872_s0 + $0x148] sm:$0xff] }
  0x67   :  { %v2667_v23 = vadd.f32 %v551_v19, %v550_v15  ;;  %v2671_v38 = vsub.f32 %v561_v26, %v562_v53  ;;  %v2684_v30 = vmul.f32 %v1673_v29, %v3909_v14  ;;  %v2687_v9 = vmul.f32 %v1673_v29, %v2345_v37  ;;  %3915 = vst [vmem:[#allocation9_spill] sm:$0xff] %v2721_v48 }
  0x68   :  { %v2678_v4 = vsub.f32 %v564_v56, %v565_v12  ;;  %1489 = vst [vmem:[%s3873_s1 + $0x2e8] sm:$0xff] %v605_v44  ;;  %v669_v35 = vadd.f32 %v668_v60, %v2569_v58  ;;  %v437_v7 = vadd.f32 %v2547_v18, %v435_v42  ;;  %1678 = vrsqrt.f32 %v554_v8  ;;  %v2703_v58 = vld [vmem:[%s3872_s0 + $0x140] sm:$0xff] }
  0x69   :  { %v737_v50 = vadd.f32 %v736_v3, %v735_v39  ;;  %v738_v6 = vmul.f32 %v2586_v59, %v2586_v59  ;;  %v1675_v41 = vpop.eup %1674  ;;  %v2694_v36 = vmul.f32 %v1673_v29, %v2459_v54  ;;  %v611_v61 = vmul.f32 %v2684_v30, %v2684_v30  ;;  %3910 = vst [vmem:[#allocation3_spill] sm:$0xff] %v2703_v58  ;;  %v3911_v18 = vld [vmem:[#allocation2_spill] sm:$0xff]  ;;  %v3916_v29 = vld [vmem:[#allocation4_spill] sm:$0xff] }
  0x6a   :  { %v612_v37 = vmul.f32 %v2687_v9, %v2687_v9  ;;  %v2707_v60 = vsub.f32 %v2676_v0, %v3911_v18  ;;  %v371_v39 = vmul.f32 %v1675_v41, %v2485_v16  ;;  %v3912_v3 = vld [vmem:[#allocation10_spill] sm:$0xff]  ;;  %v377_v1 = vmul.f32 %v1675_v41, %v3913_v10 }
  0x6b   :  { %v374_v54 = vmul.f32 %v1675_v41, %v3912_v3  ;;  %v380_v31 = vmul.f32 %v1675_v41, %v3914_v22  ;;  %1680 = vrsqrt.f32 %v437_v7  ;;  %v614_v21 = vmul.f32 %v2694_v36, %v2694_v36  ;;  %v1531_v22 = vld [vmem:[%s3872_s0 + $0x158] sm:$0xff] }
  0x6c   :  { %v613_v11 = vadd.f32 %v612_v37, %v611_v61  ;;  %v2716_v19 = vadd.f32 %v2584_v2, %v669_v35  ;;  %v1677_v16 = vpop.eup %1676  ;;  %1446 = vst [vmem:[%s3873_s1 + $0xa0] sm:$0xff] %v371_v39  ;;  %1448 = vst [vmem:[%s3873_s1 + $0xb0] sm:$0xff] %v377_v1  ;;  %v500_v2 = vmul.f32 %v2549_v43, %v2549_v43  ;;  %v1530_v1 = vld [vmem:[%s3872_s0 + $0x150] sm:$0xff] }
  0x6d   :  { %1447 = vst [vmem:[%s3873_s1 + $0xa8] sm:$0xff] %v374_v54  ;;  %1449 = vst [vmem:[%s3873_s1 + $0xb8] sm:$0xff] %v380_v31  ;;  %v502_v55 = vmul.f32 %v2559_v32, %v2559_v32  ;;  %v2739_v26 = vadd.f32 %v738_v6, %v737_v50  ;;  %v2743_v57 = vsub.f32 %v2703_v58, %v3916_v29 }
  0x6e   :  { %v2747_v15 = vadd.f32 %v1677_v16, %v485_v63  ;;  %v2749_v53 = vadd.f32 %v614_v21, %v613_v11  ;;  %v616_v56 = vmul.f32 %v2684_v30, %v2602_v25  ;;  %v617_v12 = vmul.f32 %v2687_v9, %v2605_v45 }
  0x6f   :  { %v504_v44 = vmul.f32 %v2565_v20, %v2565_v20  ;;  %v619_v42 = vmul.f32 %v2694_v36, %v2608_v5  ;;  %v2761_v27 = vsub.f32 %v2721_v48, %v2035_v52  ;;  %v803_v51 = vmul.f32 %v2707_v60, %v2707_v60 }
  0x70   :  { %v499_v63 = vmul.f32 %v2747_v15, %v2747_v15  ;;  %v622_v8 = vmul.f32 %v2749_v53, %v2655_v17  ;;  %v626_v14 = vmul.f32 %v2687_v9, %v2608_v5  ;;  %1682 = vrsqrt.f32 %v2716_v19 }
  0x71   :  { %v627_v35 = vmul.f32 %v2694_v36, %v2605_v45  ;;  %v629_v52 = vmul.f32 %v2694_v36, %v2602_v25  ;;  %v630_v7 = vmul.f32 %v2684_v30, %v2608_v5  ;;  %1684 = vrsqrt.f32 %v2739_v26 }
  0x72   :  { %v501_v50 = vadd.f32 %v500_v2, %v499_v63  ;;  %v618_v6 = vadd.f32 %v617_v12, %v616_v56  ;;  %1686 = vrsqrt.f32 %v622_v8  ;;  %v804_v41 = vmul.f32 %v2743_v57, %v2743_v57  ;;  %v1679_v61 = vpop.eup %1678  ;;  %v1532_v63 = vld [vmem:[%s3872_s0 + $0x160] sm:$0xff] }
  0x73   :  { %1688 = vrsqrt.f32 %v1679_v61  ;;  %v2783_v18 = vmul.f32 %v2659_v24, %v2659_v24  ;;  %v2785_v39 = vsub.f32 %v626_v14, %v627_v35  ;;  %v2787_v3 = vsub.f32 %v629_v52, %v630_v7 }
  0x74   :  { %v503_v37 = vadd.f32 %v502_v55, %v501_v50  ;;  %v632_v54 = vmul.f32 %v2684_v30, %v2605_v45  ;;  %v633_v10 = vmul.f32 %v2687_v9, %v2602_v25  ;;  %v2799_v21 = vadd.f32 %v619_v42, %v618_v6 }
  0x75   :  { %v1681_v31 = vpop.eup %1680  ;;  %v805_v16 = vadd.f32 %v804_v41, %v803_v51  ;;  %v806_v2 = vmul.f32 %v2761_v27, %v2761_v27  ;;  %v2812_v42 = vsub.f32 %v1530_v1, %v2676_v0  ;;  %v2815_v51 = vsub.f32 %v1531_v22, %v2703_v58 }
  0x76   :  { %v505_v11 = vadd.f32 %v504_v44, %v503_v37  ;;  %v439_v55 = vmul.f32 %v1681_v31, %v2610_v46  ;;  %v442_v29 = vmul.f32 %v1681_v31, %v2469_v13  ;;  %v445_v56 = vmul.f32 %v1681_v31, %v2471_v34  ;;  %v1541_v37 = vld [vmem:[%s3872_s0 + $0x168] sm:$0xff] }
  0x77   :  { %v448_v12 = vmul.f32 %v1681_v31, %v2473_v28  ;;  %v553_v44 = vsub.f32 0.0, %v2667_v23  ;;  %v2831_v13 = vmul.f32 %v2671_v38, %v2671_v38  ;;  %v2835_v34 = vmul.f32 %v2678_v4, %v2678_v4 }
  0x78   :  { %1690 = vrsqrt.f32 %v505_v11  ;;  %1457 = vst [vmem:[%s3873_s1 + $0xc0] sm:$0xff] %v439_v55  ;;  %1458 = vst [vmem:[%s3873_s1 + $0xc8] sm:$0xff] %v442_v29  ;;  %v2837_v28 = vsub.f32 %v632_v54, %v633_v10  ;;  %v2841_v46 = vmul.f32 %v2785_v39, %v2785_v39  ;;  %v2846_v14 = vmul.f32 %v2787_v3, %v2787_v3  ;;  %v1543_v11 = vld [vmem:[%s3872_s0 + $0x178] sm:$0xff] }
  0x79   :  { %1459 = vst [vmem:[%s3873_s1 + $0xd0] sm:$0xff] %v445_v56  ;;  %1460 = vst [vmem:[%s3873_s1 + $0xd8] sm:$0xff] %v448_v12  ;;  %v2848_v35 = vadd.f32 %v806_v2, %v805_v16  ;;  %v2851_v52 = vsub.f32 %v1532_v63, %v2721_v48  ;;  %v2899_v56 = vsub.f32 %v1541_v37, %v1530_v1 }
  0x7a   :  { %v1683_v23 = vpop.eup %1682 }
  0x7b   :  { %v1685_v7 = vpop.eup %1684  ;;  %v673_v50 = vmul.f32 %v1683_v23, %v2716_v19  ;;  %v2855_v6 = vmul.f32 %v1683_v23, %v2527_v33  ;;  %v2858_v41 = vmul.f32 %v1683_v23, %v2552_v40  ;;  %v2861_v61 = vmul.f32 %v1683_v23, %v2555_v62  ;;  %3917 = vst [vmem:[#allocation6_spill] sm:$0xff] %v2899_v56 }
  0x7c   :  { %v1687_v54 = vpop.eup %1686  ;;  %v741_v10 = vmul.f32 %v1685_v7, %v2739_v26  ;;  %v2868_v31 = vmul.f32 %v1685_v7, %v2571_v49  ;;  %v871_v33 = vmul.f32 %v2812_v42, %v2812_v42  ;;  %v872_v40 = vmul.f32 %v2815_v51, %v2815_v51  ;;  %v1542_v26 = vld [vmem:[%s3872_s0 + $0x170] sm:$0xff] }
  0x7d   :  { %1692 = vrsqrt.f32 %v1687_v54  ;;  %1500 = vst [vmem:[%s3873_s1 + $0x2f0] sm:$0xff] %v673_v50  ;;  %v679_v62 = vmul.f32 %v2855_v6, %v2855_v6  ;;  %v680_v19 = vmul.f32 %v2858_v41, %v2858_v41  ;;  %v682_v49 = vmul.f32 %v2861_v61, %v2861_v61  ;;  %v1689_v16 = vpop.eup %1688 }
  0x7e   :  { %v684_v2 = vmul.f32 %v2855_v6, %v2684_v30  ;;  %v685_v55 = vmul.f32 %v2858_v41, %v2687_v9  ;;  %1511 = vst [vmem:[%s3873_s1 + $0x2f8] sm:$0xff] %v741_v10  ;;  %v2897_v29 = vmul.f32 %v1685_v7, %v2573_v47  ;;  %v2901_v12 = vadd.f32 %v1689_v16, %v553_v44 }
  0x7f   :  { %v2905_v23 = vmul.f32 %v2837_v28, %v2837_v28  ;;  %v681_v50 = vadd.f32 %v680_v19, %v679_v62  ;;  %1694 = vrsqrt.f32 %v2848_v35  ;;  %v873_v54 = vadd.f32 %v872_v40, %v871_v33  ;;  %v1552_v40 = vld [vmem:[%s3872_s0 + $0x180] sm:$0xff] }
  0x80   :  { %v874_v8 = vmul.f32 %v2851_v52, %v2851_v52  ;;  %v2910_v48 = vsub.f32 %v1542_v26, %v1531_v22  ;;  %v2912_v10 = vsub.f32 %v1543_v11, %v1532_v63  ;;  %v567_v47 = vmul.f32 %v2901_v12, %v2901_v12 }
  0x81   :  { %v683_v1 = vadd.f32 %v682_v49, %v681_v50  ;;  %v746_v44 = vmul.f32 %v1685_v7, %v2586_v59  ;;  %v747_v16 = vmul.f32 %v2868_v31, %v2868_v31  ;;  %v686_v19 = vadd.f32 %v685_v55, %v684_v2 }
  0x82   :  { %3918 = vst [vmem:[#allocation7_spill] sm:$0xff] %v2912_v10  ;;  %v1691_v62 = vpop.eup %1690  ;;  %v687_v33 = vmul.f32 %v2861_v61, %v2694_v36  ;;  %v748_v22 = vmul.f32 %v2897_v29, %v2897_v29  ;;  %v2925_v63 = vmul.f32 %v2899_v56, %v2899_v56  ;;  %v569_v55 = vadd.f32 %v2783_v18, %v567_v47 }
  0x83   :  { %v507_v59 = vmul.f32 %v1691_v62, %v2747_v15  ;;  %v510_v7 = vmul.f32 %v1691_v62, %v2549_v43  ;;  %v513_v49 = vmul.f32 %v1691_v62, %v2559_v32  ;;  %v516_v2 = vmul.f32 %v1691_v62, %v2565_v20  ;;  %v1553_v43 = vld [vmem:[%s3872_s0 + $0x188] sm:$0xff]  ;;  %v1554_v32 = vld [vmem:[%s3872_s0 + $0x190] sm:$0xff] }
  0x84   :  { %v690_v50 = vmul.f32 %v683_v1, %v2749_v53  ;;  %v2938_v56 = vmul.f32 %v2910_v48, %v2910_v48  ;;  %v2942_v58 = vmul.f32 %v2912_v10, %v2912_v10  ;;  %v749_v20 = vadd.f32 %v748_v22, %v747_v16 }
  0x85   :  { %1468 = vst [vmem:[%s3873_s1 + $0xe0] sm:$0xff] %v507_v59  ;;  %1469 = vst [vmem:[%s3873_s1 + $0xe8] sm:$0xff] %v510_v7  ;;  %v750_v15 = vmul.f32 %v746_v44, %v746_v44  ;;  %v2962_v53 = vadd.f32 %v874_v8, %v873_v54  ;;  %v2964_v18 = vsub.f32 %v1552_v40, %v1541_v37  ;;  %v3919_v37 = vsub.f32 0.0, %v2799_v21 }
  0x86   :  { %1470 = vst [vmem:[%s3873_s1 + $0xf0] sm:$0xff] %v513_v49  ;;  %1471 = vst [vmem:[%s3873_s1 + $0xf8] sm:$0xff] %v516_v2  ;;  %v571_v47 = vadd.f32 %v2831_v13, %v569_v55  ;;  %1696 = vrsqrt.f32 %v690_v50  ;;  %v694_v62 = vmul.f32 %v2858_v41, %v2694_v36  ;;  %v695_v59 = vmul.f32 %v2861_v61, %v2687_v9 }
  0x87   :  { %v1693_v7 = vpop.eup %1692  ;;  %v2971_v49 = vadd.f32 %v687_v33, %v686_v19  ;;  %v751_v10 = vadd.f32 %v750_v15, %v749_v20  ;;  %v2973_v2 = vsub.f32 %v1553_v43, %v1542_v26  ;;  %v2975_v16 = vsub.f32 %v1554_v32, %v1543_v11 }
  0x88   :  { %v573_v8 = vadd.f32 %v2835_v34, %v571_v47  ;;  %v2980_v13 = vadd.f32 %v1693_v7, %v3919_v37  ;;  %v2984_v54 = vmul.f32 %v2861_v61, %v2684_v30  ;;  %v2988_v22 = vmul.f32 %v2855_v6, %v2694_v36 }
  0x89   :  { %v1695_v19 = vpop.eup %1694  ;;  %v2992_v26 = vmul.f32 %v2855_v6, %v2687_v9  ;;  %v752_v34 = vmul.f32 %v2868_v31, %v2855_v6  ;;  %v753_v21 = vmul.f32 %v2897_v29, %v2858_v41  ;;  %v758_v11 = vmul.f32 %v751_v10, %v683_v1 }
  0x8a   :  { %1698 = vrsqrt.f32 %v573_v8  ;;  %v635_v33 = vmul.f32 %v2980_v13, %v2980_v13  ;;  %v3000_v40 = vsub.f32 %v694_v62, %v695_v59  ;;  %v3004_v36 = vmul.f32 %v2858_v41, %v2684_v30 }
  0x8b   :  { %v689_v9 = vsub.f32 0.0, %v2971_v49  ;;  %v755_v55 = vmul.f32 %v746_v44, %v2861_v61  ;;  %1700 = vrsqrt.f32 %v758_v11  ;;  %v809_v50 = vmul.f32 %v1695_v19, %v2848_v35 }
  0x8c   :  { %v637_v43 = vadd.f32 %v2841_v46, %v635_v33  ;;  %v3012_v10 = vmul.f32 %v2897_v29, %v2861_v61  ;;  %v3015_v1 = vmul.f32 %v746_v44, %v2858_v41  ;;  %v3018_v32 = vmul.f32 %v1695_v19, %v2707_v60 }
  0x8d   :  { %v754_v30 = vadd.f32 %v753_v21, %v752_v34  ;;  %1522 = vst [vmem:[%s3873_s1 + $0x300] sm:$0xff] %v809_v50  ;;  %v3024_v20 = vmul.f32 %v1695_v19, %v2743_v57  ;;  %v3027_v46 = vmul.f32 %v1695_v19, %v2761_v27  ;;  %1702 = vrsqrt.f32 %v2962_v53 }
  0x8e   :  { %v639_v35 = vadd.f32 %v2846_v14, %v637_v43  ;;  %v765_v15 = vmul.f32 %v746_v44, %v2855_v6  ;;  %v815_v60 = vmul.f32 %v3018_v32, %v3018_v32  ;;  %v820_v47 = vmul.f32 %v3018_v32, %v2602_v25 }
  0x8f   :  { %v816_v62 = vmul.f32 %v3024_v20, %v3024_v20  ;;  %v818_v57 = vmul.f32 %v3027_v46, %v3027_v46  ;;  %v821_v27 = vmul.f32 %v3024_v20, %v2605_v45  ;;  %v823_v14 = vmul.f32 %v3027_v46, %v2608_v5 }
  0x90   :  { %v1697_v59 = vpop.eup %1696  ;;  %v641_v44 = vadd.f32 %v2905_v23, %v639_v35  ;;  %v830_v7 = vmul.f32 %v3024_v20, %v2608_v5  ;;  %v831_v8 = vmul.f32 %v3027_v46, %v2605_v45  ;;  %v833_v37 = vmul.f32 %v3027_v46, %v2602_v25 }
  0x91   :  { %1704 = vrsqrt.f32 %v1697_v59  ;;  %v817_v19 = vadd.f32 %v816_v62, %v815_v60  ;;  %v822_v34 = vadd.f32 %v821_v27, %v820_v47  ;;  %v834_v21 = vmul.f32 %v3018_v32, %v2608_v5 }
  0x92   :  { %1706 = vrsqrt.f32 %v641_v44  ;;  %v3053_v11 = vsub.f32 %v830_v7, %v831_v8  ;;  %v836_v23 = vmul.f32 %v3018_v32, %v2605_v45  ;;  %v837_v33 = vmul.f32 %v3024_v20, %v2602_v25 }
  0x93   :  { %v3059_v50 = vadd.f32 %v818_v57, %v817_v19  ;;  %v3061_v43 = vadd.f32 %v823_v14, %v822_v34  ;;  %v3063_v35 = vsub.f32 %v833_v37, %v834_v21  ;;  %v941_v60 = vadd.f32 %v2938_v56, %v2925_v63 }
  0x94   :  { %v1699_v47 = vpop.eup %1698  ;;  %v766_v5 = vmul.f32 %v2868_v31, %v2861_v61  ;;  %v3069_v62 = vsub.f32 %v836_v23, %v837_v33  ;;  %v1007_v45 = vmul.f32 %v2964_v18, %v2964_v18  ;;  %v1008_v25 = vmul.f32 %v2973_v2, %v2973_v2  ;;  %v3164_v33 = vld [vmem:[%s3872_s0 + $0x1a0] sm:$0xff] }
  0x95   :  { %v1701_v57 = vpop.eup %1700  ;;  %v575_v27 = vmul.f32 %v1699_v47, %v2901_v12  ;;  %v578_v14 = vmul.f32 %v1699_v47, %v2659_v24  ;;  %v581_v59 = vmul.f32 %v1699_v47, %v2671_v38  ;;  %v584_v56 = vmul.f32 %v1699_v47, %v2678_v4 }
  0x96   :  { %v756_v63 = vadd.f32 %v755_v55, %v754_v30  ;;  %1708 = vrsqrt.f32 %v1701_v57  ;;  %v768_v61 = vmul.f32 %v2868_v31, %v2858_v41  ;;  %v826_v44 = vmul.f32 %v3059_v50, %v2655_v17 }
  0x97   :  { %v1703_v7 = vpop.eup %1702  ;;  %1479 = vst [vmem:[%s3873_s1 + $0x100] sm:$0xff] %v575_v27  ;;  %1480 = vst [vmem:[%s3873_s1 + $0x108] sm:$0xff] %v578_v14  ;;  %v769_v17 = vmul.f32 %v2897_v29, %v2855_v6  ;;  %v3098_v24 = vadd.f32 %v2942_v58, %v941_v60  ;;  %v1009_v38 = vadd.f32 %v1008_v25, %v1007_v45  ;;  %v3920_v14 = vld [vmem:[#allocation3_spill] sm:$0xff] }
  0x98   :  { %1481 = vst [vmem:[%s3873_s1 + $0x110] sm:$0xff] %v581_v59  ;;  %1482 = vst [vmem:[%s3873_s1 + $0x118] sm:$0xff] %v584_v56  ;;  %v1010_v4 = vmul.f32 %v2975_v16, %v2975_v16  ;;  %1710 = vrsqrt.f32 %v826_v44  ;;  %v877_v41 = vmul.f32 %v1703_v7, %v2962_v53  ;;  %v3104_v31 = vmul.f32 %v1703_v7, %v2812_v42 }
  0x99   :  { %v3107_v12 = vmul.f32 %v1703_v7, %v2815_v51  ;;  %v3111_v55 = vsub.f32 %v2984_v54, %v2988_v22  ;;  %v3114_v58 = vmul.f32 %v1703_v7, %v2851_v52  ;;  %1712 = vrsqrt.f32 %v3098_v24 }
  0x9a   :  { %v3119_v6 = vsub.f32 %v2992_v26, %v3004_v36  ;;  %v704_v42 = vmul.f32 %v3000_v40, %v3000_v40  ;;  %1533 = vst [vmem:[%s3873_s1 + $0x308] sm:$0xff] %v877_v41  ;;  %v883_v51 = vmul.f32 %v3104_v31, %v3104_v31  ;;  %v3132_v53 = vsub.f32 %v3012_v10, %v3015_v1  ;;  %v3143_v36 = vld [vmem:[%s3872_s0 + $0x198] sm:$0xff] }
  0x9b   :  { %v884_v52 = vmul.f32 %v3107_v12, %v3107_v12  ;;  %v1705_v29 = vpop.eup %1704  ;;  %v3134_v54 = vsub.f32 %v765_v15, %v766_v5  ;;  %v886_v22 = vmul.f32 %v3114_v58, %v3114_v58  ;;  %v3138_v26 = vadd.f32 %v1010_v4, %v1009_v38 }
  0x9c   :  { %v1707_v30 = vpop.eup %1706  ;;  %v3147_v8 = vadd.f32 %v1705_v29, %v689_v9  ;;  %v757_v37 = vsub.f32 0.0, %v756_v63  ;;  %v3149_v10 = vsub.f32 %v768_v61, %v769_v17  ;;  %v706_v49 = vmul.f32 %v3111_v55, %v3111_v55 }
  0x9d   :  { %v885_v1 = vadd.f32 %v884_v52, %v883_v51  ;;  %v643_v15 = vmul.f32 %v1707_v30, %v2980_v13  ;;  %v646_v19 = vmul.f32 %v1707_v30, %v2785_v39  ;;  %v649_v34 = vmul.f32 %v1707_v30, %v2787_v3  ;;  %v3921_v51 = vld [vmem:[#allocation6_spill] sm:$0xff] }
  0x9e   :  { %v652_v21 = vmul.f32 %v1707_v30, %v2837_v28  ;;  %v703_v23 = vmul.f32 %v3147_v8, %v3147_v8  ;;  %v3168_v39 = vsub.f32 %v3143_v36, %v2676_v0  ;;  %v708_v0 = vmul.f32 %v3119_v6, %v3119_v6 }
  0x9f   :  { %v3159_v9 = vadd.f32 %v886_v22, %v885_v1  ;;  %1490 = vst [vmem:[%s3873_s1 + $0x120] sm:$0xff] %v643_v15  ;;  %1491 = vst [vmem:[%s3873_s1 + $0x128] sm:$0xff] %v646_v19  ;;  %v888_v3 = vmul.f32 %v3104_v31, %v3018_v32  ;;  %v889_v28 = vmul.f32 %v3107_v12, %v3024_v20  ;;  %1714 = vrsqrt.f32 %v3138_v26  ;;  %v3922_v1 = vld [vmem:[#allocation7_spill] sm:$0xff] }
  0xa0   :  { %1492 = vst [vmem:[%s3873_s1 + $0x130] sm:$0xff] %v649_v34  ;;  %1493 = vst [vmem:[%s3873_s1 + $0x138] sm:$0xff] %v652_v21  ;;  %v1709_v13 = vpop.eup %1708  ;;  %v705_v60 = vadd.f32 %v704_v42, %v703_v23  ;;  %v772_v47 = vmul.f32 %v3132_v53, %v3132_v53  ;;  %v774_v5 = vmul.f32 %v3134_v54, %v3134_v54  ;;  %v825_v23 = vsub.f32 0.0, %v3061_v43 }
  0xa1   :  { %v894_v45 = vmul.f32 %v3159_v9, %v3059_v50  ;;  %v3195_v25 = vadd.f32 %v1709_v13, %v757_v37  ;;  %v776_v57 = vmul.f32 %v3149_v10, %v3149_v10  ;;  %v891_v27 = vmul.f32 %v3114_v58, %v3027_v46 }
  0xa2   :  { %v3203_v59 = vsub.f32 %v3164_v33, %v3920_v14  ;;  %v1711_v56 = vpop.eup %1710  ;;  %v707_v63 = vadd.f32 %v706_v49, %v705_v60  ;;  %v898_v61 = vmul.f32 %v3107_v12, %v3027_v46  ;;  %v899_v44 = vmul.f32 %v3114_v58, %v3024_v20 }
  0xa3   :  { %1716 = vrsqrt.f32 %v894_v45  ;;  %v1713_v7 = vpop.eup %1712  ;;  %v771_v17 = vmul.f32 %v3195_v25, %v3195_v25  ;;  %v890_v38 = vadd.f32 %v889_v28, %v888_v3  ;;  %v901_v4 = vmul.f32 %v3114_v58, %v3018_v32  ;;  %v3923_v28 = vld [vmem:[#allocation9_spill] sm:$0xff] }
  0xa4   :  { %1718 = vrsqrt.f32 %v1711_v56  ;;  %v709_v41 = vadd.f32 %v708_v0, %v707_v63  ;;  %v945_v42 = vmul.f32 %v1713_v7, %v3098_v24  ;;  %v3215_v52 = vmul.f32 %v1713_v7, %v3921_v51  ;;  %v3230_v24 = vld [vmem:[%s3872_s0 + $0x1a8] sm:$0xff] }
  0xa5   :  { %v3218_v29 = vmul.f32 %v1713_v7, %v2910_v48  ;;  %v773_v22 = vadd.f32 %v772_v47, %v771_v17  ;;  %v902_v30 = vmul.f32 %v3104_v31, %v3027_v46  ;;  %v904_v37 = vmul.f32 %v3104_v31, %v3024_v20 }
  0xa6   :  { %v3225_v15 = vmul.f32 %v1713_v7, %v3922_v1  ;;  %1720 = vrsqrt.f32 %v709_v41  ;;  %v905_v48 = vmul.f32 %v3107_v12, %v3018_v32  ;;  %1544 = vst [vmem:[%s3873_s1 + $0x310] sm:$0xff] %v945_v42  ;;  %v951_v19 = vmul.f32 %v3215_v52, %v3215_v52 }
  0xa7   :  { %v952_v34 = vmul.f32 %v3218_v29, %v3218_v29  ;;  %v775_v21 = vadd.f32 %v774_v5, %v773_v22  ;;  %v840_v49 = vmul.f32 %v3053_v11, %v3053_v11  ;;  %v3248_v13 = vsub.f32 %v3230_v24, %v3923_v28 }
  0xa8   :  { %v954_v0 = vmul.f32 %v3225_v15, %v3225_v15  ;;  %v1075_v60 = vmul.f32 %v3168_v39, %v3168_v39  ;;  %v1076_v47 = vmul.f32 %v3203_v59, %v3203_v59  ;;  %v842_v43 = vmul.f32 %v3063_v35, %v3063_v35 }
  0xa9   :  { %v953_v3 = vadd.f32 %v952_v34, %v951_v19  ;;  %v1715_v5 = vpop.eup %1714  ;;  %v777_v45 = vadd.f32 %v776_v57, %v775_v21  ;;  %v3256_v14 = vadd.f32 %v891_v27, %v890_v38  ;;  %v3258_v56 = vsub.f32 %v898_v61, %v899_v44 }
  0xaa   :  { %v3260_v63 = vsub.f32 %v901_v4, %v902_v30  ;;  %v3262_v7 = vsub.f32 %v904_v37, %v905_v48  ;;  %v1013_v41 = vmul.f32 %v1715_v5, %v3138_v26  ;;  %v956_v42 = vmul.f32 %v3215_v52, %v3104_v31 }
  0xab   :  { %v3264_v17 = vadd.f32 %v954_v0, %v953_v3  ;;  %1722 = vrsqrt.f32 %v777_v45  ;;  %v957_v57 = vmul.f32 %v3218_v29, %v3107_v12  ;;  %v3272_v27 = vmul.f32 %v1715_v5, %v2964_v18 }
  0xac   :  { %1555 = vst [vmem:[%s3873_s1 + $0x318] sm:$0xff] %v1013_v41  ;;  %v3280_v26 = vmul.f32 %v1715_v5, %v2973_v2  ;;  %v1077_v38 = vadd.f32 %v1076_v47, %v1075_v60  ;;  %v1078_v4 = vmul.f32 %v3248_v13, %v3248_v13  ;;  %v959_v18 = vmul.f32 %v3225_v15, %v3114_v58 }
  0xad   :  { %v1717_v61 = vpop.eup %1716  ;;  %v962_v44 = vmul.f32 %v3264_v17, %v3159_v9  ;;  %v966_v22 = vmul.f32 %v3218_v29, %v3114_v58  ;;  %v3289_v9 = vmul.f32 %v1715_v5, %v2975_v16  ;;  %v967_v2 = vmul.f32 %v3225_v15, %v3107_v12 }
  0xae   :  { %v1719_v51 = vpop.eup %1718  ;;  %1724 = vrsqrt.f32 %v1717_v61  ;;  %v1019_v37 = vmul.f32 %v3272_v27, %v3272_v27  ;;  %v958_v1 = vadd.f32 %v957_v57, %v956_v42  ;;  %v969_v48 = vmul.f32 %v3225_v15, %v3104_v31 }
  0xaf   :  { %v3291_v30 = vadd.f32 %v1719_v51, %v825_v23  ;;  %1726 = vrsqrt.f32 %v962_v44  ;;  %v970_v19 = vmul.f32 %v3215_v52, %v3114_v58  ;;  %v1020_v16 = vmul.f32 %v3280_v26, %v3280_v26 }
  0xb0   :  { %v1721_v34 = vpop.eup %1720  ;;  %v972_v23 = vmul.f32 %v3215_v52, %v3107_v12  ;;  %v973_v0 = vmul.f32 %v3218_v29, %v3104_v31  ;;  %v1022_v3 = vmul.f32 %v3289_v9, %v3289_v9  ;;  %v844_v45 = vmul.f32 %v3069_v62, %v3069_v62  ;;  %v1574_v31 = vld [vmem:[%s3872_s0 + $0x1b0] sm:$0xff] }
  0xb1   :  { %v839_v21 = vmul.f32 %v3291_v30, %v3291_v30  ;;  %v711_v28 = vmul.f32 %v1721_v34, %v3147_v8  ;;  %v714_v58 = vmul.f32 %v1721_v34, %v3000_v40  ;;  %v717_v60 = vmul.f32 %v1721_v34, %v3111_v55 }
  0xb2   :  { %v720_v47 = vmul.f32 %v1721_v34, %v3119_v6  ;;  %v1021_v41 = vadd.f32 %v1020_v16, %v1019_v37  ;;  %v893_v40 = vsub.f32 0.0, %v3256_v14  ;;  %v908_v12 = vmul.f32 %v3258_v56, %v3258_v56  ;;  %v1575_v37 = vld [vmem:[%s3872_s0 + $0x1b8] sm:$0xff] }
  0xb3   :  { %v841_v5 = vadd.f32 %v840_v49, %v839_v21  ;;  %1501 = vst [vmem:[%s3873_s1 + $0x140] sm:$0xff] %v711_v28  ;;  %1502 = vst [vmem:[%s3873_s1 + $0x148] sm:$0xff] %v714_v58  ;;  %v910_v55 = vmul.f32 %v3260_v63, %v3260_v63  ;;  %v3339_v6 = vmul.f32 %v3262_v7, %v3262_v7 }
  0xb4   :  { %1503 = vst [vmem:[%s3873_s1 + $0x150] sm:$0xff] %v717_v60  ;;  %1504 = vst [vmem:[%s3873_s1 + $0x158] sm:$0xff] %v720_v47  ;;  %v3341_v49 = vadd.f32 %v959_v18, %v958_v1  ;;  %v3343_v42 = vsub.f32 %v966_v22, %v967_v2  ;;  %v1023_v57 = vadd.f32 %v1022_v3, %v1021_v41 }
  0xb5   :  { %v843_v8 = vadd.f32 %v842_v43, %v841_v5  ;;  %v1723_v61 = vpop.eup %1722  ;;  %v3345_v44 = vsub.f32 %v969_v48, %v970_v19  ;;  %v3347_v14 = vsub.f32 %v972_v23, %v973_v0  ;;  %v3349_v51 = vadd.f32 %v1078_v4, %v1077_v38  ;;  %v1576_v38 = vld [vmem:[%s3872_s0 + $0x1c0] sm:$0xff]  ;;  %v1585_v4 = vld [vmem:[%s3872_s0 + $0x1c8] sm:$0xff]  ;;  %v1587_v23 = vld [vmem:[%s3872_s0 + $0x1d8] sm:$0xff] }
  0xb6   :  { %v3355_v16 = vsub.f32 %v1574_v31, %v3143_v36  ;;  %v779_v43 = vmul.f32 %v1723_v61, %v3195_v25  ;;  %v782_v18 = vmul.f32 %v1723_v61, %v3132_v53  ;;  %v785_v22 = vmul.f32 %v1723_v61, %v3134_v54  ;;  %v1596_v5 = vld [vmem:[%s3872_s0 + $0x1e0] sm:$0xff] }
  0xb7   :  { %v788_v2 = vmul.f32 %v1723_v61, %v3149_v10  ;;  %v845_v48 = vadd.f32 %v844_v45, %v843_v8  ;;  %v1024_v19 = vmul.f32 %v3272_v27, %v3215_v52  ;;  %v1025_v53 = vmul.f32 %v3280_v26, %v3218_v29  ;;  %v1586_v10 = vld [vmem:[%s3872_s0 + $0x1d0] sm:$0xff] }
  0xb8   :  { %v1725_v1 = vpop.eup %1724  ;;  %v1030_v54 = vmul.f32 %v1023_v57, %v3264_v17  ;;  %1512 = vst [vmem:[%s3873_s1 + $0x160] sm:$0xff] %v779_v43  ;;  %1513 = vst [vmem:[%s3873_s1 + $0x168] sm:$0xff] %v782_v18  ;;  %v1034_v34 = vmul.f32 %v3280_v26, %v3225_v15  ;;  %1728 = vrsqrt.f32 %v3349_v51  ;;  %v3393_v21 = vsub.f32 %v1575_v37, %v3164_v33 }
  0xb9   :  { %v1727_v25 = vpop.eup %1726  ;;  %1514 = vst [vmem:[%s3873_s1 + $0x170] sm:$0xff] %v785_v22  ;;  %1515 = vst [vmem:[%s3873_s1 + $0x178] sm:$0xff] %v788_v2  ;;  %v3387_v17 = vadd.f32 %v1725_v1, %v893_v40  ;;  %1730 = vrsqrt.f32 %v845_v48  ;;  %v3399_v0 = vsub.f32 %v1576_v38, %v3230_v24  ;;  %v1143_v3 = vmul.f32 %v3355_v16, %v3355_v16  ;;  %v1597_v40 = vld [vmem:[%s3872_s0 + $0x1e8] sm:$0xff]  ;;  %v1598_v48 = vld [vmem:[%s3872_s0 + $0x1f0] sm:$0xff] }
  0xba   :  { %v3403_v28 = vsub.f32 %v1585_v4, %v1574_v31  ;;  %1732 = vrsqrt.f32 %v1727_v25  ;;  %v1144_v60 = vmul.f32 %v3393_v21, %v3393_v21  ;;  %v3409_v47 = vsub.f32 %v1586_v10, %v1575_v37 }
  0xbb   :  { %v907_v58 = vmul.f32 %v3387_v17, %v3387_v17  ;;  %1734 = vrsqrt.f32 %v1030_v54  ;;  %v1146_v45 = vmul.f32 %v3399_v0, %v3399_v0  ;;  %v3416_v41 = vsub.f32 %v1587_v23, %v1576_v38 }
  0xbc   :  { %v1211_v31 = vmul.f32 %v3403_v28, %v3403_v28  ;;  %v1035_v57 = vmul.f32 %v3289_v9, %v3218_v29  ;;  %v1145_v61 = vadd.f32 %v1144_v60, %v1143_v3  ;;  %v1212_v37 = vmul.f32 %v3409_v47, %v3409_v47 }
  0xbd   :  { %v909_v8 = vadd.f32 %v908_v12, %v907_v58  ;;  %v1026_v43 = vadd.f32 %v1025_v53, %v1024_v19  ;;  %v1027_v18 = vmul.f32 %v3289_v9, %v3225_v15  ;;  %v1214_v22 = vmul.f32 %v3416_v41, %v3416_v41 }
  0xbe   :  { %v3431_v2 = vsub.f32 %v1596_v5, %v1585_v4  ;;  %v3433_v1 = vadd.f32 %v1146_v45, %v1145_v61  ;;  %v1213_v12 = vadd.f32 %v1212_v37, %v1211_v31  ;;  %v3438_v54 = vsub.f32 %v1597_v40, %v1586_v10 }
  0xbf   :  { %v911_v38 = vadd.f32 %v910_v55, %v909_v8  ;;  %v961_v19 = vsub.f32 0.0, %v3341_v49  ;;  %v976_v53 = vmul.f32 %v3343_v42, %v3343_v42  ;;  %v978_v25 = vmul.f32 %v3345_v44, %v3345_v44 }
  0xc0   :  { %v3447_v55 = vmul.f32 %v3347_v14, %v3347_v14  ;;  %v3450_v3 = vsub.f32 %v1034_v34, %v1035_v57  ;;  %v3454_v10 = vmul.f32 %v3289_v9, %v3215_v52  ;;  %1736 = vrsqrt.f32 %v3433_v1 }
  0xc1   :  { %v913_v4 = vadd.f32 %v3339_v6, %v911_v38  ;;  %v3457_v49 = vadd.f32 %v1027_v18, %v1026_v43  ;;  %v3461_v58 = vmul.f32 %v3272_v27, %v3225_v15  ;;  %v3465_v60 = vmul.f32 %v3272_v27, %v3218_v29 }
  0xc2   :  { %v3467_v5 = vsub.f32 %v1598_v48, %v1587_v23  ;;  %v1729_v6 = vpop.eup %1728  ;;  %v3469_v34 = vadd.f32 %v1214_v22, %v1213_v12  ;;  %v1279_v9 = vmul.f32 %v3431_v2, %v3431_v2  ;;  %v1280_v45 = vmul.f32 %v3438_v54, %v3438_v54 }
  0xc3   :  { %1738 = vrsqrt.f32 %v913_v4  ;;  %v1731_v31 = vpop.eup %1730  ;;  %v1081_v15 = vmul.f32 %v1729_v6, %v3349_v51  ;;  %v3477_v40 = vmul.f32 %v1729_v6, %v3168_v39  ;;  %v3480_v29 = vmul.f32 %v1729_v6, %v3203_v59 }
  0xc4   :  { %v3483_v27 = vmul.f32 %v1729_v6, %v3248_v13  ;;  %v1733_v23 = vpop.eup %1732  ;;  %v847_v8 = vmul.f32 %v1731_v31, %v3291_v30  ;;  %v850_v57 = vmul.f32 %v1731_v31, %v3053_v11  ;;  %v853_v61 = vmul.f32 %v1731_v31, %v3063_v35 }
  0xc5   :  { %v856_v37 = vmul.f32 %v1731_v31, %v3069_v62  ;;  %v1735_v43 = vpop.eup %1734  ;;  %v3489_v51 = vadd.f32 %v1733_v23, %v961_v19  ;;  %1566 = vst [vmem:[%s3873_s1 + $0x320] sm:$0xff] %v1081_v15  ;;  %v1087_v39 = vmul.f32 %v3477_v40, %v3477_v40  ;;  %v1088_v59 = vmul.f32 %v3480_v29, %v3480_v29 }
  0xc6   :  { %v1090_v11 = vmul.f32 %v3483_v27, %v3483_v27  ;;  %1523 = vst [vmem:[%s3873_s1 + $0x180] sm:$0xff] %v847_v8  ;;  %1524 = vst [vmem:[%s3873_s1 + $0x188] sm:$0xff] %v850_v57  ;;  %1740 = vrsqrt.f32 %v1735_v43  ;;  %v1092_v35 = vmul.f32 %v3477_v40, %v3018_v32  ;;  %v1093_v62 = vmul.f32 %v3480_v29, %v3024_v20 }
  0xc7   :  { %1525 = vst [vmem:[%s3873_s1 + $0x190] sm:$0xff] %v853_v61  ;;  %1526 = vst [vmem:[%s3873_s1 + $0x198] sm:$0xff] %v856_v37  ;;  %v1095_v13 = vmul.f32 %v3483_v27, %v3027_v46  ;;  %v975_v30 = vmul.f32 %v3489_v51, %v3489_v51  ;;  %v1089_v18 = vadd.f32 %v1088_v59, %v1087_v39  ;;  %1742 = vrsqrt.f32 %v3469_v34 }
  0xc8   :  { %v1102_v22 = vmul.f32 %v3480_v29, %v3027_v46  ;;  %v1103_v38 = vmul.f32 %v3483_v27, %v3024_v20  ;;  %v1094_v12 = vadd.f32 %v1093_v62, %v1092_v35  ;;  %v1105_v48 = vmul.f32 %v3483_v27, %v3018_v32 }
  0xc9   :  { %v1106_v19 = vmul.f32 %v3477_v40, %v3027_v46  ;;  %v1108_v4 = vmul.f32 %v3477_v40, %v3024_v20  ;;  %v977_v6 = vadd.f32 %v976_v53, %v975_v30  ;;  %v1091_v31 = vadd.f32 %v1090_v11, %v1089_v18 }
  0xca   :  { %v3530_v15 = vsub.f32 %v1102_v22, %v1103_v38  ;;  %v1109_v23 = vmul.f32 %v3480_v29, %v3018_v32  ;;  %v1737_v8 = vpop.eup %1736  ;;  %v3534_v57 = vadd.f32 %v1095_v13, %v1094_v12  ;;  %v1282_v46 = vmul.f32 %v3467_v5, %v3467_v5 }
  0xcb   :  { %v3536_v61 = vsub.f32 %v1105_v48, %v1106_v19  ;;  %v979_v37 = vadd.f32 %v978_v25, %v977_v6  ;;  %v1098_v20 = vmul.f32 %v1091_v31, %v3059_v50  ;;  %v1281_v43 = vadd.f32 %v1280_v45, %v1279_v9 }
  0xcc   :  { %v3542_v53 = vsub.f32 %v1108_v4, %v1109_v23  ;;  %v1029_v59 = vsub.f32 0.0, %v3457_v49  ;;  %v1041_v32 = vmul.f32 %v3280_v26, %v3215_v52  ;;  %v1149_v11 = vmul.f32 %v1737_v8, %v3433_v1  ;;  %v1335_v26 = vld [vmem:[%s3872_s0] sm:$0xff] }
  0xcd   :  { %v1739_v39 = vpop.eup %1738  ;;  %v3549_v35 = vmul.f32 %v1737_v8, %v3355_v16  ;;  %v981_v9 = vadd.f32 %v3447_v55, %v979_v37  ;;  %1744 = vrsqrt.f32 %v1098_v20  ;;  %v3560_v52 = vmul.f32 %v1737_v8, %v3393_v21 }
  0xce   :  { %v915_v62 = vmul.f32 %v1739_v39, %v3387_v17  ;;  %v918_v25 = vmul.f32 %v1739_v39, %v3258_v56  ;;  %v921_v50 = vmul.f32 %v1739_v39, %v3260_v63  ;;  %v924_v13 = vmul.f32 %v1739_v39, %v3262_v7  ;;  %1577 = vst [vmem:[%s3873_s1 + $0x328] sm:$0xff] %v1149_v11  ;;  %v1604_v56 = vld [vmem:[%s3872_s0 + $0x8] sm:$0xff] }
  0xcf   :  { %v3582_v63 = vsub.f32 %v3454_v10, %v3461_v58  ;;  %v3585_v7 = vmul.f32 %v1737_v8, %v3399_v0  ;;  %v1155_v16 = vmul.f32 %v3549_v35, %v3549_v35  ;;  %v1283_v17 = vadd.f32 %v1282_v46, %v1281_v43  ;;  %v1605_v58 = vld [vmem:[%s3872_s0 + $0x10] sm:$0xff] }
  0xd0   :  { %1534 = vst [vmem:[%s3873_s1 + $0x1a0] sm:$0xff] %v915_v62  ;;  %1535 = vst [vmem:[%s3873_s1 + $0x1a8] sm:$0xff] %v918_v25  ;;  %v1741_v21 = vpop.eup %1740  ;;  %1746 = vrsqrt.f32 %v981_v9  ;;  %v3590_v1 = vsub.f32 %v3465_v60, %v1041_v32  ;;  %v1044_v55 = vmul.f32 %v3450_v3, %v3450_v3  ;;  %v1156_v49 = vmul.f32 %v3560_v52, %v3560_v52 }
  0xd1   :  { %1536 = vst [vmem:[%s3873_s1 + $0x1b0] sm:$0xff] %v921_v50  ;;  %1537 = vst [vmem:[%s3873_s1 + $0x1b8] sm:$0xff] %v924_v13  ;;  %v3596_v10 = vadd.f32 %v1741_v21, %v1029_v59  ;;  %v1158_v0 = vmul.f32 %v3585_v7, %v3585_v7  ;;  %v3604_v45 = vsub.f32 %v3143_v36, %v1335_v26  ;;  %1748 = vrsqrt.f32 %v1283_v17  ;;  %v1743_v38 = vpop.eup %1742 }
  0xd2   :  { %v3607_v60 = vsub.f32 %v3164_v33, %v1604_v56  ;;  %v1157_v30 = vadd.f32 %v1156_v49, %v1155_v16  ;;  %v1046_v22 = vmul.f32 %v3582_v63, %v3582_v63  ;;  %v1048_v12 = vmul.f32 %v3590_v1, %v3590_v1 }
  0xd3   :  { %v1043_v18 = vmul.f32 %v3596_v10, %v3596_v10  ;;  %v3616_v19 = vsub.f32 %v3230_v24, %v1605_v58  ;;  %v1217_v33 = vmul.f32 %v1743_v38, %v3469_v34  ;;  %v1344_v4 = vmul.f32 %v3604_v45, %v3604_v45 }
  0xd4   :  { %v1159_v48 = vadd.f32 %v1158_v0, %v1157_v30  ;;  %v1345_v6 = vmul.f32 %v3607_v60, %v3607_v60  ;;  %v3624_v8 = vmul.f32 %v1743_v38, %v3403_v28  ;;  %v3630_v24 = vmul.f32 %v1743_v38, %v3409_v47 }
  0xd5   :  { %v1045_v36 = vadd.f32 %v1044_v55, %v1043_v18  ;;  %1588 = vst [vmem:[%s3873_s1 + $0x330] sm:$0xff] %v1217_v33  ;;  %v3633_v34 = vmul.f32 %v1743_v38, %v3416_v41  ;;  %v1347_v28 = vmul.f32 %v3616_v19, %v3616_v19  ;;  %v1097_v56 = vsub.f32 0.0, %v3534_v57 }
  0xd6   :  { %v1166_v23 = vmul.f32 %v1159_v48, %v1091_v31  ;;  %v1223_v20 = vmul.f32 %v3624_v8, %v3624_v8  ;;  %v1224_v43 = vmul.f32 %v3630_v24, %v3630_v24  ;;  %v1346_v39 = vadd.f32 %v1345_v6, %v1344_v4 }
  0xd7   :  { %v1047_v46 = vadd.f32 %v1046_v22, %v1045_v36  ;;  %v1745_v37 = vpop.eup %1744  ;;  %v1226_v47 = vmul.f32 %v3633_v34, %v3633_v34  ;;  %v1163_v57 = vmul.f32 %v3585_v7, %v3483_v27  ;;  %v1112_v30 = vmul.f32 %v3530_v15, %v3530_v15 }
  0xd8   :  { %1750 = vrsqrt.f32 %v1166_v23  ;;  %v1225_v25 = vadd.f32 %v1224_v43, %v1223_v20  ;;  %v1114_v18 = vmul.f32 %v3536_v61, %v3536_v61  ;;  %v1174_v22 = vmul.f32 %v3549_v35, %v3483_v27 }
  0xd9   :  { %v1049_v31 = vadd.f32 %v1048_v12, %v1047_v46  ;;  %1752 = vrsqrt.f32 %v1745_v37  ;;  %v1170_v38 = vmul.f32 %v3560_v52, %v3483_v27  ;;  %v1171_v12 = vmul.f32 %v3585_v7, %v3480_v29 }
  0xda   :  { %v1747_v59 = vpop.eup %1746  ;;  %v1228_v23 = vmul.f32 %v3624_v8, %v3549_v35  ;;  %v1229_v46 = vmul.f32 %v3630_v24, %v3560_v52  ;;  %v1116_v43 = vmul.f32 %v3542_v53, %v3542_v53 }
  0xdb   :  { %v983_v41 = vmul.f32 %v1747_v59, %v3489_v51  ;;  %v986_v32 = vmul.f32 %v1747_v59, %v3343_v42  ;;  %v989_v11 = vmul.f32 %v1747_v59, %v3345_v44  ;;  %v992_v62 = vmul.f32 %v1747_v59, %v3347_v14  ;;  %v1749_v50 = vpop.eup %1748 }
  0xdc   :  { %1754 = vrsqrt.f32 %v1049_v31  ;;  %v1348_v42 = vadd.f32 %v1347_v28, %v1346_v39  ;;  %v1160_v44 = vmul.f32 %v3549_v35, %v3477_v40  ;;  %v1161_v14 = vmul.f32 %v3560_v52, %v3480_v29 }
  0xdd   :  { %1545 = vst [vmem:[%s3873_s1 + $0x1c0] sm:$0xff] %v983_v41  ;;  %1546 = vst [vmem:[%s3873_s1 + $0x1c8] sm:$0xff] %v986_v32  ;;  %v1227_v51 = vadd.f32 %v1226_v47, %v1225_v25  ;;  %v1285_v13 = vmul.f32 %v1749_v50, %v1283_v17  ;;  %v3664_v9 = vmul.f32 %v1749_v50, %v3431_v2 }
  0xde   :  { %1547 = vst [vmem:[%s3873_s1 + $0x1d0] sm:$0xff] %v989_v11  ;;  %1548 = vst [vmem:[%s3873_s1 + $0x1d8] sm:$0xff] %v992_v62  ;;  %v3667_v26 = vmul.f32 %v1749_v50, %v3438_v54  ;;  %v3674_v21 = vmul.f32 %v1749_v50, %v3467_v5  ;;  %1756 = vrsqrt.f32 %v1348_v42  ;;  %v1162_v54 = vadd.f32 %v1161_v14, %v1160_v44 }
  0xdf   :  { %v1234_v16 = vmul.f32 %v1227_v51, %v1159_v48  ;;  %1599 = vst [vmem:[%s3873_s1 + $0x338] sm:$0xff] %v1285_v13  ;;  %v1291_v17 = vmul.f32 %v3664_v9, %v3664_v9  ;;  %v1173_v48 = vmul.f32 %v3585_v7, %v3477_v40  ;;  %v1231_v32 = vmul.f32 %v3633_v34, %v3585_v7 }
  0xe0   :  { %v1292_v2 = vmul.f32 %v3667_v26, %v3667_v26  ;;  %v1294_v49 = vmul.f32 %v3674_v21, %v3674_v21  ;;  %v1164_v6 = vadd.f32 %v1163_v57, %v1162_v54  ;;  %v1230_v11 = vadd.f32 %v1229_v46, %v1228_v23 }
  0xe1   :  { %1758 = vrsqrt.f32 %v1234_v16  ;;  %v1296_v54 = vmul.f32 %v3664_v9, %v3624_v8  ;;  %v1297_v57 = vmul.f32 %v3667_v26, %v3630_v24  ;;  %v1299_v23 = vmul.f32 %v3674_v21, %v3633_v34 }
  0xe2   :  { %v1751_v55 = vpop.eup %1750  ;;  %v1293_v5 = vadd.f32 %v1292_v2, %v1291_v17  ;;  %v1165_v41 = vsub.f32 0.0, %v1164_v6  ;;  %v1232_v16 = vadd.f32 %v1231_v32, %v1230_v11  ;;  %v1238_v17 = vmul.f32 %v3630_v24, %v3585_v7 }
  0xe3   :  { %v1753_v0 = vpop.eup %1752  ;;  %1760 = vrsqrt.f32 %v1751_v55  ;;  %v1239_v2 = vmul.f32 %v3633_v34, %v3560_v52  ;;  %v1298_v6 = vadd.f32 %v1297_v57, %v1296_v54  ;;  %v1309_v32 = vmul.f32 %v3674_v21, %v3624_v8 }
  0xe4   :  { %v3684_v58 = vadd.f32 %v1753_v0, %v1097_v56  ;;  %v1295_v36 = vadd.f32 %v1294_v49, %v1293_v5  ;;  %v1310_v11 = vmul.f32 %v3664_v9, %v3633_v34 }
  0xe6   :  { %v1755_v33 = vpop.eup %1754  ;;  %v1111_v4 = vmul.f32 %v3684_v58, %v3684_v58  ;;  %v1302_v39 = vmul.f32 %v1295_v36, %v1227_v51  ;;  %v1245_v36 = vmul.f32 %v3630_v24, %v3549_v35 }
  0xe7   :  { %v1051_v27 = vmul.f32 %v1755_v33, %v3596_v10  ;;  %v1054_v37 = vmul.f32 %v1755_v33, %v3450_v3  ;;  %v1057_v20 = vmul.f32 %v1755_v33, %v3582_v63  ;;  %v1060_v28 = vmul.f32 %v1755_v33, %v3590_v1 }
  0xe8   :  { %v1113_v31 = vadd.f32 %v1112_v30, %v1111_v4  ;;  %v3722_v3 = vsub.f32 %v1170_v38, %v1171_v12  ;;  %v3724_v63 = vsub.f32 %v1173_v48, %v1174_v22  ;;  %v1176_v1 = vmul.f32 %v3549_v35, %v3480_v29  ;;  %v1757_v59 = vpop.eup %1756 }
  0xe9   :  { %1556 = vst [vmem:[%s3873_s1 + $0x1e0] sm:$0xff] %v1051_v27  ;;  %1557 = vst [vmem:[%s3873_s1 + $0x1e8] sm:$0xff] %v1054_v37  ;;  %v1177_v10 = vmul.f32 %v3560_v52, %v3477_v40  ;;  %1762 = vrsqrt.f32 %v1302_v39  ;;  %v1350_v62 = vmul.f32 %v1757_v59, %v1348_v42  ;;  %v3733_v25 = vmul.f32 %v1757_v59, %v3607_v60 }
  0xea   :  { %1558 = vst [vmem:[%s3873_s1 + $0x1f0] sm:$0xff] %v1057_v20  ;;  %1559 = vst [vmem:[%s3873_s1 + $0x1f8] sm:$0xff] %v1060_v28  ;;  %v1115_v47 = vadd.f32 %v1114_v18, %v1113_v31  ;;  %v3736_v50 = vmul.f32 %v1757_v59, %v3616_v19  ;;  %v3739_v14 = vmul.f32 %v1757_v59, %v3604_v45  ;;  %v1233_v38 = vsub.f32 0.0, %v1232_v16 }
  0xeb   :  { %v1759_v44 = vpop.eup %1758  ;;  %v3741_v51 = vsub.f32 %v1176_v1, %v1177_v10  ;;  %v1180_v13 = vmul.f32 %v3722_v3, %v3722_v3  ;;  %1609 = vst [vmem:[%s3873_s1 + $0x340] sm:$0xff] %v1350_v62  ;;  %v3750_v60 = vmul.f32 %v3733_v25, %v3733_v25  ;;  %v1182_v56 = vmul.f32 %v3724_v63, %v3724_v63 }
  0xec   :  { %v1117_v29 = vadd.f32 %v1116_v43, %v1115_v47  ;;  %1764 = vrsqrt.f32 %v1759_v44  ;;  %v1359_v45 = vmul.f32 %v3736_v50, %v3736_v50  ;;  %v1356_v42 = vmul.f32 %v3739_v14, %v3739_v14 }
  0xed   :  { %v1761_v40 = vpop.eup %1760  ;;  %v1184_v0 = vmul.f32 %v3741_v51, %v3741_v51  ;;  %v1241_v30 = vmul.f32 %v3633_v34, %v3549_v35  ;;  %v1242_v18 = vmul.f32 %v3624_v8, %v3585_v7  ;;  %v3777_v12 = vsub.f32 %v1238_v17, %v1239_v2 }
  0xee   :  { %1766 = vrsqrt.f32 %v1117_v29  ;;  %v3752_v19 = vadd.f32 %v1761_v40, %v1165_v41  ;;  %v1358_v49 = vadd.f32 %v3750_v60, %v1356_v42  ;;  %v1244_v48 = vmul.f32 %v3624_v8, %v3560_v52 }
  0xef   :  { %v1243_v7 = vsub.f32 %v1241_v30, %v1242_v18  ;;  %v1248_v20 = vmul.f32 %v3777_v12, %v3777_v12  ;;  %v1306_v52 = vmul.f32 %v3667_v26, %v3633_v34  ;;  %v1300_v31 = vadd.f32 %v1299_v23, %v1298_v6 }
  0xf0   :  { %v1179_v55 = vmul.f32 %v3752_v19, %v3752_v19  ;;  %v1360_v22 = vadd.f32 %v1359_v45, %v1358_v49  ;;  %v1246_v37 = vsub.f32 %v1244_v48, %v1245_v36  ;;  %v1307_v43 = vmul.f32 %v3674_v21, %v3630_v24 }
  0xf1   :  { %v1250_v41 = vmul.f32 %v1243_v7, %v1243_v7  ;;  %v1301_v34 = vsub.f32 0.0, %v1300_v31  ;;  %v1311_v29 = vsub.f32 %v1309_v32, %v1310_v11 }
  0xf2   :  { %v1181_v5 = vadd.f32 %v1180_v13, %v1179_v55  ;;  %1768 = vrsqrt.f32 %v1360_v22  ;;  %v1308_v21 = vsub.f32 %v1306_v52, %v1307_v43 }
  0xf3   :  { %v1763_v33 = vpop.eup %1762  ;;  %v1318_v2 = vmul.f32 %v1311_v29, %v1311_v29 }
  0xf4   :  { %v1183_v4 = vadd.f32 %v1182_v56, %v1181_v5  ;;  %1770 = vrsqrt.f32 %v1763_v33  ;;  %v1316_v56 = vmul.f32 %v1308_v21, %v1308_v21 }
  0xf6   :  { %v1185_v46 = vadd.f32 %v1184_v0, %v1183_v4  ;;  %v1765_v27 = vpop.eup %1764 }
  0xf7   :  { %v1237_v35 = vadd.f32 %v1765_v27, %v1233_v38 }
  0xf8   :  { %v1767_v28 = vpop.eup %1766  ;;  %1772 = vrsqrt.f32 %v1185_v46 }
  0xf9   :  { %v1119_v39 = vmul.f32 %v1767_v28, %v3684_v58  ;;  %v1122_v1 = vmul.f32 %v1767_v28, %v3530_v15  ;;  %v1125_v10 = vmul.f32 %v1767_v28, %v3536_v61  ;;  %v1128_v59 = vmul.f32 %v1767_v28, %v3542_v53 }
  0xfa   :  { %v1247_v47 = vmul.f32 %v1237_v35, %v1237_v35  ;;  %v1252_v15 = vmul.f32 %v1246_v37, %v1246_v37  ;;  %v1312_v61 = vmul.f32 %v3664_v9, %v3630_v24  ;;  %v1313_v58 = vmul.f32 %v3667_v26, %v3624_v8 }
  0xfb   :  { %1567 = vst [vmem:[%s3873_s1 + $0x200] sm:$0xff] %v1119_v39  ;;  %1568 = vst [vmem:[%s3873_s1 + $0x208] sm:$0xff] %v1122_v1 }
  0xfc   :  { %1569 = vst [vmem:[%s3873_s1 + $0x210] sm:$0xff] %v1125_v10  ;;  %1570 = vst [vmem:[%s3873_s1 + $0x218] sm:$0xff] %v1128_v59  ;;  %v1249_v53 = vadd.f32 %v1248_v20, %v1247_v47  ;;  %v1769_v62 = vpop.eup %1768  ;;  %v1314_v42 = vsub.f32 %v1312_v61, %v1313_v58 }
  0xfd   :  { %1774 = vrsqrt.f32 %v1769_v62 }
  0xfe   :  { %v1251_v44 = vadd.f32 %v1250_v41, %v1249_v53  ;;  %v1771_v40 = vpop.eup %1770  ;;  %v1320_v54 = vmul.f32 %v1314_v42, %v1314_v42 }
  0xff   :  { %v1305_v45 = vadd.f32 %v1771_v40, %v1301_v34 }
 0x100   :  { %v1253_v13 = vadd.f32 %v1252_v15, %v1251_v44 }
 0x101   :  { %v1315_v17 = vmul.f32 %v1305_v45, %v1305_v45 }
 0x102   :  { %v1773_v16 = vpop.eup %1772  ;;  %1776 = vrsqrt.f32 %v1253_v13 }
 0x103   :  { %v1187_v24 = vmul.f32 %v1773_v16, %v3752_v19  ;;  %v1190_v9 = vmul.f32 %v1773_v16, %v3722_v3  ;;  %v1193_v55 = vmul.f32 %v1773_v16, %v3724_v63  ;;  %v1196_v8 = vmul.f32 %v1773_v16, %v3741_v51 }
 0x104   :  { %v1317_v26 = vadd.f32 %v1316_v56, %v1315_v17  ;;  %v1364_v63 = vsub.f32 0.0, %v3736_v50 }
 0x105   :  { %1578 = vst [vmem:[%s3873_s1 + $0x220] sm:$0xff] %v1187_v24  ;;  %1579 = vst [vmem:[%s3873_s1 + $0x228] sm:$0xff] %v1190_v9 }
 0x106   :  { %1580 = vst [vmem:[%s3873_s1 + $0x230] sm:$0xff] %v1193_v55  ;;  %1581 = vst [vmem:[%s3873_s1 + $0x238] sm:$0xff] %v1196_v8  ;;  %v1319_v3 = vadd.f32 %v1318_v2, %v1317_v26  ;;  %v1367_v49 = vmul.f32 %v1364_v63, %v1364_v63 }
 0x107   :  { %v1775_v19 = vpop.eup %1774 }
 0x108   :  { %v1321_v51 = vadd.f32 %v1320_v54, %v1319_v3  ;;  %v1363_v57 = vadd.f32 %v1775_v19, %v3739_v14 }
 0x10a   :  { %1778 = vrsqrt.f32 %v1321_v51  ;;  %v1365_v5 = vmul.f32 %v1363_v57, %v1363_v57 }
 0x10c   :  { %v1777_v0 = vpop.eup %1776  ;;  %v1368_v48 = vadd.f32 %v1367_v49, %v1365_v5 }
 0x10d   :  { %v1255_v30 = vmul.f32 %v1777_v0, %v1237_v35  ;;  %v1258_v18 = vmul.f32 %v1777_v0, %v3777_v12  ;;  %v1261_v22 = vmul.f32 %v1777_v0, %v1243_v7  ;;  %v1264_v38 = vmul.f32 %v1777_v0, %v1246_v37 }
 0x10e   :  { %v1369_v50 = vadd.f32 %v1368_v48, %v3750_v60 }
 0x10f   :  { %1589 = vst [vmem:[%s3873_s1 + $0x240] sm:$0xff] %v1255_v30  ;;  %1590 = vst [vmem:[%s3873_s1 + $0x248] sm:$0xff] %v1258_v18 }
 0x110   :  { %1591 = vst [vmem:[%s3873_s1 + $0x250] sm:$0xff] %v1261_v22  ;;  %1592 = vst [vmem:[%s3873_s1 + $0x258] sm:$0xff] %v1264_v38  ;;  %1780 = vrsqrt.f32 %v1369_v50 }
 0x114   :  { %v1779_v14 = vpop.eup %1778 }
 0x115   :  { %v1323_v12 = vmul.f32 %v1779_v14, %v1305_v45  ;;  %v1326_v36 = vmul.f32 %v1779_v14, %v1308_v21  ;;  %v1329_v33 = vmul.f32 %v1779_v14, %v1311_v29  ;;  %v1332_v4 = vmul.f32 %v1779_v14, %v1314_v42 }
 0x117   :  { %1600 = vst [vmem:[%s3873_s1 + $0x260] sm:$0xff] %v1323_v12  ;;  %1601 = vst [vmem:[%s3873_s1 + $0x268] sm:$0xff] %v1326_v36 }
 0x118   :  { %1602 = vst [vmem:[%s3873_s1 + $0x270] sm:$0xff] %v1329_v33  ;;  %1603 = vst [vmem:[%s3873_s1 + $0x278] sm:$0xff] %v1332_v4 }
 0x11a   :  { %v1781_v60 = vpop.eup %1780 }
 0x11b   :  { %v1371_v6 = vmul.f32 %v1781_v60, %v1363_v57  ;;  %v1374_v23 = vmul.f32 0.0, %v1781_v60  ;;  %v1377_v46 = vmul.f32 %v1781_v60, %v1364_v63  ;;  %v1380_v7 = vmul.f32 %v1781_v60, %v3733_v25 }
 0x11d   :  { %1610 = vst [vmem:[%s3873_s1 + $0x280] sm:$0xff] %v1371_v6  ;;  %1611 = vst [vmem:[%s3873_s1 + $0x288] sm:$0xff] %v1374_v23 }
 0x11e   :  { %1612 = vst [vmem:[%s3873_s1 + $0x290] sm:$0xff] %v1377_v46  ;;  %1613 = vst [vmem:[%s3873_s1 + $0x298] sm:$0xff] %v1380_v7 }

</bundles_post_ra>
